<compile_context>
chip_gen: v7x
topology: tpu7x:2x2x1
jax: 0.10.0
libtpu: 0.0.40
codegen_flags: <defaults>
</compile_context>

<pallas_src>
import functools

import jax
import jax.numpy as jnp
import numpy as np
from jax.experimental import pallas as pl
from jax.experimental.pallas import tpu as pltpu


# ----------------------------------------------------------------------------
# Fused Bottleneck block kernel
# ----------------------------------------------------------------------------
def _bottleneck_kernel(x_ref, w1_ref, b1_ref, w2_ref, b2_ref, w3_ref, b3_ref,
                       *rest, stride, H, W, has_down):
    if has_down:
        wd_ref, bd_ref, o_ref, hp_ref = rest
    else:
        o_ref, hp_ref = rest

    P = w1_ref.shape[1]            # bottleneck width ("planes")
    out_ch = w3_ref.shape[1]
    Ho, Wo = H // stride, W // stride
    M2 = Ho * Wo                                  # rows of the block output
    M1 = (4 * M2) if stride == 2 else (H * W)     # rows entering conv1

    xb = x_ref[...]
    cin = xb.shape[-1]
    x2d = xb.reshape(M1, cin)                     # f32 (identity path)
    x_bf = x2d.astype(jnp.bfloat16)               # MXU operand

    # ---- conv1: 1x1, cin -> P, ReLU (bf16 MXU, f32 accumulate/epilogue) ----
    h1 = jnp.dot(x_bf, w1_ref[...], preferred_element_type=jnp.float32)
    h1 = jnp.maximum(h1 + b1_ref[...], 0.0)

    # ---- stage the zero-padded conv1 output in VMEM for the 3x3 conv ----
    hp_ref[...] = jnp.zeros_like(hp_ref)
    if stride == 1:
        hp_ref[1:H + 1, 1:W + 1, :] = h1.reshape(H, W, P)
    else:
        # parity-major layout: hp[py*2+px, 1+iy, 1+ix] = conv1(x)[2iy+py, 2ix+px]
        hp_ref[:, 1:Ho + 1, 1:Wo + 1, :] = h1.reshape(4, Ho, Wo, P)

    # ---- conv2: 3x3 (stride s), P -> P, ReLU; 9-tap accumulation in VMEM ----
    acc2 = jnp.zeros((M2, P), jnp.float32)
    for dy in range(3):
        for dx in range(3):
            if stride == 1:
                slab = hp_ref[dy:dy + Ho, dx:dx + Wo, :]
            else:
                pidx = (0 if dy == 1 else 1) * 2 + (0 if dx == 1 else 1)
                ay = 0 if dy == 0 else 1
                ax = 0 if dx == 0 else 1
                slab = hp_ref[pidx, ay:ay + Ho, ax:ax + Wo, :]
            tap = dy * 3 + dx
            acc2 += jnp.dot(slab.reshape(M2, P).astype(jnp.bfloat16),
                            w2_ref[tap * P:(tap + 1) * P, :],
                            preferred_element_type=jnp.float32)
    h2 = jnp.maximum(acc2 + b2_ref[...], 0.0).astype(jnp.bfloat16)

    # ---- identity / fused 1x1 (strided) downsample ----
    if has_down:
        # stride 2: parity (0,0) rows of the permuted input == x[:, ::2, ::2, :]
        idn = x_bf[:M2, :] if stride == 2 else x_bf
        ident = jnp.dot(idn, wd_ref[...],
                        preferred_element_type=jnp.float32) + bd_ref[...]
    else:
        ident = x2d                                # cin == out_ch here

    # ---- conv3: 1x1, P -> out_ch, + residual, ReLU ----
    out = jnp.dot(h2, w3_ref[...], preferred_element_type=jnp.float32)
    out = jnp.maximum(out + b3_ref[...] + ident, 0.0)
    o_ref[...] = out.reshape(1, M2, out_ch).astype(o_ref.dtype)


# ----------------------------------------------------------------------------
# Wrapper: one pallas_call per Bottleneck block
# ----------------------------------------------------------------------------
def bottleneck_fused(x, params, stride):
    """x: NHWC f32. Returns NHWC f32."""
    N, H, W, C = x.shape
    w1, b1 = params["conv1"]
    w2, b2 = params["conv2"]
    w3, b3 = params["conv3"]
    P = w1.shape[1]
    out_ch = w3.shape[1]
    has_down = "down" in params
    Ho, Wo = H // stride, W // stride
    M2 = Ho * Wo

    if stride == 1:
        x_in = x
        x_spec = pl.BlockSpec((1, H, W, C), lambda n: (n, 0, 0, 0))
        hp_shape = (H + 2, W + 2, P)
    else:
        assert stride == 2 and H % 2 == 0 and W % 2 == 0, (stride, H, W)
        # wrapper-side parity (space-to-depth) permutation: (py,px) major, then
        # (n, iy, ix, c); keeps every in-kernel slice static & stride-1.
        x_in = (x.reshape(N, Ho, 2, Wo, 2, C)
                 .transpose(2, 4, 0, 1, 3, 5)
                 .reshape(4, N, M2, C))
        x_spec = pl.BlockSpec((4, 1, M2, C), lambda n: (0, n, 0, 0))
        hp_shape = (4, Ho + 2, Wo + 2, P)

    def full2d(a):
        return pl.BlockSpec(a.shape, lambda n: (0, 0))   # VMEM-resident weights

    args = [x_in, w1, b1, w2, b2, w3, b3]
    in_specs = [x_spec] + [full2d(a) for a in args[1:]]
    if has_down:
        wd, bd = params["down"]
        args += [wd, bd]
        in_specs += [full2d(wd), full2d(bd)]

    kernel = functools.partial(
        _bottleneck_kernel, stride=stride, H=H, W=W, has_down=has_down)

    out = pl.pallas_call(
        kernel,
        out_shape=jax.ShapeDtypeStruct((N, M2, out_ch), jnp.float32),
        grid=(N,),
        in_specs=in_specs,
        out_specs=pl.BlockSpec((1, M2, out_ch), lambda n: (n, 0, 0)),
        scratch_shapes=[pltpu.VMEM(hp_shape, jnp.float32)],
        compiler_params=pltpu.CompilerParams(
            dimension_semantics=("parallel",)),
    )(*args)
    return out.reshape(N, Ho, Wo, out_ch)


# ----------------------------------------------------------------------------
# Deterministic parameter construction (BN folded, eval semantics)
# ----------------------------------------------------------------------------
def _conv_params(key, k_in, k_out):
    kw, kb = jax.random.split(key)
    w = (jax.random.normal(kw, (k_in, k_out), jnp.float32)
         * (0.2 / np.sqrt(k_in))).astype(jnp.bfloat16)      # MXU operand dtype
    b = jax.random.normal(kb, (1, k_out), jnp.float32) * 0.01
    return w, b


def make_layer(key, inplanes, planes, num_blocks, stride):
    """Parameters for one ResNet stage (expansion = 4)."""
    out_ch = planes * 4
    blocks = []
    keys = jax.random.split(key, num_blocks * 4)
    for i in range(num_blocks):
        k1, k2, k3, kd = keys[4 * i:4 * i + 4]
        cin = inplanes if i == 0 else out_ch
        p = {
            "conv1": _conv_params(k1, cin, planes),
            "conv2": _conv_params(k2, 9 * planes, planes),
            "conv3": _conv_params(k3, planes, out_ch),
        }
        if i == 0 and (stride != 1 or cin != out_ch):
            p["down"] = _conv_params(kd, cin, out_ch)
        blocks.append(p)
    return blocks


def shared_module_bh_forward(x_nchw, layer3_params, layer4_params,
                             layer3_stride, layer4_stride):
    """Equivalent of Shared_module_bh.forward for model_name='resnet50'."""
    x = jnp.transpose(x_nchw, (0, 2, 3, 1))          # NCHW -> NHWC
    for i, p in enumerate(layer3_params):
        x = bottleneck_fused(x, p, layer3_stride if i == 0 else 1)
    x_sh3 = x
    for i, p in enumerate(layer4_params):
        x = bottleneck_fused(x, p, layer4_stride if i == 0 else 1)
    x_sh4 = x
    # back to NCHW to match the PyTorch output convention
    return (jnp.transpose(x_sh3, (0, 3, 1, 2)),
            jnp.transpose(x_sh4, (0, 3, 1, 2)))


# ----------------------------------------------------------------------------
if __name__ == "__main__":
    # Scaled-down ResNet-50 stage-3 / stage-4 (real sizes /8):
    #   layer3: 6 bottlenecks, planes=32, out=128, first stride 2
    #   layer4: 3 bottlenecks, planes=64, out=256, stride 1 (drop_last_stride)
    drop_last_stride = True
    C_IN, PLANES3, PLANES4 = 64, 32, 64
    N_, H_, W_ = 2, 16, 16

    key = jax.random.PRNGKey(0)
    kx, k3, k4 = jax.random.split(key, 3)

    x = jax.random.normal(kx, (N_, C_IN, H_, W_), jnp.float32)   # NCHW input

    layer3_stride = 2
    layer4_stride = 1 if drop_last_stride else 2
    layer3_params = make_layer(k3, C_IN, PLANES3, 6, stride=layer3_stride)
    layer4_params = make_layer(k4, PLANES3 * 4, PLANES4, 3, stride=layer4_stride)

    fwd = jax.jit(functools.partial(
        shared_module_bh_forward,
        layer3_params=layer3_params, layer4_params=layer4_params,
        layer3_stride=layer3_stride, layer4_stride=layer4_stride))

    x_sh3, x_sh4 = fwd(x)
    jax.block_until_ready((x_sh3, x_sh4))

    assert x_sh3.shape == (N_, PLANES3 * 4, H_ // 2, W_ // 2), x_sh3.shape
    exp_hw = (H_ // 2) if drop_last_stride else (H_ // 4)
    assert x_sh4.shape == (N_, PLANES4 * 4, exp_hw, exp_hw), x_sh4.shape
    assert jnp.all(jnp.isfinite(x_sh3)) and jnp.all(jnp.isfinite(x_sh4))

    print("KERNEL_OK")
</pallas_src>

<mosaic_0001>
module attributes {stable_mosaic.version = 11 : i64} {
  func.func @_bottleneck_kernel(%arg0: i32, %arg1: memref<1x8x8x128xf32, #tpu.memory_space<vmem>>, %arg2: memref<128x32xbf16, #tpu.memory_space<vmem>>, %arg3: memref<1x32xf32, #tpu.memory_space<vmem>>, %arg4: memref<288x32xbf16, #tpu.memory_space<vmem>>, %arg5: memref<1x32xf32, #tpu.memory_space<vmem>>, %arg6: memref<32x128xbf16, #tpu.memory_space<vmem>>, %arg7: memref<1x128xf32, #tpu.memory_space<vmem>>, %arg8: memref<1x64x128xf32, #tpu.memory_space<vmem>>, %arg9: memref<10x10x32xf32, #tpu.memory_space<vmem>>) attributes {dimension_semantics = [#tpu.dimension_semantics<parallel>], iteration_bounds = array<i64: 2>, scalar_prefetch = 0 : i64, scratch_operands = 1 : i64, tpu.core_type = #tpu.core_type<tc>, window_params = [{transform_indices = @transform_0, window_bounds = array<i64: 1, 8, 8, 128>}, {pipeline_mode = #tpu.pipeline_mode<synchronous>, transform_indices = @transform_1, window_bounds = array<i64: 128, 32>}, {pipeline_mode = #tpu.pipeline_mode<synchronous>, transform_indices = @transform_2, window_bounds = array<i64: 1, 32>}, {pipeline_mode = #tpu.pipeline_mode<synchronous>, transform_indices = @transform_3, window_bounds = array<i64: 288, 32>}, {pipeline_mode = #tpu.pipeline_mode<synchronous>, transform_indices = @transform_4, window_bounds = array<i64: 1, 32>}, {pipeline_mode = #tpu.pipeline_mode<synchronous>, transform_indices = @transform_5, window_bounds = array<i64: 32, 128>}, {pipeline_mode = #tpu.pipeline_mode<synchronous>, transform_indices = @transform_6, window_bounds = array<i64: 1, 128>}, {transform_indices = @transform_7, window_bounds = array<i64: 1, 64, 128>}]} {
    %c0 = arith.constant 0 : index
    %c0_0 = arith.constant 0 : index
    %c0_1 = arith.constant 0 : index
    %c0_2 = arith.constant 0 : index
    %0 = vector.load %arg1[%c0, %c0_0, %c0_1, %c0_2] : memref<1x8x8x128xf32, #tpu.memory_space<vmem>>, vector<1x8x8x128xf32>
    %1 = vector.shape_cast %0 : vector<1x8x8x128xf32> to vector<64x128xf32>
    %2 = arith.truncf %1 : vector<64x128xf32> to vector<64x128xbf16>
    %c0_3 = arith.constant 0 : index
    %c0_4 = arith.constant 0 : index
    %3 = vector.load %arg2[%c0_3, %c0_4] : memref<128x32xbf16, #tpu.memory_space<vmem>>, vector<128x32xbf16>
    %cst = arith.constant dense<0.000000e+00> : vector<64x32xf32>
    %4 = tpu.matmul %2, %3, %cst {dimension_numbers = #tpu.dot_dimension_numbers<[1], [0], [0], [1], [0, 0, 1, 1], [], []>} : vector<64x128xbf16>, vector<128x32xbf16>, vector<64x32xf32> -> vector<64x32xf32>
    %c0_5 = arith.constant 0 : index
    %c0_6 = arith.constant 0 : index
    %5 = vector.load %arg3[%c0_5, %c0_6] : memref<1x32xf32, #tpu.memory_space<vmem>>, vector<1x32xf32>
    %6 = vector.broadcast %5 : vector<1x32xf32> to vector<64x32xf32>
    %7 = arith.addf %4, %6 : vector<64x32xf32>
    %cst_7 = arith.constant 0.000000e+00 : f32
    %8 = vector.broadcast %cst_7 : f32 to vector<64x32xf32>
    %9 = arith.maximumf %7, %8 : vector<64x32xf32>
    %cst_8 = arith.constant 0.000000e+00 : f32
    %10 = vector.broadcast %cst_8 : f32 to vector<10x10x32xf32>
    %c0_9 = arith.constant 0 : index
    %c0_10 = arith.constant 0 : index
    %c0_11 = arith.constant 0 : index
    %11 = vector.load %arg9[%c0_9, %c0_10, %c0_11] : memref<10x10x32xf32, #tpu.memory_space<vmem>>, vector<10x10x32xf32>
    tpu.vector_store %arg9[%c0_9, %c0_10, %c0_11], %10 {strides = array<i32>} : memref<10x10x32xf32, #tpu.memory_space<vmem>>, vector<10x10x32xf32>,
    %12 = vector.shape_cast %9 : vector<64x32xf32> to vector<8x8x32xf32>
    %c1 = arith.constant 1 : index
    %c1_12 = arith.constant 1 : index
    %c0_13 = arith.constant 0 : index
    %13 = vector.load %arg9[%c1, %c1_12, %c0_13] : memref<10x10x32xf32, #tpu.memory_space<vmem>>, vector<8x8x32xf32>
    tpu.vector_store %arg9[%c1, %c1_12, %c0_13], %12 {strides = array<i32>} : memref<10x10x32xf32, #tpu.memory_space<vmem>>, vector<8x8x32xf32>,
    %cst_14 = arith.constant 0.000000e+00 : f32
    %14 = vector.broadcast %cst_14 : f32 to vector<64x32xf32>
    %c0_15 = arith.constant 0 : index
    %c0_16 = arith.constant 0 : index
    %c0_17 = arith.constant 0 : index
    %15 = vector.load %arg9[%c0_15, %c0_16, %c0_17] : memref<10x10x32xf32, #tpu.memory_space<vmem>>, vector<8x8x32xf32>
    %16 = vector.shape_cast %15 : vector<8x8x32xf32> to vector<64x32xf32>
    %17 = arith.truncf %16 : vector<64x32xf32> to vector<64x32xbf16>
    %c0_18 = arith.constant 0 : index
    %c0_19 = arith.constant 0 : index
    %18 = vector.load %arg4[%c0_18, %c0_19] : memref<288x32xbf16, #tpu.memory_space<vmem>>, vector<32x32xbf16>
    %cst_20 = arith.constant dense<0.000000e+00> : vector<64x32xf32>
    %19 = tpu.matmul %17, %18, %cst_20 {dimension_numbers = #tpu.dot_dimension_numbers<[1], [0], [0], [1], [0, 0, 1, 1], [], []>} : vector<64x32xbf16>, vector<32x32xbf16>, vector<64x32xf32> -> vector<64x32xf32>
    %20 = arith.addf %14, %19 : vector<64x32xf32>
    %c0_21 = arith.constant 0 : index
    %c1_22 = arith.constant 1 : index
    %c0_23 = arith.constant 0 : index
    %21 = vector.load %arg9[%c0_21, %c1_22, %c0_23] : memref<10x10x32xf32, #tpu.memory_space<vmem>>, vector<8x8x32xf32>
    %22 = vector.shape_cast %21 : vector<8x8x32xf32> to vector<64x32xf32>
    %23 = arith.truncf %22 : vector<64x32xf32> to vector<64x32xbf16>
    %c32 = arith.constant 32 : index
    %c0_24 = arith.constant 0 : index
    %24 = vector.load %arg4[%c32, %c0_24] : memref<288x32xbf16, #tpu.memory_space<vmem>>, vector<32x32xbf16>
    %cst_25 = arith.constant dense<0.000000e+00> : vector<64x32xf32>
    %25 = tpu.matmul %23, %24, %cst_25 {dimension_numbers = #tpu.dot_dimension_numbers<[1], [0], [0], [1], [0, 0, 1, 1], [], []>} : vector<64x32xbf16>, vector<32x32xbf16>, vector<64x32xf32> -> vector<64x32xf32>
    %26 = arith.addf %20, %25 : vector<64x32xf32>
    %c0_26 = arith.constant 0 : index
    %c2 = arith.constant 2 : index
    %c0_27 = arith.constant 0 : index
    %27 = vector.load %arg9[%c0_26, %c2, %c0_27] : memref<10x10x32xf32, #tpu.memory_space<vmem>>, vector<8x8x32xf32>
    %28 = vector.shape_cast %27 : vector<8x8x32xf32> to vector<64x32xf32>
    %29 = arith.truncf %28 : vector<64x32xf32> to vector<64x32xbf16>
    %c64 = arith.constant 64 : index
    %c0_28 = arith.constant 0 : index
    %30 = vector.load %arg4[%c64, %c0_28] : memref<288x32xbf16, #tpu.memory_space<vmem>>, vector<32x32xbf16>
    %cst_29 = arith.constant dense<0.000000e+00> : vector<64x32xf32>
    %31 = tpu.matmul %29, %30, %cst_29 {dimension_numbers = #tpu.dot_dimension_numbers<[1], [0], [0], [1], [0, 0, 1, 1], [], []>} : vector<64x32xbf16>, vector<32x32xbf16>, vector<64x32xf32> -> vector<64x32xf32>
    %32 = arith.addf %26, %31 : vector<64x32xf32>
    %c1_30 = arith.constant 1 : index
    %c0_31 = arith.constant 0 : index
    %c0_32 = arith.constant 0 : index
    %33 = vector.load %arg9[%c1_30, %c0_31, %c0_32] : memref<10x10x32xf32, #tpu.memory_space<vmem>>, vector<8x8x32xf32>
    %34 = vector.shape_cast %33 : vector<8x8x32xf32> to vector<64x32xf32>
    %35 = arith.truncf %34 : vector<64x32xf32> to vector<64x32xbf16>
    %c96 = arith.constant 96 : index
    %c0_33 = arith.constant 0 : index
    %36 = vector.load %arg4[%c96, %c0_33] : memref<288x32xbf16, #tpu.memory_space<vmem>>, vector<32x32xbf16>
    %cst_34 = arith.constant dense<0.000000e+00> : vector<64x32xf32>
    %37 = tpu.matmul %35, %36, %cst_34 {dimension_numbers = #tpu.dot_dimension_numbers<[1], [0], [0], [1], [0, 0, 1, 1], [], []>} : vector<64x32xbf16>, vector<32x32xbf16>, vector<64x32xf32> -> vector<64x32xf32>
    %38 = arith.addf %32, %37 : vector<64x32xf32>
    %c1_35 = arith.constant 1 : index
    %c1_36 = arith.constant 1 : index
    %c0_37 = arith.constant 0 : index
    %39 = vector.load %arg9[%c1_35, %c1_36, %c0_37] : memref<10x10x32xf32, #tpu.memory_space<vmem>>, vector<8x8x32xf32>
    %40 = vector.shape_cast %39 : vector<8x8x32xf32> to vector<64x32xf32>
    %41 = arith.truncf %40 : vector<64x32xf32> to vector<64x32xbf16>
    %c128 = arith.constant 128 : index
    %c0_38 = arith.constant 0 : index
    %42 = vector.load %arg4[%c128, %c0_38] : memref<288x32xbf16, #tpu.memory_space<vmem>>, vector<32x32xbf16>
    %cst_39 = arith.constant dense<0.000000e+00> : vector<64x32xf32>
    %43 = tpu.matmul %41, %42, %cst_39 {dimension_numbers = #tpu.dot_dimension_numbers<[1], [0], [0], [1], [0, 0, 1, 1], [], []>} : vector<64x32xbf16>, vector<32x32xbf16>, vector<64x32xf32> -> vector<64x32xf32>
    %44 = arith.addf %38, %43 : vector<64x32xf32>
    %c1_40 = arith.constant 1 : index
    %c2_41 = arith.constant 2 : index
    %c0_42 = arith.constant 0 : index
    %45 = vector.load %arg9[%c1_40, %c2_41, %c0_42] : memref<10x10x32xf32, #tpu.memory_space<vmem>>, vector<8x8x32xf32>
    %46 = vector.shape_cast %45 : vector<8x8x32xf32> to vector<64x32xf32>
    %47 = arith.truncf %46 : vector<64x32xf32> to vector<64x32xbf16>
    %c160 = arith.constant 160 : index
    %c0_43 = arith.constant 0 : index
    %48 = vector.load %arg4[%c160, %c0_43] : memref<288x32xbf16, #tpu.memory_space<vmem>>, vector<32x32xbf16>
    %cst_44 = arith.constant dense<0.000000e+00> : vector<64x32xf32>
    %49 = tpu.matmul %47, %48, %cst_44 {dimension_numbers = #tpu.dot_dimension_numbers<[1], [0], [0], [1], [0, 0, 1, 1], [], []>} : vector<64x32xbf16>, vector<32x32xbf16>, vector<64x32xf32> -> vector<64x32xf32>
    %50 = arith.addf %44, %49 : vector<64x32xf32>
    %c2_45 = arith.constant 2 : index
    %c0_46 = arith.constant 0 : index
    %c0_47 = arith.constant 0 : index
    %51 = vector.load %arg9[%c2_45, %c0_46, %c0_47] : memref<10x10x32xf32, #tpu.memory_space<vmem>>, vector<8x8x32xf32>
    %52 = vector.shape_cast %51 : vector<8x8x32xf32> to vector<64x32xf32>
    %53 = arith.truncf %52 : vector<64x32xf32> to vector<64x32xbf16>
    %c192 = arith.constant 192 : index
    %c0_48 = arith.constant 0 : index
    %54 = vector.load %arg4[%c192, %c0_48] : memref<288x32xbf16, #tpu.memory_space<vmem>>, vector<32x32xbf16>
    %cst_49 = arith.constant dense<0.000000e+00> : vector<64x32xf32>
    %55 = tpu.matmul %53, %54, %cst_49 {dimension_numbers = #tpu.dot_dimension_numbers<[1], [0], [0], [1], [0, 0, 1, 1], [], []>} : vector<64x32xbf16>, vector<32x32xbf16>, vector<64x32xf32> -> vector<64x32xf32>
    %56 = arith.addf %50, %55 : vector<64x32xf32>
    %c2_50 = arith.constant 2 : index
    %c1_51 = arith.constant 1 : index
    %c0_52 = arith.constant 0 : index
    %57 = vector.load %arg9[%c2_50, %c1_51, %c0_52] : memref<10x10x32xf32, #tpu.memory_space<vmem>>, vector<8x8x32xf32>
    %58 = vector.shape_cast %57 : vector<8x8x32xf32> to vector<64x32xf32>
    %59 = arith.truncf %58 : vector<64x32xf32> to vector<64x32xbf16>
    %c224 = arith.constant 224 : index
    %c0_53 = arith.constant 0 : index
    %60 = vector.load %arg4[%c224, %c0_53] : memref<288x32xbf16, #tpu.memory_space<vmem>>, vector<32x32xbf16>
    %cst_54 = arith.constant dense<0.000000e+00> : vector<64x32xf32>
    %61 = tpu.matmul %59, %60, %cst_54 {dimension_numbers = #tpu.dot_dimension_numbers<[1], [0], [0], [1], [0, 0, 1, 1], [], []>} : vector<64x32xbf16>, vector<32x32xbf16>, vector<64x32xf32> -> vector<64x32xf32>
    %62 = arith.addf %56, %61 : vector<64x32xf32>
    %c2_55 = arith.constant 2 : index
    %c2_56 = arith.constant 2 : index
    %c0_57 = arith.constant 0 : index
    %63 = vector.load %arg9[%c2_55, %c2_56, %c0_57] : memref<10x10x32xf32, #tpu.memory_space<vmem>>, vector<8x8x32xf32>
    %64 = vector.shape_cast %63 : vector<8x8x32xf32> to vector<64x32xf32>
    %65 = arith.truncf %64 : vector<64x32xf32> to vector<64x32xbf16>
    %c256 = arith.constant 256 : index
    %c0_58 = arith.constant 0 : index
    %66 = vector.load %arg4[%c256, %c0_58] : memref<288x32xbf16, #tpu.memory_space<vmem>>, vector<32x32xbf16>
    %cst_59 = arith.constant dense<0.000000e+00> : vector<64x32xf32>
    %67 = tpu.matmul %65, %66, %cst_59 {dimension_numbers = #tpu.dot_dimension_numbers<[1], [0], [0], [1], [0, 0, 1, 1], [], []>} : vector<64x32xbf16>, vector<32x32xbf16>, vector<64x32xf32> -> vector<64x32xf32>
    %68 = arith.addf %62, %67 : vector<64x32xf32>
    %c0_60 = arith.constant 0 : index
    %c0_61 = arith.constant 0 : index
    %69 = vector.load %arg5[%c0_60, %c0_61] : memref<1x32xf32, #tpu.memory_space<vmem>>, vector<1x32xf32>
    %70 = vector.broadcast %69 : vector<1x32xf32> to vector<64x32xf32>
    %71 = arith.addf %68, %70 : vector<64x32xf32>
    %cst_62 = arith.constant 0.000000e+00 : f32
    %72 = vector.broadcast %cst_62 : f32 to vector<64x32xf32>
    %73 = arith.maximumf %71, %72 : vector<64x32xf32>
    %74 = arith.truncf %73 : vector<64x32xf32> to vector<64x32xbf16>
    %c0_63 = arith.constant 0 : index
    %c0_64 = arith.constant 0 : index
    %75 = vector.load %arg6[%c0_63, %c0_64] : memref<32x128xbf16, #tpu.memory_space<vmem>>, vector<32x128xbf16>
    %cst_65 = arith.constant dense<0.000000e+00> : vector<64x128xf32>
    %76 = tpu.matmul %74, %75, %cst_65 {dimension_numbers = #tpu.dot_dimension_numbers<[1], [0], [0], [1], [0, 0, 1, 1], [], []>} : vector<64x32xbf16>, vector<32x128xbf16>, vector<64x128xf32> -> vector<64x128xf32>
    %c0_66 = arith.constant 0 : index
    %c0_67 = arith.constant 0 : index
    %77 = vector.load %arg7[%c0_66, %c0_67] : memref<1x128xf32, #tpu.memory_space<vmem>>, vector<1x128xf32>
    %78 = vector.broadcast %77 : vector<1x128xf32> to vector<64x128xf32>
    %79 = arith.addf %76, %78 : vector<64x128xf32>
    %80 = arith.addf %79, %1 : vector<64x128xf32>
    %cst_68 = arith.constant 0.000000e+00 : f32
    %81 = vector.broadcast %cst_68 : f32 to vector<64x128xf32>
    %82 = arith.maximumf %80, %81 : vector<64x128xf32>
    %83 = vector.shape_cast %82 : vector<64x128xf32> to vector<1x64x128xf32>
    %c0_69 = arith.constant 0 : index
    %c0_70 = arith.constant 0 : index
    %c0_71 = arith.constant 0 : index
    %84 = vector.load %arg8[%c0_69, %c0_70, %c0_71] : memref<1x64x128xf32, #tpu.memory_space<vmem>>, vector<1x64x128xf32>
    tpu.vector_store %arg8[%c0_69, %c0_70, %c0_71], %83 {strides = array<i32>} : memref<1x64x128xf32, #tpu.memory_space<vmem>>, vector<1x64x128xf32>,
    return
  }
  func.func @transform_0(%arg0: i32) -> (i32, i32, i32, i32) {
    %c0_i32 = arith.constant 0 : i32
    %c0_i32_0 = arith.constant 0 : i32
    %c0_i32_1 = arith.constant 0 : i32
    %c0_i32_2 = arith.constant 0 : i32
    return %arg0, %c0_i32, %c0_i32_0, %c0_i32_1 : i32, i32, i32, i32
  }
  func.func @transform_1(%arg0: i32) -> (i32, i32) {
    %c0_i32 = arith.constant 0 : i32
    %c0_i32_0 = arith.constant 0 : i32
    %c0_i32_1 = arith.constant 0 : i32
    return %c0_i32, %c0_i32_0 : i32, i32
  }
  func.func @transform_2(%arg0: i32) -> (i32, i32) {
    %c0_i32 = arith.constant 0 : i32
    %c0_i32_0 = arith.constant 0 : i32
    %c0_i32_1 = arith.constant 0 : i32
    return %c0_i32, %c0_i32_0 : i32, i32
  }
  func.func @transform_3(%arg0: i32) -> (i32, i32) {
    %c0_i32 = arith.constant 0 : i32
    %c0_i32_0 = arith.constant 0 : i32
    %c0_i32_1 = arith.constant 0 : i32
    return %c0_i32, %c0_i32_0 : i32, i32
  }
  func.func @transform_4(%arg0: i32) -> (i32, i32) {
    %c0_i32 = arith.constant 0 : i32
    %c0_i32_0 = arith.constant 0 : i32
    %c0_i32_1 = arith.constant 0 : i32
    return %c0_i32, %c0_i32_0 : i32, i32
  }
  func.func @transform_5(%arg0: i32) -> (i32, i32) {
    %c0_i32 = arith.constant 0 : i32
    %c0_i32_0 = arith.constant 0 : i32
    %c0_i32_1 = arith.constant 0 : i32
    return %c0_i32, %c0_i32_0 : i32, i32
  }
  func.func @transform_6(%arg0: i32) -> (i32, i32) {
    %c0_i32 = arith.constant 0 : i32
    %c0_i32_0 = arith.constant 0 : i32
    %c0_i32_1 = arith.constant 0 : i32
    return %c0_i32, %c0_i32_0 : i32, i32
  }
  func.func @transform_7(%arg0: i32) -> (i32, i32, i32) {
    %c0_i32 = arith.constant 0 : i32
    %c0_i32_0 = arith.constant 0 : i32
    %c0_i32_1 = arith.constant 0 : i32
    return %arg0, %c0_i32, %c0_i32_0 : i32, i32, i32
  }
}

module attributes {stable_mosaic.version = 11 : i64} {
  func.func @_bottleneck_kernel(%arg0: i32, %arg1: memref<4x1x64x64xf32, #tpu.memory_space<vmem>>, %arg2: memref<64x32xbf16, #tpu.memory_space<vmem>>, %arg3: memref<1x32xf32, #tpu.memory_space<vmem>>, %arg4: memref<288x32xbf16, #tpu.memory_space<vmem>>, %arg5: memref<1x32xf32, #tpu.memory_space<vmem>>, %arg6: memref<32x128xbf16, #tpu.memory_space<vmem>>, %arg7: memref<1x128xf32, #tpu.memory_space<vmem>>, %arg8: memref<64x128xbf16, #tpu.memory_space<vmem>>, %arg9: memref<1x128xf32, #tpu.memory_space<vmem>>, %arg10: memref<1x64x128xf32, #tpu.memory_space<vmem>>, %arg11: memref<4x10x10x32xf32, #tpu.memory_space<vmem>>) attributes {dimension_semantics = [#tpu.dimension_semantics<parallel>], iteration_bounds = array<i64: 2>, scalar_prefetch = 0 : i64, scratch_operands = 1 : i64, tpu.core_type = #tpu.core_type<tc>, window_params = [{transform_indices = @transform_0, window_bounds = array<i64: 4, 1, 64, 64>}, {pipeline_mode = #tpu.pipeline_mode<synchronous>, transform_indices = @transform_1, window_bounds = array<i64: 64, 32>}, {pipeline_mode = #tpu.pipeline_mode<synchronous>, transform_indices = @transform_2, window_bounds = array<i64: 1, 32>}, {pipeline_mode = #tpu.pipeline_mode<synchronous>, transform_indices = @transform_3, window_bounds = array<i64: 288, 32>}, {pipeline_mode = #tpu.pipeline_mode<synchronous>, transform_indices = @transform_4, window_bounds = array<i64: 1, 32>}, {pipeline_mode = #tpu.pipeline_mode<synchronous>, transform_indices = @transform_5, window_bounds = array<i64: 32, 128>}, {pipeline_mode = #tpu.pipeline_mode<synchronous>, transform_indices = @transform_6, window_bounds = array<i64: 1, 128>}, {pipeline_mode = #tpu.pipeline_mode<synchronous>, transform_indices = @transform_7, window_bounds = array<i64: 64, 128>}, {pipeline_mode = #tpu.pipeline_mode<synchronous>, transform_indices = @transform_8, window_bounds = array<i64: 1, 128>}, {transform_indices = @transform_9, window_bounds = array<i64: 1, 64, 128>}]} {
    %c0 = arith.constant 0 : index
    %c0_0 = arith.constant 0 : index
    %c0_1 = arith.constant 0 : index
    %c0_2 = arith.constant 0 : index
    %0 = vector.load %arg1[%c0, %c0_0, %c0_1, %c0_2] : memref<4x1x64x64xf32, #tpu.memory_space<vmem>>, vector<4x1x64x64xf32>
    %1 = vector.shape_cast %0 : vector<4x1x64x64xf32> to vector<256x64xf32>
    %2 = arith.truncf %1 : vector<256x64xf32> to vector<256x64xbf16>
    %c0_3 = arith.constant 0 : index
    %c0_4 = arith.constant 0 : index
    %3 = vector.load %arg2[%c0_3, %c0_4] : memref<64x32xbf16, #tpu.memory_space<vmem>>, vector<64x32xbf16>
    %cst = arith.constant dense<0.000000e+00> : vector<256x32xf32>
    %4 = tpu.matmul %2, %3, %cst {dimension_numbers = #tpu.dot_dimension_numbers<[1], [0], [0], [1], [0, 0, 1, 1], [], []>} : vector<256x64xbf16>, vector<64x32xbf16>, vector<256x32xf32> -> vector<256x32xf32>
    %c0_5 = arith.constant 0 : index
    %c0_6 = arith.constant 0 : index
    %5 = vector.load %arg3[%c0_5, %c0_6] : memref<1x32xf32, #tpu.memory_space<vmem>>, vector<1x32xf32>
    %6 = vector.broadcast %5 : vector<1x32xf32> to vector<256x32xf32>
    %7 = arith.addf %4, %6 : vector<256x32xf32>
    %cst_7 = arith.constant 0.000000e+00 : f32
    %8 = vector.broadcast %cst_7 : f32 to vector<256x32xf32>
    %9 = arith.maximumf %7, %8 : vector<256x32xf32>
    %cst_8 = arith.constant 0.000000e+00 : f32
    %10 = vector.broadcast %cst_8 : f32 to vector<4x10x10x32xf32>
    %c0_9 = arith.constant 0 : index
    %c0_10 = arith.constant 0 : index
    %c0_11 = arith.constant 0 : index
    %c0_12 = arith.constant 0 : index
    %11 = vector.load %arg11[%c0_9, %c0_10, %c0_11, %c0_12] : memref<4x10x10x32xf32, #tpu.memory_space<vmem>>, vector<4x10x10x32xf32>
    tpu.vector_store %arg11[%c0_9, %c0_10, %c0_11, %c0_12], %10 {strides = array<i32>} : memref<4x10x10x32xf32, #tpu.memory_space<vmem>>, vector<4x10x10x32xf32>,
    %12 = vector.shape_cast %9 : vector<256x32xf32> to vector<4x8x8x32xf32>
    %c0_13 = arith.constant 0 : index
    %c1 = arith.constant 1 : index
    %c1_14 = arith.constant 1 : index
    %c0_15 = arith.constant 0 : index
    %13 = vector.load %arg11[%c0_13, %c1, %c1_14, %c0_15] : memref<4x10x10x32xf32, #tpu.memory_space<vmem>>, vector<4x8x8x32xf32>
    tpu.vector_store %arg11[%c0_13, %c1, %c1_14, %c0_15], %12 {strides = array<i32>} : memref<4x10x10x32xf32, #tpu.memory_space<vmem>>, vector<4x8x8x32xf32>,
    %cst_16 = arith.constant 0.000000e+00 : f32
    %14 = vector.broadcast %cst_16 : f32 to vector<64x32xf32>
    %c3 = arith.constant 3 : index
    %c0_17 = arith.constant 0 : index
    %c0_18 = arith.constant 0 : index
    %c0_19 = arith.constant 0 : index
    %15 = vector.load %arg11[%c3, %c0_17, %c0_18, %c0_19] : memref<4x10x10x32xf32, #tpu.memory_space<vmem>>, vector<1x8x8x32xf32>
    %16 = vector.shape_cast %15 : vector<1x8x8x32xf32> to vector<8x8x32xf32>
    %17 = vector.shape_cast %16 : vector<8x8x32xf32> to vector<64x32xf32>
    %18 = arith.truncf %17 : vector<64x32xf32> to vector<64x32xbf16>
    %c0_20 = arith.constant 0 : index
    %c0_21 = arith.constant 0 : index
    %19 = vector.load %arg4[%c0_20, %c0_21] : memref<288x32xbf16, #tpu.memory_space<vmem>>, vector<32x32xbf16>
    %cst_22 = arith.constant dense<0.000000e+00> : vector<64x32xf32>
    %20 = tpu.matmul %18, %19, %cst_22 {dimension_numbers = #tpu.dot_dimension_numbers<[1], [0], [0], [1], [0, 0, 1, 1], [], []>} : vector<64x32xbf16>, vector<32x32xbf16>, vector<64x32xf32> -> vector<64x32xf32>
    %21 = arith.addf %14, %20 : vector<64x32xf32>
    %c2 = arith.constant 2 : index
    %c0_23 = arith.constant 0 : index
    %c1_24 = arith.constant 1 : index
    %c0_25 = arith.constant 0 : index
    %22 = vector.load %arg11[%c2, %c0_23, %c1_24, %c0_25] : memref<4x10x10x32xf32, #tpu.memory_space<vmem>>, vector<1x8x8x32xf32>
    %23 = vector.shape_cast %22 : vector<1x8x8x32xf32> to vector<8x8x32xf32>
    %24 = vector.shape_cast %23 : vector<8x8x32xf32> to vector<64x32xf32>
    %25 = arith.truncf %24 : vector<64x32xf32> to vector<64x32xbf16>
    %c32 = arith.constant 32 : index
    %c0_26 = arith.constant 0 : index
    %26 = vector.load %arg4[%c32, %c0_26] : memref<288x32xbf16, #tpu.memory_space<vmem>>, vector<32x32xbf16>
    %cst_27 = arith.constant dense<0.000000e+00> : vector<64x32xf32>
    %27 = tpu.matmul %25, %26, %cst_27 {dimension_numbers = #tpu.dot_dimension_numbers<[1], [0], [0], [1], [0, 0, 1, 1], [], []>} : vector<64x32xbf16>, vector<32x32xbf16>, vector<64x32xf32> -> vector<64x32xf32>
    %28 = arith.addf %21, %27 : vector<64x32xf32>
    %c3_28 = arith.constant 3 : index
    %c0_29 = arith.constant 0 : index
    %c1_30 = arith.constant 1 : index
    %c0_31 = arith.constant 0 : index
    %29 = vector.load %arg11[%c3_28, %c0_29, %c1_30, %c0_31] : memref<4x10x10x32xf32, #tpu.memory_space<vmem>>, vector<1x8x8x32xf32>
    %30 = vector.shape_cast %29 : vector<1x8x8x32xf32> to vector<8x8x32xf32>
    %31 = vector.shape_cast %30 : vector<8x8x32xf32> to vector<64x32xf32>
    %32 = arith.truncf %31 : vector<64x32xf32> to vector<64x32xbf16>
    %c64 = arith.constant 64 : index
    %c0_32 = arith.constant 0 : index
    %33 = vector.load %arg4[%c64, %c0_32] : memref<288x32xbf16, #tpu.memory_space<vmem>>, vector<32x32xbf16>
    %cst_33 = arith.constant dense<0.000000e+00> : vector<64x32xf32>
    %34 = tpu.matmul %32, %33, %cst_33 {dimension_numbers = #tpu.dot_dimension_numbers<[1], [0], [0], [1], [0, 0, 1, 1], [], []>} : vector<64x32xbf16>, vector<32x32xbf16>, vector<64x32xf32> -> vector<64x32xf32>
    %35 = arith.addf %28, %34 : vector<64x32xf32>
    %c1_34 = arith.constant 1 : index
    %c1_35 = arith.constant 1 : index
    %c0_36 = arith.constant 0 : index
    %c0_37 = arith.constant 0 : index
    %36 = vector.load %arg11[%c1_34, %c1_35, %c0_36, %c0_37] : memref<4x10x10x32xf32, #tpu.memory_space<vmem>>, vector<1x8x8x32xf32>
    %37 = vector.shape_cast %36 : vector<1x8x8x32xf32> to vector<8x8x32xf32>
    %38 = vector.shape_cast %37 : vector<8x8x32xf32> to vector<64x32xf32>
    %39 = arith.truncf %38 : vector<64x32xf32> to vector<64x32xbf16>
    %c96 = arith.constant 96 : index
    %c0_38 = arith.constant 0 : index
    %40 = vector.load %arg4[%c96, %c0_38] : memref<288x32xbf16, #tpu.memory_space<vmem>>, vector<32x32xbf16>
    %cst_39 = arith.constant dense<0.000000e+00> : vector<64x32xf32>
    %41 = tpu.matmul %39, %40, %cst_39 {dimension_numbers = #tpu.dot_dimension_numbers<[1], [0], [0], [1], [0, 0, 1, 1], [], []>} : vector<64x32xbf16>, vector<32x32xbf16>, vector<64x32xf32> -> vector<64x32xf32>
    %42 = arith.addf %35, %41 : vector<64x32xf32>
    %c0_40 = arith.constant 0 : index
    %c1_41 = arith.constant 1 : index
    %c1_42 = arith.constant 1 : index
    %c0_43 = arith.constant 0 : index
    %43 = vector.load %arg11[%c0_40, %c1_41, %c1_42, %c0_43] : memref<4x10x10x32xf32, #tpu.memory_space<vmem>>, vector<1x8x8x32xf32>
    %44 = vector.shape_cast %43 : vector<1x8x8x32xf32> to vector<8x8x32xf32>
    %45 = vector.shape_cast %44 : vector<8x8x32xf32> to vector<64x32xf32>
    %46 = arith.truncf %45 : vector<64x32xf32> to vector<64x32xbf16>
    %c128 = arith.constant 128 : index
    %c0_44 = arith.constant 0 : index
    %47 = vector.load %arg4[%c128, %c0_44] : memref<288x32xbf16, #tpu.memory_space<vmem>>, vector<32x32xbf16>
    %cst_45 = arith.constant dense<0.000000e+00> : vector<64x32xf32>
    %48 = tpu.matmul %46, %47, %cst_45 {dimension_numbers = #tpu.dot_dimension_numbers<[1], [0], [0], [1], [0, 0, 1, 1], [], []>} : vector<64x32xbf16>, vector<32x32xbf16>, vector<64x32xf32> -> vector<64x32xf32>
    %49 = arith.addf %42, %48 : vector<64x32xf32>
    %c1_46 = arith.constant 1 : index
    %c1_47 = arith.constant 1 : index
    %c1_48 = arith.constant 1 : index
    %c0_49 = arith.constant 0 : index
    %50 = vector.load %arg11[%c1_46, %c1_47, %c1_48, %c0_49] : memref<4x10x10x32xf32, #tpu.memory_space<vmem>>, vector<1x8x8x32xf32>
    %51 = vector.shape_cast %50 : vector<1x8x8x32xf32> to vector<8x8x32xf32>
    %52 = vector.shape_cast %51 : vector<8x8x32xf32> to vector<64x32xf32>
    %53 = arith.truncf %52 : vector<64x32xf32> to vector<64x32xbf16>
    %c160 = arith.constant 160 : index
    %c0_50 = arith.constant 0 : index
    %54 = vector.load %arg4[%c160, %c0_50] : memref<288x32xbf16, #tpu.memory_space<vmem>>, vector<32x32xbf16>
    %cst_51 = arith.constant dense<0.000000e+00> : vector<64x32xf32>
    %55 = tpu.matmul %53, %54, %cst_51 {dimension_numbers = #tpu.dot_dimension_numbers<[1], [0], [0], [1], [0, 0, 1, 1], [], []>} : vector<64x32xbf16>, vector<32x32xbf16>, vector<64x32xf32> -> vector<64x32xf32>
    %56 = arith.addf %49, %55 : vector<64x32xf32>
    %c3_52 = arith.constant 3 : index
    %c1_53 = arith.constant 1 : index
    %c0_54 = arith.constant 0 : index
    %c0_55 = arith.constant 0 : index
    %57 = vector.load %arg11[%c3_52, %c1_53, %c0_54, %c0_55] : memref<4x10x10x32xf32, #tpu.memory_space<vmem>>, vector<1x8x8x32xf32>
    %58 = vector.shape_cast %57 : vector<1x8x8x32xf32> to vector<8x8x32xf32>
    %59 = vector.shape_cast %58 : vector<8x8x32xf32> to vector<64x32xf32>
    %60 = arith.truncf %59 : vector<64x32xf32> to vector<64x32xbf16>
    %c192 = arith.constant 192 : index
    %c0_56 = arith.constant 0 : index
    %61 = vector.load %arg4[%c192, %c0_56] : memref<288x32xbf16, #tpu.memory_space<vmem>>, vector<32x32xbf16>
    %cst_57 = arith.constant dense<0.000000e+00> : vector<64x32xf32>
    %62 = tpu.matmul %60, %61, %cst_57 {dimension_numbers = #tpu.dot_dimension_numbers<[1], [0], [0], [1], [0, 0, 1, 1], [], []>} : vector<64x32xbf16>, vector<32x32xbf16>, vector<64x32xf32> -> vector<64x32xf32>
    %63 = arith.addf %56, %62 : vector<64x32xf32>
    %c2_58 = arith.constant 2 : index
    %c1_59 = arith.constant 1 : index
    %c1_60 = arith.constant 1 : index
    %c0_61 = arith.constant 0 : index
    %64 = vector.load %arg11[%c2_58, %c1_59, %c1_60, %c0_61] : memref<4x10x10x32xf32, #tpu.memory_space<vmem>>, vector<1x8x8x32xf32>
    %65 = vector.shape_cast %64 : vector<1x8x8x32xf32> to vector<8x8x32xf32>
    %66 = vector.shape_cast %65 : vector<8x8x32xf32> to vector<64x32xf32>
    %67 = arith.truncf %66 : vector<64x32xf32> to vector<64x32xbf16>
    %c224 = arith.constant 224 : index
    %c0_62 = arith.constant 0 : index
    %68 = vector.load %arg4[%c224, %c0_62] : memref<288x32xbf16, #tpu.memory_space<vmem>>, vector<32x32xbf16>
    %cst_63 = arith.constant dense<0.000000e+00> : vector<64x32xf32>
    %69 = tpu.matmul %67, %68, %cst_63 {dimension_numbers = #tpu.dot_dimension_numbers<[1], [0], [0], [1], [0, 0, 1, 1], [], []>} : vector<64x32xbf16>, vector<32x32xbf16>, vector<64x32xf32> -> vector<64x32xf32>
    %70 = arith.addf %63, %69 : vector<64x32xf32>
    %c3_64 = arith.constant 3 : index
    %c1_65 = arith.constant 1 : index
    %c1_66 = arith.constant 1 : index
    %c0_67 = arith.constant 0 : index
    %71 = vector.load %arg11[%c3_64, %c1_65, %c1_66, %c0_67] : memref<4x10x10x32xf32, #tpu.memory_space<vmem>>, vector<1x8x8x32xf32>
    %72 = vector.shape_cast %71 : vector<1x8x8x32xf32> to vector<8x8x32xf32>
    %73 = vector.shape_cast %72 : vector<8x8x32xf32> to vector<64x32xf32>
    %74 = arith.truncf %73 : vector<64x32xf32> to vector<64x32xbf16>
    %c256 = arith.constant 256 : index
    %c0_68 = arith.constant 0 : index
    %75 = vector.load %arg4[%c256, %c0_68] : memref<288x32xbf16, #tpu.memory_space<vmem>>, vector<32x32xbf16>
    %cst_69 = arith.constant dense<0.000000e+00> : vector<64x32xf32>
    %76 = tpu.matmul %74, %75, %cst_69 {dimension_numbers = #tpu.dot_dimension_numbers<[1], [0], [0], [1], [0, 0, 1, 1], [], []>} : vector<64x32xbf16>, vector<32x32xbf16>, vector<64x32xf32> -> vector<64x32xf32>
    %77 = arith.addf %70, %76 : vector<64x32xf32>
    %c0_70 = arith.constant 0 : index
    %c0_71 = arith.constant 0 : index
    %78 = vector.load %arg5[%c0_70, %c0_71] : memref<1x32xf32, #tpu.memory_space<vmem>>, vector<1x32xf32>
    %79 = vector.broadcast %78 : vector<1x32xf32> to vector<64x32xf32>
    %80 = arith.addf %77, %79 : vector<64x32xf32>
    %cst_72 = arith.constant 0.000000e+00 : f32
    %81 = vector.broadcast %cst_72 : f32 to vector<64x32xf32>
    %82 = arith.maximumf %80, %81 : vector<64x32xf32>
    %83 = arith.truncf %82 : vector<64x32xf32> to vector<64x32xbf16>
    %84 = vector.extract_strided_slice %2 {offsets = [0, 0], sizes = [64, 64], strides = [1, 1]} : vector<256x64xbf16> to vector<64x64xbf16>
    %c0_73 = arith.constant 0 : index
    %c0_74 = arith.constant 0 : index
    %85 = vector.load %arg8[%c0_73, %c0_74] : memref<64x128xbf16, #tpu.memory_space<vmem>>, vector<64x128xbf16>
    %cst_75 = arith.constant dense<0.000000e+00> : vector<64x128xf32>
    %86 = tpu.matmul %84, %85, %cst_75 {dimension_numbers = #tpu.dot_dimension_numbers<[1], [0], [0], [1], [0, 0, 1, 1], [], []>} : vector<64x64xbf16>, vector<64x128xbf16>, vector<64x128xf32> -> vector<64x128xf32>
    %c0_76 = arith.constant 0 : index
    %c0_77 = arith.constant 0 : index
    %87 = vector.load %arg9[%c0_76, %c0_77] : memref<1x128xf32, #tpu.memory_space<vmem>>, vector<1x128xf32>
    %88 = vector.broadcast %87 : vector<1x128xf32> to vector<64x128xf32>
    %89 = arith.addf %86, %88 : vector<64x128xf32>
    %c0_78 = arith.constant 0 : index
    %c0_79 = arith.constant 0 : index
    %90 = vector.load %arg6[%c0_78, %c0_79] : memref<32x128xbf16, #tpu.memory_space<vmem>>, vector<32x128xbf16>
    %cst_80 = arith.constant dense<0.000000e+00> : vector<64x128xf32>
    %91 = tpu.matmul %83, %90, %cst_80 {dimension_numbers = #tpu.dot_dimension_numbers<[1], [0], [0], [1], [0, 0, 1, 1], [], []>} : vector<64x32xbf16>, vector<32x128xbf16>, vector<64x128xf32> -> vector<64x128xf32>
    %c0_81 = arith.constant 0 : index
    %c0_82 = arith.constant 0 : index
    %92 = vector.load %arg7[%c0_81, %c0_82] : memref<1x128xf32, #tpu.memory_space<vmem>>, vector<1x128xf32>
    %93 = vector.broadcast %92 : vector<1x128xf32> to vector<64x128xf32>
    %94 = arith.addf %91, %93 : vector<64x128xf32>
    %95 = arith.addf %94, %89 : vector<64x128xf32>
    %cst_83 = arith.constant 0.000000e+00 : f32
    %96 = vector.broadcast %cst_83 : f32 to vector<64x128xf32>
    %97 = arith.maximumf %95, %96 : vector<64x128xf32>
    %98 = vector.shape_cast %97 : vector<64x128xf32> to vector<1x64x128xf32>
    %c0_84 = arith.constant 0 : index
    %c0_85 = arith.constant 0 : index
    %c0_86 = arith.constant 0 : index
    %99 = vector.load %arg10[%c0_84, %c0_85, %c0_86] : memref<1x64x128xf32, #tpu.memory_space<vmem>>, vector<1x64x128xf32>
    tpu.vector_store %arg10[%c0_84, %c0_85, %c0_86], %98 {strides = array<i32>} : memref<1x64x128xf32, #tpu.memory_space<vmem>>, vector<1x64x128xf32>,
    return
  }
  func.func @transform_0(%arg0: i32) -> (i32, i32, i32, i32) {
    %c0_i32 = arith.constant 0 : i32
    %c0_i32_0 = arith.constant 0 : i32
    %c0_i32_1 = arith.constant 0 : i32
    %c0_i32_2 = arith.constant 0 : i32
    return %c0_i32, %arg0, %c0_i32_0, %c0_i32_1 : i32, i32, i32, i32
  }
  func.func @transform_1(%arg0: i32) -> (i32, i32) {
    %c0_i32 = arith.constant 0 : i32
    %c0_i32_0 = arith.constant 0 : i32
    %c0_i32_1 = arith.constant 0 : i32
    return %c0_i32, %c0_i32_0 : i32, i32
  }
  func.func @transform_2(%arg0: i32) -> (i32, i32) {
    %c0_i32 = arith.constant 0 : i32
    %c0_i32_0 = arith.constant 0 : i32
    %c0_i32_1 = arith.constant 0 : i32
    return %c0_i32, %c0_i32_0 : i32, i32
  }
  func.func @transform_3(%arg0: i32) -> (i32, i32) {
    %c0_i32 = arith.constant 0 : i32
    %c0_i32_0 = arith.constant 0 : i32
    %c0_i32_1 = arith.constant 0 : i32
    return %c0_i32, %c0_i32_0 : i32, i32
  }
  func.func @transform_4(%arg0: i32) -> (i32, i32) {
    %c0_i32 = arith.constant 0 : i32
    %c0_i32_0 = arith.constant 0 : i32
    %c0_i32_1 = arith.constant 0 : i32
    return %c0_i32, %c0_i32_0 : i32, i32
  }
  func.func @transform_5(%arg0: i32) -> (i32, i32) {
    %c0_i32 = arith.constant 0 : i32
    %c0_i32_0 = arith.constant 0 : i32
    %c0_i32_1 = arith.constant 0 : i32
    return %c0_i32, %c0_i32_0 : i32, i32
  }
  func.func @transform_6(%arg0: i32) -> (i32, i32) {
    %c0_i32 = arith.constant 0 : i32
    %c0_i32_0 = arith.constant 0 : i32
    %c0_i32_1 = arith.constant 0 : i32
    return %c0_i32, %c0_i32_0 : i32, i32
  }
  func.func @transform_7(%arg0: i32) -> (i32, i32) {
    %c0_i32 = arith.constant 0 : i32
    %c0_i32_0 = arith.constant 0 : i32
    %c0_i32_1 = arith.constant 0 : i32
    return %c0_i32, %c0_i32_0 : i32, i32
  }
  func.func @transform_8(%arg0: i32) -> (i32, i32) {
    %c0_i32 = arith.constant 0 : i32
    %c0_i32_0 = arith.constant 0 : i32
    %c0_i32_1 = arith.constant 0 : i32
    return %c0_i32, %c0_i32_0 : i32, i32
  }
  func.func @transform_9(%arg0: i32) -> (i32, i32, i32) {
    %c0_i32 = arith.constant 0 : i32
    %c0_i32_0 = arith.constant 0 : i32
    %c0_i32_1 = arith.constant 0 : i32
    return %arg0, %c0_i32, %c0_i32_0 : i32, i32, i32
  }
}

module attributes {stable_mosaic.version = 11 : i64} {
  func.func @_bottleneck_kernel(%arg0: i32, %arg1: memref<1x8x8x128xf32, #tpu.memory_space<vmem>>, %arg2: memref<128x64xbf16, #tpu.memory_space<vmem>>, %arg3: memref<1x64xf32, #tpu.memory_space<vmem>>, %arg4: memref<576x64xbf16, #tpu.memory_space<vmem>>, %arg5: memref<1x64xf32, #tpu.memory_space<vmem>>, %arg6: memref<64x256xbf16, #tpu.memory_space<vmem>>, %arg7: memref<1x256xf32, #tpu.memory_space<vmem>>, %arg8: memref<128x256xbf16, #tpu.memory_space<vmem>>, %arg9: memref<1x256xf32, #tpu.memory_space<vmem>>, %arg10: memref<1x64x256xf32, #tpu.memory_space<vmem>>, %arg11: memref<10x10x64xf32, #tpu.memory_space<vmem>>) attributes {dimension_semantics = [#tpu.dimension_semantics<parallel>], iteration_bounds = array<i64: 2>, scalar_prefetch = 0 : i64, scratch_operands = 1 : i64, tpu.core_type = #tpu.core_type<tc>, window_params = [{transform_indices = @transform_0, window_bounds = array<i64: 1, 8, 8, 128>}, {pipeline_mode = #tpu.pipeline_mode<synchronous>, transform_indices = @transform_1, window_bounds = array<i64: 128, 64>}, {pipeline_mode = #tpu.pipeline_mode<synchronous>, transform_indices = @transform_2, window_bounds = array<i64: 1, 64>}, {pipeline_mode = #tpu.pipeline_mode<synchronous>, transform_indices = @transform_3, window_bounds = array<i64: 576, 64>}, {pipeline_mode = #tpu.pipeline_mode<synchronous>, transform_indices = @transform_4, window_bounds = array<i64: 1, 64>}, {pipeline_mode = #tpu.pipeline_mode<synchronous>, transform_indices = @transform_5, window_bounds = array<i64: 64, 256>}, {pipeline_mode = #tpu.pipeline_mode<synchronous>, transform_indices = @transform_6, window_bounds = array<i64: 1, 256>}, {pipeline_mode = #tpu.pipeline_mode<synchronous>, transform_indices = @transform_7, window_bounds = array<i64: 128, 256>}, {pipeline_mode = #tpu.pipeline_mode<synchronous>, transform_indices = @transform_8, window_bounds = array<i64: 1, 256>}, {transform_indices = @transform_9, window_bounds = array<i64: 1, 64, 256>}]} {
    %c0 = arith.constant 0 : index
    %c0_0 = arith.constant 0 : index
    %c0_1 = arith.constant 0 : index
    %c0_2 = arith.constant 0 : index
    %0 = vector.load %arg1[%c0, %c0_0, %c0_1, %c0_2] : memref<1x8x8x128xf32, #tpu.memory_space<vmem>>, vector<1x8x8x128xf32>
    %1 = vector.shape_cast %0 : vector<1x8x8x128xf32> to vector<64x128xf32>
    %2 = arith.truncf %1 : vector<64x128xf32> to vector<64x128xbf16>
    %c0_3 = arith.constant 0 : index
    %c0_4 = arith.constant 0 : index
    %3 = vector.load %arg2[%c0_3, %c0_4] : memref<128x64xbf16, #tpu.memory_space<vmem>>, vector<128x64xbf16>
    %cst = arith.constant dense<0.000000e+00> : vector<64x64xf32>
    %4 = tpu.matmul %2, %3, %cst {dimension_numbers = #tpu.dot_dimension_numbers<[1], [0], [0], [1], [0, 0, 1, 1], [], []>} : vector<64x128xbf16>, vector<128x64xbf16>, vector<64x64xf32> -> vector<64x64xf32>
    %c0_5 = arith.constant 0 : index
    %c0_6 = arith.constant 0 : index
    %5 = vector.load %arg3[%c0_5, %c0_6] : memref<1x64xf32, #tpu.memory_space<vmem>>, vector<1x64xf32>
    %6 = vector.broadcast %5 : vector<1x64xf32> to vector<64x64xf32>
    %7 = arith.addf %4, %6 : vector<64x64xf32>
    %cst_7 = arith.constant 0.000000e+00 : f32
    %8 = vector.broadcast %cst_7 : f32 to vector<64x64xf32>
    %9 = arith.maximumf %7, %8 : vector<64x64xf32>
    %cst_8 = arith.constant 0.000000e+00 : f32
    %10 = vector.broadcast %cst_8 : f32 to vector<10x10x64xf32>
    %c0_9 = arith.constant 0 : index
    %c0_10 = arith.constant 0 : index
    %c0_11 = arith.constant 0 : index
    %11 = vector.load %arg11[%c0_9, %c0_10, %c0_11] : memref<10x10x64xf32, #tpu.memory_space<vmem>>, vector<10x10x64xf32>
    tpu.vector_store %arg11[%c0_9, %c0_10, %c0_11], %10 {strides = array<i32>} : memref<10x10x64xf32, #tpu.memory_space<vmem>>, vector<10x10x64xf32>,
    %12 = vector.shape_cast %9 : vector<64x64xf32> to vector<8x8x64xf32>
    %c1 = arith.constant 1 : index
    %c1_12 = arith.constant 1 : index
    %c0_13 = arith.constant 0 : index
    %13 = vector.load %arg11[%c1, %c1_12, %c0_13] : memref<10x10x64xf32, #tpu.memory_space<vmem>>, vector<8x8x64xf32>
    tpu.vector_store %arg11[%c1, %c1_12, %c0_13], %12 {strides = array<i32>} : memref<10x10x64xf32, #tpu.memory_space<vmem>>, vector<8x8x64xf32>,
    %cst_14 = arith.constant 0.000000e+00 : f32
    %14 = vector.broadcast %cst_14 : f32 to vector<64x64xf32>
    %c0_15 = arith.constant 0 : index
    %c0_16 = arith.constant 0 : index
    %c0_17 = arith.constant 0 : index
    %15 = vector.load %arg11[%c0_15, %c0_16, %c0_17] : memref<10x10x64xf32, #tpu.memory_space<vmem>>, vector<8x8x64xf32>
    %16 = vector.shape_cast %15 : vector<8x8x64xf32> to vector<64x64xf32>
    %17 = arith.truncf %16 : vector<64x64xf32> to vector<64x64xbf16>
    %c0_18 = arith.constant 0 : index
    %c0_19 = arith.constant 0 : index
    %18 = vector.load %arg4[%c0_18, %c0_19] : memref<576x64xbf16, #tpu.memory_space<vmem>>, vector<64x64xbf16>
    %cst_20 = arith.constant dense<0.000000e+00> : vector<64x64xf32>
    %19 = tpu.matmul %17, %18, %cst_20 {dimension_numbers = #tpu.dot_dimension_numbers<[1], [0], [0], [1], [0, 0, 1, 1], [], []>} : vector<64x64xbf16>, vector<64x64xbf16>, vector<64x64xf32> -> vector<64x64xf32>
    %20 = arith.addf %14, %19 : vector<64x64xf32>
    %c0_21 = arith.constant 0 : index
    %c1_22 = arith.constant 1 : index
    %c0_23 = arith.constant 0 : index
    %21 = vector.load %arg11[%c0_21, %c1_22, %c0_23] : memref<10x10x64xf32, #tpu.memory_space<vmem>>, vector<8x8x64xf32>
    %22 = vector.shape_cast %21 : vector<8x8x64xf32> to vector<64x64xf32>
    %23 = arith.truncf %22 : vector<64x64xf32> to vector<64x64xbf16>
    %c64 = arith.constant 64 : index
    %c0_24 = arith.constant 0 : index
    %24 = vector.load %arg4[%c64, %c0_24] : memref<576x64xbf16, #tpu.memory_space<vmem>>, vector<64x64xbf16>
    %cst_25 = arith.constant dense<0.000000e+00> : vector<64x64xf32>
    %25 = tpu.matmul %23, %24, %cst_25 {dimension_numbers = #tpu.dot_dimension_numbers<[1], [0], [0], [1], [0, 0, 1, 1], [], []>} : vector<64x64xbf16>, vector<64x64xbf16>, vector<64x64xf32> -> vector<64x64xf32>
    %26 = arith.addf %20, %25 : vector<64x64xf32>
    %c0_26 = arith.constant 0 : index
    %c2 = arith.constant 2 : index
    %c0_27 = arith.constant 0 : index
    %27 = vector.load %arg11[%c0_26, %c2, %c0_27] : memref<10x10x64xf32, #tpu.memory_space<vmem>>, vector<8x8x64xf32>
    %28 = vector.shape_cast %27 : vector<8x8x64xf32> to vector<64x64xf32>
    %29 = arith.truncf %28 : vector<64x64xf32> to vector<64x64xbf16>
    %c128 = arith.constant 128 : index
    %c0_28 = arith.constant 0 : index
    %30 = vector.load %arg4[%c128, %c0_28] : memref<576x64xbf16, #tpu.memory_space<vmem>>, vector<64x64xbf16>
    %cst_29 = arith.constant dense<0.000000e+00> : vector<64x64xf32>
    %31 = tpu.matmul %29, %30, %cst_29 {dimension_numbers = #tpu.dot_dimension_numbers<[1], [0], [0], [1], [0, 0, 1, 1], [], []>} : vector<64x64xbf16>, vector<64x64xbf16>, vector<64x64xf32> -> vector<64x64xf32>
    %32 = arith.addf %26, %31 : vector<64x64xf32>
    %c1_30 = arith.constant 1 : index
    %c0_31 = arith.constant 0 : index
    %c0_32 = arith.constant 0 : index
    %33 = vector.load %arg11[%c1_30, %c0_31, %c0_32] : memref<10x10x64xf32, #tpu.memory_space<vmem>>, vector<8x8x64xf32>
    %34 = vector.shape_cast %33 : vector<8x8x64xf32> to vector<64x64xf32>
    %35 = arith.truncf %34 : vector<64x64xf32> to vector<64x64xbf16>
    %c192 = arith.constant 192 : index
    %c0_33 = arith.constant 0 : index
    %36 = vector.load %arg4[%c192, %c0_33] : memref<576x64xbf16, #tpu.memory_space<vmem>>, vector<64x64xbf16>
    %cst_34 = arith.constant dense<0.000000e+00> : vector<64x64xf32>
    %37 = tpu.matmul %35, %36, %cst_34 {dimension_numbers = #tpu.dot_dimension_numbers<[1], [0], [0], [1], [0, 0, 1, 1], [], []>} : vector<64x64xbf16>, vector<64x64xbf16>, vector<64x64xf32> -> vector<64x64xf32>
    %38 = arith.addf %32, %37 : vector<64x64xf32>
    %c1_35 = arith.constant 1 : index
    %c1_36 = arith.constant 1 : index
    %c0_37 = arith.constant 0 : index
    %39 = vector.load %arg11[%c1_35, %c1_36, %c0_37] : memref<10x10x64xf32, #tpu.memory_space<vmem>>, vector<8x8x64xf32>
    %40 = vector.shape_cast %39 : vector<8x8x64xf32> to vector<64x64xf32>
    %41 = arith.truncf %40 : vector<64x64xf32> to vector<64x64xbf16>
    %c256 = arith.constant 256 : index
    %c0_38 = arith.constant 0 : index
    %42 = vector.load %arg4[%c256, %c0_38] : memref<576x64xbf16, #tpu.memory_space<vmem>>, vector<64x64xbf16>
    %cst_39 = arith.constant dense<0.000000e+00> : vector<64x64xf32>
    %43 = tpu.matmul %41, %42, %cst_39 {dimension_numbers = #tpu.dot_dimension_numbers<[1], [0], [0], [1], [0, 0, 1, 1], [], []>} : vector<64x64xbf16>, vector<64x64xbf16>, vector<64x64xf32> -> vector<64x64xf32>
    %44 = arith.addf %38, %43 : vector<64x64xf32>
    %c1_40 = arith.constant 1 : index
    %c2_41 = arith.constant 2 : index
    %c0_42 = arith.constant 0 : index
    %45 = vector.load %arg11[%c1_40, %c2_41, %c0_42] : memref<10x10x64xf32, #tpu.memory_space<vmem>>, vector<8x8x64xf32>
    %46 = vector.shape_cast %45 : vector<8x8x64xf32> to vector<64x64xf32>
    %47 = arith.truncf %46 : vector<64x64xf32> to vector<64x64xbf16>
    %c320 = arith.constant 320 : index
    %c0_43 = arith.constant 0 : index
    %48 = vector.load %arg4[%c320, %c0_43] : memref<576x64xbf16, #tpu.memory_space<vmem>>, vector<64x64xbf16>
    %cst_44 = arith.constant dense<0.000000e+00> : vector<64x64xf32>
    %49 = tpu.matmul %47, %48, %cst_44 {dimension_numbers = #tpu.dot_dimension_numbers<[1], [0], [0], [1], [0, 0, 1, 1], [], []>} : vector<64x64xbf16>, vector<64x64xbf16>, vector<64x64xf32> -> vector<64x64xf32>
    %50 = arith.addf %44, %49 : vector<64x64xf32>
    %c2_45 = arith.constant 2 : index
    %c0_46 = arith.constant 0 : index
    %c0_47 = arith.constant 0 : index
    %51 = vector.load %arg11[%c2_45, %c0_46, %c0_47] : memref<10x10x64xf32, #tpu.memory_space<vmem>>, vector<8x8x64xf32>
    %52 = vector.shape_cast %51 : vector<8x8x64xf32> to vector<64x64xf32>
    %53 = arith.truncf %52 : vector<64x64xf32> to vector<64x64xbf16>
    %c384 = arith.constant 384 : index
    %c0_48 = arith.constant 0 : index
    %54 = vector.load %arg4[%c384, %c0_48] : memref<576x64xbf16, #tpu.memory_space<vmem>>, vector<64x64xbf16>
    %cst_49 = arith.constant dense<0.000000e+00> : vector<64x64xf32>
    %55 = tpu.matmul %53, %54, %cst_49 {dimension_numbers = #tpu.dot_dimension_numbers<[1], [0], [0], [1], [0, 0, 1, 1], [], []>} : vector<64x64xbf16>, vector<64x64xbf16>, vector<64x64xf32> -> vector<64x64xf32>
    %56 = arith.addf %50, %55 : vector<64x64xf32>
    %c2_50 = arith.constant 2 : index
    %c1_51 = arith.constant 1 : index
    %c0_52 = arith.constant 0 : index
    %57 = vector.load %arg11[%c2_50, %c1_51, %c0_52] : memref<10x10x64xf32, #tpu.memory_space<vmem>>, vector<8x8x64xf32>
    %58 = vector.shape_cast %57 : vector<8x8x64xf32> to vector<64x64xf32>
    %59 = arith.truncf %58 : vector<64x64xf32> to vector<64x64xbf16>
    %c448 = arith.constant 448 : index
    %c0_53 = arith.constant 0 : index
    %60 = vector.load %arg4[%c448, %c0_53] : memref<576x64xbf16, #tpu.memory_space<vmem>>, vector<64x64xbf16>
    %cst_54 = arith.constant dense<0.000000e+00> : vector<64x64xf32>
    %61 = tpu.matmul %59, %60, %cst_54 {dimension_numbers = #tpu.dot_dimension_numbers<[1], [0], [0], [1], [0, 0, 1, 1], [], []>} : vector<64x64xbf16>, vector<64x64xbf16>, vector<64x64xf32> -> vector<64x64xf32>
    %62 = arith.addf %56, %61 : vector<64x64xf32>
    %c2_55 = arith.constant 2 : index
    %c2_56 = arith.constant 2 : index
    %c0_57 = arith.constant 0 : index
    %63 = vector.load %arg11[%c2_55, %c2_56, %c0_57] : memref<10x10x64xf32, #tpu.memory_space<vmem>>, vector<8x8x64xf32>
    %64 = vector.shape_cast %63 : vector<8x8x64xf32> to vector<64x64xf32>
    %65 = arith.truncf %64 : vector<64x64xf32> to vector<64x64xbf16>
    %c512 = arith.constant 512 : index
    %c0_58 = arith.constant 0 : index
    %66 = vector.load %arg4[%c512, %c0_58] : memref<576x64xbf16, #tpu.memory_space<vmem>>, vector<64x64xbf16>
    %cst_59 = arith.constant dense<0.000000e+00> : vector<64x64xf32>
    %67 = tpu.matmul %65, %66, %cst_59 {dimension_numbers = #tpu.dot_dimension_numbers<[1], [0], [0], [1], [0, 0, 1, 1], [], []>} : vector<64x64xbf16>, vector<64x64xbf16>, vector<64x64xf32> -> vector<64x64xf32>
    %68 = arith.addf %62, %67 : vector<64x64xf32>
    %c0_60 = arith.constant 0 : index
    %c0_61 = arith.constant 0 : index
    %69 = vector.load %arg5[%c0_60, %c0_61] : memref<1x64xf32, #tpu.memory_space<vmem>>, vector<1x64xf32>
    %70 = vector.broadcast %69 : vector<1x64xf32> to vector<64x64xf32>
    %71 = arith.addf %68, %70 : vector<64x64xf32>
    %cst_62 = arith.constant 0.000000e+00 : f32
    %72 = vector.broadcast %cst_62 : f32 to vector<64x64xf32>
    %73 = arith.maximumf %71, %72 : vector<64x64xf32>
    %74 = arith.truncf %73 : vector<64x64xf32> to vector<64x64xbf16>
    %c0_63 = arith.constant 0 : index
    %c0_64 = arith.constant 0 : index
    %75 = vector.load %arg8[%c0_63, %c0_64] : memref<128x256xbf16, #tpu.memory_space<vmem>>, vector<128x256xbf16>
    %cst_65 = arith.constant dense<0.000000e+00> : vector<64x256xf32>
    %76 = tpu.matmul %2, %75, %cst_65 {dimension_numbers = #tpu.dot_dimension_numbers<[1], [0], [0], [1], [0, 0, 1, 1], [], []>} : vector<64x128xbf16>, vector<128x256xbf16>, vector<64x256xf32> -> vector<64x256xf32>
    %c0_66 = arith.constant 0 : index
    %c0_67 = arith.constant 0 : index
    %77 = vector.load %arg9[%c0_66, %c0_67] : memref<1x256xf32, #tpu.memory_space<vmem>>, vector<1x256xf32>
    %78 = vector.broadcast %77 : vector<1x256xf32> to vector<64x256xf32>
    %79 = arith.addf %76, %78 : vector<64x256xf32>
    %c0_68 = arith.constant 0 : index
    %c0_69 = arith.constant 0 : index
    %80 = vector.load %arg6[%c0_68, %c0_69] : memref<64x256xbf16, #tpu.memory_space<vmem>>, vector<64x256xbf16>
    %cst_70 = arith.constant dense<0.000000e+00> : vector<64x256xf32>
    %81 = tpu.matmul %74, %80, %cst_70 {dimension_numbers = #tpu.dot_dimension_numbers<[1], [0], [0], [1], [0, 0, 1, 1], [], []>} : vector<64x64xbf16>, vector<64x256xbf16>, vector<64x256xf32> -> vector<64x256xf32>
    %c0_71 = arith.constant 0 : index
    %c0_72 = arith.constant 0 : index
    %82 = vector.load %arg7[%c0_71, %c0_72] : memref<1x256xf32, #tpu.memory_space<vmem>>, vector<1x256xf32>
    %83 = vector.broadcast %82 : vector<1x256xf32> to vector<64x256xf32>
    %84 = arith.addf %81, %83 : vector<64x256xf32>
    %85 = arith.addf %84, %79 : vector<64x256xf32>
    %cst_73 = arith.constant 0.000000e+00 : f32
    %86 = vector.broadcast %cst_73 : f32 to vector<64x256xf32>
    %87 = arith.maximumf %85, %86 : vector<64x256xf32>
    %88 = vector.shape_cast %87 : vector<64x256xf32> to vector<1x64x256xf32>
    %c0_74 = arith.constant 0 : index
    %c0_75 = arith.constant 0 : index
    %c0_76 = arith.constant 0 : index
    %89 = vector.load %arg10[%c0_74, %c0_75, %c0_76] : memref<1x64x256xf32, #tpu.memory_space<vmem>>, vector<1x64x256xf32>
    tpu.vector_store %arg10[%c0_74, %c0_75, %c0_76], %88 {strides = array<i32>} : memref<1x64x256xf32, #tpu.memory_space<vmem>>, vector<1x64x256xf32>,
    return
  }
  func.func @transform_0(%arg0: i32) -> (i32, i32, i32, i32) {
    %c0_i32 = arith.constant 0 : i32
    %c0_i32_0 = arith.constant 0 : i32
    %c0_i32_1 = arith.constant 0 : i32
    %c0_i32_2 = arith.constant 0 : i32
    return %arg0, %c0_i32, %c0_i32_0, %c0_i32_1 : i32, i32, i32, i32
  }
  func.func @transform_1(%arg0: i32) -> (i32, i32) {
    %c0_i32 = arith.constant 0 : i32
    %c0_i32_0 = arith.constant 0 : i32
    %c0_i32_1 = arith.constant 0 : i32
    return %c0_i32, %c0_i32_0 : i32, i32
  }
  func.func @transform_2(%arg0: i32) -> (i32, i32) {
    %c0_i32 = arith.constant 0 : i32
    %c0_i32_0 = arith.constant 0 : i32
    %c0_i32_1 = arith.constant 0 : i32
    return %c0_i32, %c0_i32_0 : i32, i32
  }
  func.func @transform_3(%arg0: i32) -> (i32, i32) {
    %c0_i32 = arith.constant 0 : i32
    %c0_i32_0 = arith.constant 0 : i32
    %c0_i32_1 = arith.constant 0 : i32
    return %c0_i32, %c0_i32_0 : i32, i32
  }
  func.func @transform_4(%arg0: i32) -> (i32, i32) {
    %c0_i32 = arith.constant 0 : i32
    %c0_i32_0 = arith.constant 0 : i32
    %c0_i32_1 = arith.constant 0 : i32
    return %c0_i32, %c0_i32_0 : i32, i32
  }
  func.func @transform_5(%arg0: i32) -> (i32, i32) {
    %c0_i32 = arith.constant 0 : i32
    %c0_i32_0 = arith.constant 0 : i32
    %c0_i32_1 = arith.constant 0 : i32
    return %c0_i32, %c0_i32_0 : i32, i32
  }
  func.func @transform_6(%arg0: i32) -> (i32, i32) {
    %c0_i32 = arith.constant 0 : i32
    %c0_i32_0 = arith.constant 0 : i32
    %c0_i32_1 = arith.constant 0 : i32
    return %c0_i32, %c0_i32_0 : i32, i32
  }
  func.func @transform_7(%arg0: i32) -> (i32, i32) {
    %c0_i32 = arith.constant 0 : i32
    %c0_i32_0 = arith.constant 0 : i32
    %c0_i32_1 = arith.constant 0 : i32
    return %c0_i32, %c0_i32_0 : i32, i32
  }
  func.func @transform_8(%arg0: i32) -> (i32, i32) {
    %c0_i32 = arith.constant 0 : i32
    %c0_i32_0 = arith.constant 0 : i32
    %c0_i32_1 = arith.constant 0 : i32
    return %c0_i32, %c0_i32_0 : i32, i32
  }
  func.func @transform_9(%arg0: i32) -> (i32, i32, i32) {
    %c0_i32 = arith.constant 0 : i32
    %c0_i32_0 = arith.constant 0 : i32
    %c0_i32_1 = arith.constant 0 : i32
    return %arg0, %c0_i32, %c0_i32_0 : i32, i32, i32
  }
}

module attributes {stable_mosaic.version = 11 : i64} {
  func.func @_bottleneck_kernel(%arg0: i32, %arg1: memref<1x8x8x256xf32, #tpu.memory_space<vmem>>, %arg2: memref<256x64xbf16, #tpu.memory_space<vmem>>, %arg3: memref<1x64xf32, #tpu.memory_space<vmem>>, %arg4: memref<576x64xbf16, #tpu.memory_space<vmem>>, %arg5: memref<1x64xf32, #tpu.memory_space<vmem>>, %arg6: memref<64x256xbf16, #tpu.memory_space<vmem>>, %arg7: memref<1x256xf32, #tpu.memory_space<vmem>>, %arg8: memref<1x64x256xf32, #tpu.memory_space<vmem>>, %arg9: memref<10x10x64xf32, #tpu.memory_space<vmem>>) attributes {dimension_semantics = [#tpu.dimension_semantics<parallel>], iteration_bounds = array<i64: 2>, scalar_prefetch = 0 : i64, scratch_operands = 1 : i64, tpu.core_type = #tpu.core_type<tc>, window_params = [{transform_indices = @transform_0, window_bounds = array<i64: 1, 8, 8, 256>}, {pipeline_mode = #tpu.pipeline_mode<synchronous>, transform_indices = @transform_1, window_bounds = array<i64: 256, 64>}, {pipeline_mode = #tpu.pipeline_mode<synchronous>, transform_indices = @transform_2, window_bounds = array<i64: 1, 64>}, {pipeline_mode = #tpu.pipeline_mode<synchronous>, transform_indices = @transform_3, window_bounds = array<i64: 576, 64>}, {pipeline_mode = #tpu.pipeline_mode<synchronous>, transform_indices = @transform_4, window_bounds = array<i64: 1, 64>}, {pipeline_mode = #tpu.pipeline_mode<synchronous>, transform_indices = @transform_5, window_bounds = array<i64: 64, 256>}, {pipeline_mode = #tpu.pipeline_mode<synchronous>, transform_indices = @transform_6, window_bounds = array<i64: 1, 256>}, {transform_indices = @transform_7, window_bounds = array<i64: 1, 64, 256>}]} {
    %c0 = arith.constant 0 : index
    %c0_0 = arith.constant 0 : index
    %c0_1 = arith.constant 0 : index
    %c0_2 = arith.constant 0 : index
    %0 = vector.load %arg1[%c0, %c0_0, %c0_1, %c0_2] : memref<1x8x8x256xf32, #tpu.memory_space<vmem>>, vector<1x8x8x256xf32>
    %1 = vector.shape_cast %0 : vector<1x8x8x256xf32> to vector<64x256xf32>
    %2 = arith.truncf %1 : vector<64x256xf32> to vector<64x256xbf16>
    %c0_3 = arith.constant 0 : index
    %c0_4 = arith.constant 0 : index
    %3 = vector.load %arg2[%c0_3, %c0_4] : memref<256x64xbf16, #tpu.memory_space<vmem>>, vector<256x64xbf16>
    %cst = arith.constant dense<0.000000e+00> : vector<64x64xf32>
    %4 = tpu.matmul %2, %3, %cst {dimension_numbers = #tpu.dot_dimension_numbers<[1], [0], [0], [1], [0, 0, 1, 1], [], []>} : vector<64x256xbf16>, vector<256x64xbf16>, vector<64x64xf32> -> vector<64x64xf32>
    %c0_5 = arith.constant 0 : index
    %c0_6 = arith.constant 0 : index
    %5 = vector.load %arg3[%c0_5, %c0_6] : memref<1x64xf32, #tpu.memory_space<vmem>>, vector<1x64xf32>
    %6 = vector.broadcast %5 : vector<1x64xf32> to vector<64x64xf32>
    %7 = arith.addf %4, %6 : vector<64x64xf32>
    %cst_7 = arith.constant 0.000000e+00 : f32
    %8 = vector.broadcast %cst_7 : f32 to vector<64x64xf32>
    %9 = arith.maximumf %7, %8 : vector<64x64xf32>
    %cst_8 = arith.constant 0.000000e+00 : f32
    %10 = vector.broadcast %cst_8 : f32 to vector<10x10x64xf32>
    %c0_9 = arith.constant 0 : index
    %c0_10 = arith.constant 0 : index
    %c0_11 = arith.constant 0 : index
    %11 = vector.load %arg9[%c0_9, %c0_10, %c0_11] : memref<10x10x64xf32, #tpu.memory_space<vmem>>, vector<10x10x64xf32>
    tpu.vector_store %arg9[%c0_9, %c0_10, %c0_11], %10 {strides = array<i32>} : memref<10x10x64xf32, #tpu.memory_space<vmem>>, vector<10x10x64xf32>,
    %12 = vector.shape_cast %9 : vector<64x64xf32> to vector<8x8x64xf32>
    %c1 = arith.constant 1 : index
    %c1_12 = arith.constant 1 : index
    %c0_13 = arith.constant 0 : index
    %13 = vector.load %arg9[%c1, %c1_12, %c0_13] : memref<10x10x64xf32, #tpu.memory_space<vmem>>, vector<8x8x64xf32>
    tpu.vector_store %arg9[%c1, %c1_12, %c0_13], %12 {strides = array<i32>} : memref<10x10x64xf32, #tpu.memory_space<vmem>>, vector<8x8x64xf32>,
    %cst_14 = arith.constant 0.000000e+00 : f32
    %14 = vector.broadcast %cst_14 : f32 to vector<64x64xf32>
    %c0_15 = arith.constant 0 : index
    %c0_16 = arith.constant 0 : index
    %c0_17 = arith.constant 0 : index
    %15 = vector.load %arg9[%c0_15, %c0_16, %c0_17] : memref<10x10x64xf32, #tpu.memory_space<vmem>>, vector<8x8x64xf32>
    %16 = vector.shape_cast %15 : vector<8x8x64xf32> to vector<64x64xf32>
    %17 = arith.truncf %16 : vector<64x64xf32> to vector<64x64xbf16>
    %c0_18 = arith.constant 0 : index
    %c0_19 = arith.constant 0 : index
    %18 = vector.load %arg4[%c0_18, %c0_19] : memref<576x64xbf16, #tpu.memory_space<vmem>>, vector<64x64xbf16>
    %cst_20 = arith.constant dense<0.000000e+00> : vector<64x64xf32>
    %19 = tpu.matmul %17, %18, %cst_20 {dimension_numbers = #tpu.dot_dimension_numbers<[1], [0], [0], [1], [0, 0, 1, 1], [], []>} : vector<64x64xbf16>, vector<64x64xbf16>, vector<64x64xf32> -> vector<64x64xf32>
    %20 = arith.addf %14, %19 : vector<64x64xf32>
    %c0_21 = arith.constant 0 : index
    %c1_22 = arith.constant 1 : index
    %c0_23 = arith.constant 0 : index
    %21 = vector.load %arg9[%c0_21, %c1_22, %c0_23] : memref<10x10x64xf32, #tpu.memory_space<vmem>>, vector<8x8x64xf32>
    %22 = vector.shape_cast %21 : vector<8x8x64xf32> to vector<64x64xf32>
    %23 = arith.truncf %22 : vector<64x64xf32> to vector<64x64xbf16>
    %c64 = arith.constant 64 : index
    %c0_24 = arith.constant 0 : index
    %24 = vector.load %arg4[%c64, %c0_24] : memref<576x64xbf16, #tpu.memory_space<vmem>>, vector<64x64xbf16>
    %cst_25 = arith.constant dense<0.000000e+00> : vector<64x64xf32>
    %25 = tpu.matmul %23, %24, %cst_25 {dimension_numbers = #tpu.dot_dimension_numbers<[1], [0], [0], [1], [0, 0, 1, 1], [], []>} : vector<64x64xbf16>, vector<64x64xbf16>, vector<64x64xf32> -> vector<64x64xf32>
    %26 = arith.addf %20, %25 : vector<64x64xf32>
    %c0_26 = arith.constant 0 : index
    %c2 = arith.constant 2 : index
    %c0_27 = arith.constant 0 : index
    %27 = vector.load %arg9[%c0_26, %c2, %c0_27] : memref<10x10x64xf32, #tpu.memory_space<vmem>>, vector<8x8x64xf32>
    %28 = vector.shape_cast %27 : vector<8x8x64xf32> to vector<64x64xf32>
    %29 = arith.truncf %28 : vector<64x64xf32> to vector<64x64xbf16>
    %c128 = arith.constant 128 : index
    %c0_28 = arith.constant 0 : index
    %30 = vector.load %arg4[%c128, %c0_28] : memref<576x64xbf16, #tpu.memory_space<vmem>>, vector<64x64xbf16>
    %cst_29 = arith.constant dense<0.000000e+00> : vector<64x64xf32>
    %31 = tpu.matmul %29, %30, %cst_29 {dimension_numbers = #tpu.dot_dimension_numbers<[1], [0], [0], [1], [0, 0, 1, 1], [], []>} : vector<64x64xbf16>, vector<64x64xbf16>, vector<64x64xf32> -> vector<64x64xf32>
    %32 = arith.addf %26, %31 : vector<64x64xf32>
    %c1_30 = arith.constant 1 : index
    %c0_31 = arith.constant 0 : index
    %c0_32 = arith.constant 0 : index
    %33 = vector.load %arg9[%c1_30, %c0_31, %c0_32] : memref<10x10x64xf32, #tpu.memory_space<vmem>>, vector<8x8x64xf32>
    %34 = vector.shape_cast %33 : vector<8x8x64xf32> to vector<64x64xf32>
    %35 = arith.truncf %34 : vector<64x64xf32> to vector<64x64xbf16>
    %c192 = arith.constant 192 : index
    %c0_33 = arith.constant 0 : index
    %36 = vector.load %arg4[%c192, %c0_33] : memref<576x64xbf16, #tpu.memory_space<vmem>>, vector<64x64xbf16>
    %cst_34 = arith.constant dense<0.000000e+00> : vector<64x64xf32>
    %37 = tpu.matmul %35, %36, %cst_34 {dimension_numbers = #tpu.dot_dimension_numbers<[1], [0], [0], [1], [0, 0, 1, 1], [], []>} : vector<64x64xbf16>, vector<64x64xbf16>, vector<64x64xf32> -> vector<64x64xf32>
    %38 = arith.addf %32, %37 : vector<64x64xf32>
    %c1_35 = arith.constant 1 : index
    %c1_36 = arith.constant 1 : index
    %c0_37 = arith.constant 0 : index
    %39 = vector.load %arg9[%c1_35, %c1_36, %c0_37] : memref<10x10x64xf32, #tpu.memory_space<vmem>>, vector<8x8x64xf32>
    %40 = vector.shape_cast %39 : vector<8x8x64xf32> to vector<64x64xf32>
    %41 = arith.truncf %40 : vector<64x64xf32> to vector<64x64xbf16>
    %c256 = arith.constant 256 : index
    %c0_38 = arith.constant 0 : index
    %42 = vector.load %arg4[%c256, %c0_38] : memref<576x64xbf16, #tpu.memory_space<vmem>>, vector<64x64xbf16>
    %cst_39 = arith.constant dense<0.000000e+00> : vector<64x64xf32>
    %43 = tpu.matmul %41, %42, %cst_39 {dimension_numbers = #tpu.dot_dimension_numbers<[1], [0], [0], [1], [0, 0, 1, 1], [], []>} : vector<64x64xbf16>, vector<64x64xbf16>, vector<64x64xf32> -> vector<64x64xf32>
    %44 = arith.addf %38, %43 : vector<64x64xf32>
    %c1_40 = arith.constant 1 : index
    %c2_41 = arith.constant 2 : index
    %c0_42 = arith.constant 0 : index
    %45 = vector.load %arg9[%c1_40, %c2_41, %c0_42] : memref<10x10x64xf32, #tpu.memory_space<vmem>>, vector<8x8x64xf32>
    %46 = vector.shape_cast %45 : vector<8x8x64xf32> to vector<64x64xf32>
    %47 = arith.truncf %46 : vector<64x64xf32> to vector<64x64xbf16>
    %c320 = arith.constant 320 : index
    %c0_43 = arith.constant 0 : index
    %48 = vector.load %arg4[%c320, %c0_43] : memref<576x64xbf16, #tpu.memory_space<vmem>>, vector<64x64xbf16>
    %cst_44 = arith.constant dense<0.000000e+00> : vector<64x64xf32>
    %49 = tpu.matmul %47, %48, %cst_44 {dimension_numbers = #tpu.dot_dimension_numbers<[1], [0], [0], [1], [0, 0, 1, 1], [], []>} : vector<64x64xbf16>, vector<64x64xbf16>, vector<64x64xf32> -> vector<64x64xf32>
    %50 = arith.addf %44, %49 : vector<64x64xf32>
    %c2_45 = arith.constant 2 : index
    %c0_46 = arith.constant 0 : index
    %c0_47 = arith.constant 0 : index
    %51 = vector.load %arg9[%c2_45, %c0_46, %c0_47] : memref<10x10x64xf32, #tpu.memory_space<vmem>>, vector<8x8x64xf32>
    %52 = vector.shape_cast %51 : vector<8x8x64xf32> to vector<64x64xf32>
    %53 = arith.truncf %52 : vector<64x64xf32> to vector<64x64xbf16>
    %c384 = arith.constant 384 : index
    %c0_48 = arith.constant 0 : index
    %54 = vector.load %arg4[%c384, %c0_48] : memref<576x64xbf16, #tpu.memory_space<vmem>>, vector<64x64xbf16>
    %cst_49 = arith.constant dense<0.000000e+00> : vector<64x64xf32>
    %55 = tpu.matmul %53, %54, %cst_49 {dimension_numbers = #tpu.dot_dimension_numbers<[1], [0], [0], [1], [0, 0, 1, 1], [], []>} : vector<64x64xbf16>, vector<64x64xbf16>, vector<64x64xf32> -> vector<64x64xf32>
    %56 = arith.addf %50, %55 : vector<64x64xf32>
    %c2_50 = arith.constant 2 : index
    %c1_51 = arith.constant 1 : index
    %c0_52 = arith.constant 0 : index
    %57 = vector.load %arg9[%c2_50, %c1_51, %c0_52] : memref<10x10x64xf32, #tpu.memory_space<vmem>>, vector<8x8x64xf32>
    %58 = vector.shape_cast %57 : vector<8x8x64xf32> to vector<64x64xf32>
    %59 = arith.truncf %58 : vector<64x64xf32> to vector<64x64xbf16>
    %c448 = arith.constant 448 : index
    %c0_53 = arith.constant 0 : index
    %60 = vector.load %arg4[%c448, %c0_53] : memref<576x64xbf16, #tpu.memory_space<vmem>>, vector<64x64xbf16>
    %cst_54 = arith.constant dense<0.000000e+00> : vector<64x64xf32>
    %61 = tpu.matmul %59, %60, %cst_54 {dimension_numbers = #tpu.dot_dimension_numbers<[1], [0], [0], [1], [0, 0, 1, 1], [], []>} : vector<64x64xbf16>, vector<64x64xbf16>, vector<64x64xf32> -> vector<64x64xf32>
    %62 = arith.addf %56, %61 : vector<64x64xf32>
    %c2_55 = arith.constant 2 : index
    %c2_56 = arith.constant 2 : index
    %c0_57 = arith.constant 0 : index
    %63 = vector.load %arg9[%c2_55, %c2_56, %c0_57] : memref<10x10x64xf32, #tpu.memory_space<vmem>>, vector<8x8x64xf32>
    %64 = vector.shape_cast %63 : vector<8x8x64xf32> to vector<64x64xf32>
    %65 = arith.truncf %64 : vector<64x64xf32> to vector<64x64xbf16>
    %c512 = arith.constant 512 : index
    %c0_58 = arith.constant 0 : index
    %66 = vector.load %arg4[%c512, %c0_58] : memref<576x64xbf16, #tpu.memory_space<vmem>>, vector<64x64xbf16>
    %cst_59 = arith.constant dense<0.000000e+00> : vector<64x64xf32>
    %67 = tpu.matmul %65, %66, %cst_59 {dimension_numbers = #tpu.dot_dimension_numbers<[1], [0], [0], [1], [0, 0, 1, 1], [], []>} : vector<64x64xbf16>, vector<64x64xbf16>, vector<64x64xf32> -> vector<64x64xf32>
    %68 = arith.addf %62, %67 : vector<64x64xf32>
    %c0_60 = arith.constant 0 : index
    %c0_61 = arith.constant 0 : index
    %69 = vector.load %arg5[%c0_60, %c0_61] : memref<1x64xf32, #tpu.memory_space<vmem>>, vector<1x64xf32>
    %70 = vector.broadcast %69 : vector<1x64xf32> to vector<64x64xf32>
    %71 = arith.addf %68, %70 : vector<64x64xf32>
    %cst_62 = arith.constant 0.000000e+00 : f32
    %72 = vector.broadcast %cst_62 : f32 to vector<64x64xf32>
    %73 = arith.maximumf %71, %72 : vector<64x64xf32>
    %74 = arith.truncf %73 : vector<64x64xf32> to vector<64x64xbf16>
    %c0_63 = arith.constant 0 : index
    %c0_64 = arith.constant 0 : index
    %75 = vector.load %arg6[%c0_63, %c0_64] : memref<64x256xbf16, #tpu.memory_space<vmem>>, vector<64x256xbf16>
    %cst_65 = arith.constant dense<0.000000e+00> : vector<64x256xf32>
    %76 = tpu.matmul %74, %75, %cst_65 {dimension_numbers = #tpu.dot_dimension_numbers<[1], [0], [0], [1], [0, 0, 1, 1], [], []>} : vector<64x64xbf16>, vector<64x256xbf16>, vector<64x256xf32> -> vector<64x256xf32>
    %c0_66 = arith.constant 0 : index
    %c0_67 = arith.constant 0 : index
    %77 = vector.load %arg7[%c0_66, %c0_67] : memref<1x256xf32, #tpu.memory_space<vmem>>, vector<1x256xf32>
    %78 = vector.broadcast %77 : vector<1x256xf32> to vector<64x256xf32>
    %79 = arith.addf %76, %78 : vector<64x256xf32>
    %80 = arith.addf %79, %1 : vector<64x256xf32>
    %cst_68 = arith.constant 0.000000e+00 : f32
    %81 = vector.broadcast %cst_68 : f32 to vector<64x256xf32>
    %82 = arith.maximumf %80, %81 : vector<64x256xf32>
    %83 = vector.shape_cast %82 : vector<64x256xf32> to vector<1x64x256xf32>
    %c0_69 = arith.constant 0 : index
    %c0_70 = arith.constant 0 : index
    %c0_71 = arith.constant 0 : index
    %84 = vector.load %arg8[%c0_69, %c0_70, %c0_71] : memref<1x64x256xf32, #tpu.memory_space<vmem>>, vector<1x64x256xf32>
    tpu.vector_store %arg8[%c0_69, %c0_70, %c0_71], %83 {strides = array<i32>} : memref<1x64x256xf32, #tpu.memory_space<vmem>>, vector<1x64x256xf32>,
    return
  }
  func.func @transform_0(%arg0: i32) -> (i32, i32, i32, i32) {
    %c0_i32 = arith.constant 0 : i32
    %c0_i32_0 = arith.constant 0 : i32
    %c0_i32_1 = arith.constant 0 : i32
    %c0_i32_2 = arith.constant 0 : i32
    return %arg0, %c0_i32, %c0_i32_0, %c0_i32_1 : i32, i32, i32, i32
  }
  func.func @transform_1(%arg0: i32) -> (i32, i32) {
    %c0_i32 = arith.constant 0 : i32
    %c0_i32_0 = arith.constant 0 : i32
    %c0_i32_1 = arith.constant 0 : i32
    return %c0_i32, %c0_i32_0 : i32, i32
  }
  func.func @transform_2(%arg0: i32) -> (i32, i32) {
    %c0_i32 = arith.constant 0 : i32
    %c0_i32_0 = arith.constant 0 : i32
    %c0_i32_1 = arith.constant 0 : i32
    return %c0_i32, %c0_i32_0 : i32, i32
  }
  func.func @transform_3(%arg0: i32) -> (i32, i32) {
    %c0_i32 = arith.constant 0 : i32
    %c0_i32_0 = arith.constant 0 : i32
    %c0_i32_1 = arith.constant 0 : i32
    return %c0_i32, %c0_i32_0 : i32, i32
  }
  func.func @transform_4(%arg0: i32) -> (i32, i32) {
    %c0_i32 = arith.constant 0 : i32
    %c0_i32_0 = arith.constant 0 : i32
    %c0_i32_1 = arith.constant 0 : i32
    return %c0_i32, %c0_i32_0 : i32, i32
  }
  func.func @transform_5(%arg0: i32) -> (i32, i32) {
    %c0_i32 = arith.constant 0 : i32
    %c0_i32_0 = arith.constant 0 : i32
    %c0_i32_1 = arith.constant 0 : i32
    return %c0_i32, %c0_i32_0 : i32, i32
  }
  func.func @transform_6(%arg0: i32) -> (i32, i32) {
    %c0_i32 = arith.constant 0 : i32
    %c0_i32_0 = arith.constant 0 : i32
    %c0_i32_1 = arith.constant 0 : i32
    return %c0_i32, %c0_i32_0 : i32, i32
  }
  func.func @transform_7(%arg0: i32) -> (i32, i32, i32) {
    %c0_i32 = arith.constant 0 : i32
    %c0_i32_0 = arith.constant 0 : i32
    %c0_i32_1 = arith.constant 0 : i32
    return %arg0, %c0_i32, %c0_i32_0 : i32, i32, i32
  }
}

module attributes {stable_mosaic.version = 11 : i64} {
  func.func @_bottleneck_kernel(%arg0: i32, %arg1: memref<1x8x8x256xf32, #tpu.memory_space<vmem>>, %arg2: memref<256x64xbf16, #tpu.memory_space<vmem>>, %arg3: memref<1x64xf32, #tpu.memory_space<vmem>>, %arg4: memref<576x64xbf16, #tpu.memory_space<vmem>>, %arg5: memref<1x64xf32, #tpu.memory_space<vmem>>, %arg6: memref<64x256xbf16, #tpu.memory_space<vmem>>, %arg7: memref<1x256xf32, #tpu.memory_space<vmem>>, %arg8: memref<1x64x256xf32, #tpu.memory_space<vmem>>, %arg9: memref<10x10x64xf32, #tpu.memory_space<vmem>>) attributes {dimension_semantics = [#tpu.dimension_semantics<parallel>], iteration_bounds = array<i64: 2>, scalar_prefetch = 0 : i64, scratch_operands = 1 : i64, tpu.core_type = #tpu.core_type<tc>, window_params = [{transform_indices = @transform_0, window_bounds = array<i64: 1, 8, 8, 256>}, {pipeline_mode = #tpu.pipeline_mode<synchronous>, transform_indices = @transform_1, window_bounds = array<i64: 256, 64>}, {pipeline_mode = #tpu.pipeline_mode<synchronous>, transform_indices = @transform_2, window_bounds = array<i64: 1, 64>}, {pipeline_mode = #tpu.pipeline_mode<synchronous>, transform_indices = @transform_3, window_bounds = array<i64: 576, 64>}, {pipeline_mode = #tpu.pipeline_mode<synchronous>, transform_indices = @transform_4, window_bounds = array<i64: 1, 64>}, {pipeline_mode = #tpu.pipeline_mode<synchronous>, transform_indices = @transform_5, window_bounds = array<i64: 64, 256>}, {pipeline_mode = #tpu.pipeline_mode<synchronous>, transform_indices = @transform_6, window_bounds = array<i64: 1, 256>}, {transform_indices = @transform_7, window_bounds = array<i64: 1, 64, 256>}]} {
    %c0 = arith.constant 0 : index
    %c0_0 = arith.constant 0 : index
    %c0_1 = arith.constant 0 : index
    %c0_2 = arith.constant 0 : index
    %0 = vector.load %arg1[%c0, %c0_0, %c0_1, %c0_2] : memref<1x8x8x256xf32, #tpu.memory_space<vmem>>, vector<1x8x8x256xf32>
    %1 = vector.shape_cast %0 : vector<1x8x8x256xf32> to vector<64x256xf32>
    %2 = arith.truncf %1 : vector<64x256xf32> to vector<64x256xbf16>
    %c0_3 = arith.constant 0 : index
    %c0_4 = arith.constant 0 : index
    %3 = vector.load %arg2[%c0_3, %c0_4] : memref<256x64xbf16, #tpu.memory_space<vmem>>, vector<256x64xbf16>
    %cst = arith.constant dense<0.000000e+00> : vector<64x64xf32>
    %4 = tpu.matmul %2, %3, %cst {dimension_numbers = #tpu.dot_dimension_numbers<[1], [0], [0], [1], [0, 0, 1, 1], [], []>} : vector<64x256xbf16>, vector<256x64xbf16>, vector<64x64xf32> -> vector<64x64xf32>
    %c0_5 = arith.constant 0 : index
    %c0_6 = arith.constant 0 : index
    %5 = vector.load %arg3[%c0_5, %c0_6] : memref<1x64xf32, #tpu.memory_space<vmem>>, vector<1x64xf32>
    %6 = vector.broadcast %5 : vector<1x64xf32> to vector<64x64xf32>
    %7 = arith.addf %4, %6 : vector<64x64xf32>
    %cst_7 = arith.constant 0.000000e+00 : f32
    %8 = vector.broadcast %cst_7 : f32 to vector<64x64xf32>
    %9 = arith.maximumf %7, %8 : vector<64x64xf32>
    %cst_8 = arith.constant 0.000000e+00 : f32
    %10 = vector.broadcast %cst_8 : f32 to vector<10x10x64xf32>
    %c0_9 = arith.constant 0 : index
    %c0_10 = arith.constant 0 : index
    %c0_11 = arith.constant 0 : index
    %11 = vector.load %arg9[%c0_9, %c0_10, %c0_11] : memref<10x10x64xf32, #tpu.memory_space<vmem>>, vector<10x10x64xf32>
    tpu.vector_store %arg9[%c0_9, %c0_10, %c0_11], %10 {strides = array<i32>} : memref<10x10x64xf32, #tpu.memory_space<vmem>>, vector<10x10x64xf32>,
    %12 = vector.shape_cast %9 : vector<64x64xf32> to vector<8x8x64xf32>
    %c1 = arith.constant 1 : index
    %c1_12 = arith.constant 1 : index
    %c0_13 = arith.constant 0 : index
    %13 = vector.load %arg9[%c1, %c1_12, %c0_13] : memref<10x10x64xf32, #tpu.memory_space<vmem>>, vector<8x8x64xf32>
    tpu.vector_store %arg9[%c1, %c1_12, %c0_13], %12 {strides = array<i32>} : memref<10x10x64xf32, #tpu.memory_space<vmem>>, vector<8x8x64xf32>,
    %cst_14 = arith.constant 0.000000e+00 : f32
    %14 = vector.broadcast %cst_14 : f32 to vector<64x64xf32>
    %c0_15 = arith.constant 0 : index
    %c0_16 = arith.constant 0 : index
    %c0_17 = arith.constant 0 : index
    %15 = vector.load %arg9[%c0_15, %c0_16, %c0_17] : memref<10x10x64xf32, #tpu.memory_space<vmem>>, vector<8x8x64xf32>
    %16 = vector.shape_cast %15 : vector<8x8x64xf32> to vector<64x64xf32>
    %17 = arith.truncf %16 : vector<64x64xf32> to vector<64x64xbf16>
    %c0_18 = arith.constant 0 : index
    %c0_19 = arith.constant 0 : index
    %18 = vector.load %arg4[%c0_18, %c0_19] : memref<576x64xbf16, #tpu.memory_space<vmem>>, vector<64x64xbf16>
    %cst_20 = arith.constant dense<0.000000e+00> : vector<64x64xf32>
    %19 = tpu.matmul %17, %18, %cst_20 {dimension_numbers = #tpu.dot_dimension_numbers<[1], [0], [0], [1], [0, 0, 1, 1], [], []>} : vector<64x64xbf16>, vector<64x64xbf16>, vector<64x64xf32> -> vector<64x64xf32>
    %20 = arith.addf %14, %19 : vector<64x64xf32>
    %c0_21 = arith.constant 0 : index
    %c1_22 = arith.constant 1 : index
    %c0_23 = arith.constant 0 : index
    %21 = vector.load %arg9[%c0_21, %c1_22, %c0_23] : memref<10x10x64xf32, #tpu.memory_space<vmem>>, vector<8x8x64xf32>
    %22 = vector.shape_cast %21 : vector<8x8x64xf32> to vector<64x64xf32>
    %23 = arith.truncf %22 : vector<64x64xf32> to vector<64x64xbf16>
    %c64 = arith.constant 64 : index
    %c0_24 = arith.constant 0 : index
    %24 = vector.load %arg4[%c64, %c0_24] : memref<576x64xbf16, #tpu.memory_space<vmem>>, vector<64x64xbf16>
    %cst_25 = arith.constant dense<0.000000e+00> : vector<64x64xf32>
    %25 = tpu.matmul %23, %24, %cst_25 {dimension_numbers = #tpu.dot_dimension_numbers<[1], [0], [0], [1], [0, 0, 1, 1], [], []>} : vector<64x64xbf16>, vector<64x64xbf16>, vector<64x64xf32> -> vector<64x64xf32>
    %26 = arith.addf %20, %25 : vector<64x64xf32>
    %c0_26 = arith.constant 0 : index
    %c2 = arith.constant 2 : index
    %c0_27 = arith.constant 0 : index
    %27 = vector.load %arg9[%c0_26, %c2, %c0_27] : memref<10x10x64xf32, #tpu.memory_space<vmem>>, vector<8x8x64xf32>
    %28 = vector.shape_cast %27 : vector<8x8x64xf32> to vector<64x64xf32>
    %29 = arith.truncf %28 : vector<64x64xf32> to vector<64x64xbf16>
    %c128 = arith.constant 128 : index
    %c0_28 = arith.constant 0 : index
    %30 = vector.load %arg4[%c128, %c0_28] : memref<576x64xbf16, #tpu.memory_space<vmem>>, vector<64x64xbf16>
    %cst_29 = arith.constant dense<0.000000e+00> : vector<64x64xf32>
    %31 = tpu.matmul %29, %30, %cst_29 {dimension_numbers = #tpu.dot_dimension_numbers<[1], [0], [0], [1], [0, 0, 1, 1], [], []>} : vector<64x64xbf16>, vector<64x64xbf16>, vector<64x64xf32> -> vector<64x64xf32>
    %32 = arith.addf %26, %31 : vector<64x64xf32>
    %c1_30 = arith.constant 1 : index
    %c0_31 = arith.constant 0 : index
    %c0_32 = arith.constant 0 : index
    %33 = vector.load %arg9[%c1_30, %c0_31, %c0_32] : memref<10x10x64xf32, #tpu.memory_space<vmem>>, vector<8x8x64xf32>
    %34 = vector.shape_cast %33 : vector<8x8x64xf32> to vector<64x64xf32>
    %35 = arith.truncf %34 : vector<64x64xf32> to vector<64x64xbf16>
    %c192 = arith.constant 192 : index
    %c0_33 = arith.constant 0 : index
    %36 = vector.load %arg4[%c192, %c0_33] : memref<576x64xbf16, #tpu.memory_space<vmem>>, vector<64x64xbf16>
    %cst_34 = arith.constant dense<0.000000e+00> : vector<64x64xf32>
    %37 = tpu.matmul %35, %36, %cst_34 {dimension_numbers = #tpu.dot_dimension_numbers<[1], [0], [0], [1], [0, 0, 1, 1], [], []>} : vector<64x64xbf16>, vector<64x64xbf16>, vector<64x64xf32> -> vector<64x64xf32>
    %38 = arith.addf %32, %37 : vector<64x64xf32>
    %c1_35 = arith.constant 1 : index
    %c1_36 = arith.constant 1 : index
    %c0_37 = arith.constant 0 : index
    %39 = vector.load %arg9[%c1_35, %c1_36, %c0_37] : memref<10x10x64xf32, #tpu.memory_space<vmem>>, vector<8x8x64xf32>
    %40 = vector.shape_cast %39 : vector<8x8x64xf32> to vector<64x64xf32>
    %41 = arith.truncf %40 : vector<64x64xf32> to vector<64x64xbf16>
    %c256 = arith.constant 256 : index
    %c0_38 = arith.constant 0 : index
    %42 = vector.load %arg4[%c256, %c0_38] : memref<576x64xbf16, #tpu.memory_space<vmem>>, vector<64x64xbf16>
    %cst_39 = arith.constant dense<0.000000e+00> : vector<64x64xf32>
    %43 = tpu.matmul %41, %42, %cst_39 {dimension_numbers = #tpu.dot_dimension_numbers<[1], [0], [0], [1], [0, 0, 1, 1], [], []>} : vector<64x64xbf16>, vector<64x64xbf16>, vector<64x64xf32> -> vector<64x64xf32>
    %44 = arith.addf %38, %43 : vector<64x64xf32>
    %c1_40 = arith.constant 1 : index
    %c2_41 = arith.constant 2 : index
    %c0_42 = arith.constant 0 : index
    %45 = vector.load %arg9[%c1_40, %c2_41, %c0_42] : memref<10x10x64xf32, #tpu.memory_space<vmem>>, vector<8x8x64xf32>
    %46 = vector.shape_cast %45 : vector<8x8x64xf32> to vector<64x64xf32>
    %47 = arith.truncf %46 : vector<64x64xf32> to vector<64x64xbf16>
    %c320 = arith.constant 320 : index
    %c0_43 = arith.constant 0 : index
    %48 = vector.load %arg4[%c320, %c0_43] : memref<576x64xbf16, #tpu.memory_space<vmem>>, vector<64x64xbf16>
    %cst_44 = arith.constant dense<0.000000e+00> : vector<64x64xf32>
    %49 = tpu.matmul %47, %48, %cst_44 {dimension_numbers = #tpu.dot_dimension_numbers<[1], [0], [0], [1], [0, 0, 1, 1], [], []>} : vector<64x64xbf16>, vector<64x64xbf16>, vector<64x64xf32> -> vector<64x64xf32>
    %50 = arith.addf %44, %49 : vector<64x64xf32>
    %c2_45 = arith.constant 2 : index
    %c0_46 = arith.constant 0 : index
    %c0_47 = arith.constant 0 : index
    %51 = vector.load %arg9[%c2_45, %c0_46, %c0_47] : memref<10x10x64xf32, #tpu.memory_space<vmem>>, vector<8x8x64xf32>
    %52 = vector.shape_cast %51 : vector<8x8x64xf32> to vector<64x64xf32>
    %53 = arith.truncf %52 : vector<64x64xf32> to vector<64x64xbf16>
    %c384 = arith.constant 384 : index
    %c0_48 = arith.constant 0 : index
    %54 = vector.load %arg4[%c384, %c0_48] : memref<576x64xbf16, #tpu.memory_space<vmem>>, vector<64x64xbf16>
    %cst_49 = arith.constant dense<0.000000e+00> : vector<64x64xf32>
    %55 = tpu.matmul %53, %54, %cst_49 {dimension_numbers = #tpu.dot_dimension_numbers<[1], [0], [0], [1], [0, 0, 1, 1], [], []>} : vector<64x64xbf16>, vector<64x64xbf16>, vector<64x64xf32> -> vector<64x64xf32>
    %56 = arith.addf %50, %55 : vector<64x64xf32>
    %c2_50 = arith.constant 2 : index
    %c1_51 = arith.constant 1 : index
    %c0_52 = arith.constant 0 : index
    %57 = vector.load %arg9[%c2_50, %c1_51, %c0_52] : memref<10x10x64xf32, #tpu.memory_space<vmem>>, vector<8x8x64xf32>
    %58 = vector.shape_cast %57 : vector<8x8x64xf32> to vector<64x64xf32>
    %59 = arith.truncf %58 : vector<64x64xf32> to vector<64x64xbf16>
    %c448 = arith.constant 448 : index
    %c0_53 = arith.constant 0 : index
    %60 = vector.load %arg4[%c448, %c0_53] : memref<576x64xbf16, #tpu.memory_space<vmem>>, vector<64x64xbf16>
    %cst_54 = arith.constant dense<0.000000e+00> : vector<64x64xf32>
    %61 = tpu.matmul %59, %60, %cst_54 {dimension_numbers = #tpu.dot_dimension_numbers<[1], [0], [0], [1], [0, 0, 1, 1], [], []>} : vector<64x64xbf16>, vector<64x64xbf16>, vector<64x64xf32> -> vector<64x64xf32>
    %62 = arith.addf %56, %61 : vector<64x64xf32>
    %c2_55 = arith.constant 2 : index
    %c2_56 = arith.constant 2 : index
    %c0_57 = arith.constant 0 : index
    %63 = vector.load %arg9[%c2_55, %c2_56, %c0_57] : memref<10x10x64xf32, #tpu.memory_space<vmem>>, vector<8x8x64xf32>
    %64 = vector.shape_cast %63 : vector<8x8x64xf32> to vector<64x64xf32>
    %65 = arith.truncf %64 : vector<64x64xf32> to vector<64x64xbf16>
    %c512 = arith.constant 512 : index
    %c0_58 = arith.constant 0 : index
    %66 = vector.load %arg4[%c512, %c0_58] : memref<576x64xbf16, #tpu.memory_space<vmem>>, vector<64x64xbf16>
    %cst_59 = arith.constant dense<0.000000e+00> : vector<64x64xf32>
    %67 = tpu.matmul %65, %66, %cst_59 {dimension_numbers = #tpu.dot_dimension_numbers<[1], [0], [0], [1], [0, 0, 1, 1], [], []>} : vector<64x64xbf16>, vector<64x64xbf16>, vector<64x64xf32> -> vector<64x64xf32>
    %68 = arith.addf %62, %67 : vector<64x64xf32>
    %c0_60 = arith.constant 0 : index
    %c0_61 = arith.constant 0 : index
    %69 = vector.load %arg5[%c0_60, %c0_61] : memref<1x64xf32, #tpu.memory_space<vmem>>, vector<1x64xf32>
    %70 = vector.broadcast %69 : vector<1x64xf32> to vector<64x64xf32>
    %71 = arith.addf %68, %70 : vector<64x64xf32>
    %cst_62 = arith.constant 0.000000e+00 : f32
    %72 = vector.broadcast %cst_62 : f32 to vector<64x64xf32>
    %73 = arith.maximumf %71, %72 : vector<64x64xf32>
    %74 = arith.truncf %73 : vector<64x64xf32> to vector<64x64xbf16>
    %c0_63 = arith.constant 0 : index
    %c0_64 = arith.constant 0 : index
    %75 = vector.load %arg6[%c0_63, %c0_64] : memref<64x256xbf16, #tpu.memory_space<vmem>>, vector<64x256xbf16>
    %cst_65 = arith.constant dense<0.000000e+00> : vector<64x256xf32>
    %76 = tpu.matmul %74, %75, %cst_65 {dimension_numbers = #tpu.dot_dimension_numbers<[1], [0], [0], [1], [0, 0, 1, 1], [], []>} : vector<64x64xbf16>, vector<64x256xbf16>, vector<64x256xf32> -> vector<64x256xf32>
    %c0_66 = arith.constant 0 : index
    %c0_67 = arith.constant 0 : index
    %77 = vector.load %arg7[%c0_66, %c0_67] : memref<1x256xf32, #tpu.memory_space<vmem>>, vector<1x256xf32>
    %78 = vector.broadcast %77 : vector<1x256xf32> to vector<64x256xf32>
    %79 = arith.addf %76, %78 : vector<64x256xf32>
    %80 = arith.addf %79, %1 : vector<64x256xf32>
    %cst_68 = arith.constant 0.000000e+00 : f32
    %81 = vector.broadcast %cst_68 : f32 to vector<64x256xf32>
    %82 = arith.maximumf %80, %81 : vector<64x256xf32>
    %83 = vector.shape_cast %82 : vector<64x256xf32> to vector<1x64x256xf32>
    %c0_69 = arith.constant 0 : index
    %c0_70 = arith.constant 0 : index
    %c0_71 = arith.constant 0 : index
    %84 = vector.load %arg8[%c0_69, %c0_70, %c0_71] : memref<1x64x256xf32, #tpu.memory_space<vmem>>, vector<1x64x256xf32>
    tpu.vector_store %arg8[%c0_69, %c0_70, %c0_71], %83 {strides = array<i32>} : memref<1x64x256xf32, #tpu.memory_space<vmem>>, vector<1x64x256xf32>,
    return
  }
  func.func @transform_0(%arg0: i32) -> (i32, i32, i32, i32) {
    %c0_i32 = arith.constant 0 : i32
    %c0_i32_0 = arith.constant 0 : i32
    %c0_i32_1 = arith.constant 0 : i32
    %c0_i32_2 = arith.constant 0 : i32
    return %arg0, %c0_i32, %c0_i32_0, %c0_i32_1 : i32, i32, i32, i32
  }
  func.func @transform_1(%arg0: i32) -> (i32, i32) {
    %c0_i32 = arith.constant 0 : i32
    %c0_i32_0 = arith.constant 0 : i32
    %c0_i32_1 = arith.constant 0 : i32
    return %c0_i32, %c0_i32_0 : i32, i32
  }
  func.func @transform_2(%arg0: i32) -> (i32, i32) {
    %c0_i32 = arith.constant 0 : i32
    %c0_i32_0 = arith.constant 0 : i32
    %c0_i32_1 = arith.constant 0 : i32
    return %c0_i32, %c0_i32_0 : i32, i32
  }
  func.func @transform_3(%arg0: i32) -> (i32, i32) {
    %c0_i32 = arith.constant 0 : i32
    %c0_i32_0 = arith.constant 0 : i32
    %c0_i32_1 = arith.constant 0 : i32
    return %c0_i32, %c0_i32_0 : i32, i32
  }
  func.func @transform_4(%arg0: i32) -> (i32, i32) {
    %c0_i32 = arith.constant 0 : i32
    %c0_i32_0 = arith.constant 0 : i32
    %c0_i32_1 = arith.constant 0 : i32
    return %c0_i32, %c0_i32_0 : i32, i32
  }
  func.func @transform_5(%arg0: i32) -> (i32, i32) {
    %c0_i32 = arith.constant 0 : i32
    %c0_i32_0 = arith.constant 0 : i32
    %c0_i32_1 = arith.constant 0 : i32
    return %c0_i32, %c0_i32_0 : i32, i32
  }
  func.func @transform_6(%arg0: i32) -> (i32, i32) {
    %c0_i32 = arith.constant 0 : i32
    %c0_i32_0 = arith.constant 0 : i32
    %c0_i32_1 = arith.constant 0 : i32
    return %c0_i32, %c0_i32_0 : i32, i32
  }
  func.func @transform_7(%arg0: i32) -> (i32, i32, i32) {
    %c0_i32 = arith.constant 0 : i32
    %c0_i32_0 = arith.constant 0 : i32
    %c0_i32_1 = arith.constant 0 : i32
    return %arg0, %c0_i32, %c0_i32_0 : i32, i32, i32
  }
}

</mosaic_0001>

<bundles_post_ra>
// kernel: shared_module_bh_forward.10
= control target key start
LH: loop header
LB: loop body
LE: loop exit
PB: predicated region body
PF: predicated region fallthrough
CT: control target
= control target key end

     0   :  { %s2125_s24 = smov 0   ;;  %s2378_s0 = inlined_call_operand.vmem [shape: f32[2,8,8,128], index: 0, kind: input, shape index: {}]   ;;  %s2379_s1 = inlined_call_operand.vmem [shape: bf16[128,32], index: 1, kind: input, shape index: {}]   ;;  %s2380_s2 = inlined_call_operand.vmem [shape: f32[1,32], index: 2, kind: input, shape index: {}]   ;;  %s2381_s3 = inlined_call_operand.vmem [shape: bf16[288,32], index: 3, kind: input, shape index: {}]   ;;  %s2382_s4 = inlined_call_operand.vmem [shape: f32[1,32], index: 4, kind: input, shape index: {}]   ;;  %s2383_s5 = inlined_call_operand.vmem [shape: bf16[32,128], index: 5, kind: input, shape index: {}]   ;;  %s2384_s6 = inlined_call_operand.vmem [shape: f32[1,128], index: 6, kind: input, shape index: {}]   ;;  %s2385_s7 = inlined_call_operand.vmem [shape: f32[2,64,128], index: 7, kind: output, shape index: {}]  }
   0x1 LB: > { %s1675_s25 = sadd.s32 4294967295, %s2082_s24   ;;  %p1679_p0 = scmp.ge.s32.totalorder %s2082_s24, 1  ;;  %s2082_s24 = sphi %s2125_s24, %s17_s24  }
   0x2   : > { %p237_p1 = scmp.lt.s32.totalorder %s2082_s24, 3 }
   0x4   : > { %p238_p2 = pnand %p1679_p0, %p237_p1 }
   0x5   : > { %v2048_v0 = vld [vmem:[%s2379_s1] sm:$0xff] (!%p238_p2)   ;;  %p269_p3 = scmp.lt.s32.totalorder (!%p238_p2), %s1675_s25, 1  ;;  %v2049_v1 = vld [vmem:[%s2379_s1 + $0x8] sm:$0xff] (!%p238_p2)   ;;  %v2050_v2 = vld [vmem:[%s2379_s1 + $0x10] sm:$0xff] (!%p238_p2)   ;;  %vm436_vm0 = vcmask (!%p238_p2), 261120   ;;  %vm438_vm1 = vcmask (!%p238_p2), 254976  }
   0x6   : > { %241 = sbr.rel (%p238_p2) target bundleno = 803 (0x323), region = 48  ;;  %1831 = vmatprep.subr.bf16.mxu0 (!%p238_p2), %v2048_v0  ;;  %v2051_v3 = vld [vmem:[%s2379_s1 + $0x18] sm:$0xff] (!%p238_p2)   ;;  %v2052_v7 = vld [vmem:[%s2379_s1 + $0x20] sm:$0xff] (!%p238_p2)   ;;  %v2053_v8 = vld [vmem:[%s2379_s1 + $0x28] sm:$0xff] (!%p238_p2)   ;;  %v2084_v20 = vmov (!%p238_p2), 0.0  }
   0x7   : > { %1832 = vmatpush3.bf16.msra.mxu0 (!%p238_p2), %v2048_v0  ;;  %v2054_v9 = vld [vmem:[%s2379_s1 + $0x30] sm:$0xff] (!%p238_p2)   ;;  %v2055_v10 = vld [vmem:[%s2379_s1 + $0x38] sm:$0xff] (!%p238_p2)   ;;  %444 = vst.msk [vmem:[#allocation2 + $0x30] sm:$0xff] (!%p238_p2), %vm436_vm0, %v2084_v20  ;;  %437 = vst.msk [vmem:[#allocation2] sm:$0xff] (!%p238_p2), %vm436_vm0, %v2084_v20 }
   0x8   : > { %1833 = vmatprep.subr.bf16.mxu0 (!%p238_p2), %v2049_v1  ;;  %445 = vst.msk [vmem:[#allocation2 + $0x38] sm:$0x3] (!%p238_p2), %vm438_vm1, %v2084_v20  ;;  %439 = vst.msk [vmem:[#allocation2 + $0x8] sm:$0x3] (!%p238_p2), %vm438_vm1, %v2084_v20  ;;  %v2056_v21 = vld [vmem:[%s2381_s3 + $0x10] sm:$0xff] (!%p238_p2)   ;;  %v2058_v23 = vld [vmem:[%s2381_s3 + $0x18] sm:$0xff] (!%p238_p2)  }
   0x9   : > { %440 = vst.msk [vmem:[#allocation2 + $0x10] sm:$0xff] (!%p238_p2), %vm436_vm0, %v2084_v20  ;;  %442 = vst.msk [vmem:[#allocation2 + $0x20] sm:$0xff] (!%p238_p2), %vm436_vm0, %v2084_v20  ;;  %v2057_v22 = vld [vmem:[%s2381_s3 + $0x30] sm:$0xff] (!%p238_p2)   ;;  %v2059_v24 = vld [vmem:[%s2381_s3 + $0x38] sm:$0xff] (!%p238_p2)  }
   0xa   : > { %441 = vst.msk [vmem:[#allocation2 + $0x18] sm:$0x3] (!%p238_p2), %vm438_vm1, %v2084_v20  ;;  %443 = vst.msk [vmem:[#allocation2 + $0x28] sm:$0x3] (!%p238_p2), %vm438_vm1, %v2084_v20  ;;  %1891 = vmatprep.subr.bf16.mxu1 (!%p238_p2), %v2057_v22  ;;  %v2060_v25 = vld [vmem:[%s2381_s3 + $0x40] sm:$0xff] (!%p238_p2)   ;;  %v2063_v63 = vld [vmem:[%s2381_s3 + $0x8] sm:$0xff] (!%p238_p2)  }
   0xb   : > { %1834 = vmatpush3.bf16.msra.mxu0 (!%p238_p2), %v2049_v1  ;;  %446 = vst.msk [vmem:[#allocation2 + $0x40] sm:$0xff] (!%p238_p2), %vm436_vm0, %v2084_v20  ;;  %448 = vst.msk [vmem:[#allocation2 + $0x50] sm:$0xff] (!%p238_p2), %vm436_vm0, %v2084_v20  ;;  %1892 = vmatpush3.bf16.msra.mxu1 (!%p238_p2), %v2057_v22  ;;  %v2061_v26 = vld [vmem:[%s2381_s3] sm:$0xff] (!%p238_p2)   ;;  %v2062_v1 = vld [vmem:[%s2381_s3 + $0x48] sm:$0xff] (!%p238_p2)  }
   0xc   : > { %1835 = vmatprep.subr.bf16.mxu0 (!%p238_p2), %v2050_v2  ;;  %447 = vst.msk [vmem:[#allocation2 + $0x48] sm:$0x3] (!%p238_p2), %vm438_vm1, %v2084_v20  ;;  %449 = vst.msk [vmem:[#allocation2 + $0x58] sm:$0x3] (!%p238_p2), %vm438_vm1, %v2084_v20  ;;  %1893 = vmatprep.subr.bf16.mxu1 (!%p238_p2), %v2059_v24  ;;  %v1684_v27 = vld [vmem:[%s2380_s2] ss:$0 sm:$0xff] (!%p238_p2) }
   0xd   : > { %s2387_s25 = smov (!%p269_p3, %s1675_s25), 1  ;;  %450 = vst.msk [vmem:[#allocation2 + $0x60] sm:$0xff] %vm436_vm0, %v2084_v20  ;;  %452 = vst.msk [vmem:[#allocation2 + $0x70] sm:$0xff] %vm436_vm0, %v2084_v20 }
   0xe   : > { %s1757_s9 = sshll.u32 %s2387_s25, 6  ;;  %451 = vst.msk [vmem:[#allocation2 + $0x68] sm:$0x3] %vm438_vm1, %v2084_v20  ;;  %453 = vst.msk [vmem:[#allocation2 + $0x78] sm:$0x3] %vm438_vm1, %v2084_v20 }
   0xf   : > { %s2150_s12 = scalar_lea.vmem %s2378_s0, %s1757_s9  ;;  %1836 = vmatpush3.bf16.msra.mxu0 %v2050_v2  ;;  %454 = vst.msk [vmem:[#allocation2 + $0x80] sm:$0xff] %vm436_vm0, %v2084_v20  ;;  %456 = vst.msk [vmem:[#allocation2 + $0x90] sm:$0xff] %vm436_vm0, %v2084_v20  ;;  %1894 = vmatpush3.bf16.msra.mxu1 %v2059_v24  ;;  %v483_v48 = vld [vmem:[#allocation2 + $0x1] sm:$0xff]  ;;  %v2064_v2 = vld [vmem:[%s2381_s3 + $0x50] sm:$0xff]   ;;  %s2358_s11 = scalar_lea.vmem %s2385_s7, %s1757_s9 }
  0x10   : > { %v2156_v4 = vld [vmem:[%s2150_s12] sm:$0xff]  ;;  %v2159_v5 = vld [vmem:[%s2150_s12 + $0x8] sm:$0xff]  ;;  %1837 = vmatprep.subr.bf16.mxu0 %v2051_v3  ;;  %v2176_v11 = vld [vmem:[%s2150_s12 + $0x10] sm:$0xff]  ;;  %455 = vst.msk [vmem:[#allocation2 + $0x88] sm:$0x3] %vm438_vm1, %v2084_v20  ;;  %1903 = vmatprep.subr.bf16.mxu1 %v2060_v25 }
  0x11   : > { %v288_v6 = vpack.c.bf16 %v2159_v5, %v2156_v4  ;;  %v2179_v12 = vld [vmem:[%s2150_s12 + $0x18] sm:$0xff]  ;;  %v2182_v13 = vld [vmem:[%s2150_s12 + $0x20] sm:$0xff]  ;;  %v2185_v14 = vld [vmem:[%s2150_s12 + $0x28] sm:$0xff]  ;;  %457 = vst.msk [vmem:[#allocation2 + $0x98] sm:$0x3] %vm438_vm1, %v2084_v20 }
  0x12   : > { %v289_v15 = vpack.c.bf16 %v2179_v12, %v2176_v11  ;;  %v290_v16 = vpack.c.bf16 %v2185_v14, %v2182_v13  ;;  %v2192_v17 = vld [vmem:[%s2150_s12 + $0x30] sm:$0xff]  ;;  %v2195_v18 = vld [vmem:[%s2150_s12 + $0x38] sm:$0xff] }
  0x13   : > { %1847 = vmatprep.mubr.bf16.mxu0 %v288_v6  ;;  %1838 = vmatpush3.bf16.msra.mxu0 %v2051_v3  ;;  %v291_v19 = vpack.c.bf16 %v2195_v18, %v2192_v17 }
  0x14   : > { %1839 = vmatprep.subr.bf16.mxu0 %v2052_v7 }
  0x17   : > { %1840 = vmatpush3.bf16.msra.mxu0 %v2052_v7  ;;  %v2065_v7 = vld [vmem:[%s2381_s3 + $0x20] sm:$0xff]  }
  0x18   : > { %1841 = vmatprep.subr.bf16.mxu0 %v2053_v8 }
  0x1b   : > { %1842 = vmatpush3.bf16.msra.mxu0 %v2053_v8 }
  0x1c   : > { %1843 = vmatprep.subr.bf16.mxu0 %v2054_v9 }
  0x1f   : > { %1844 = vmatpush3.bf16.msra.mxu0 %v2054_v9 }
  0x20   : > { %1845 = vmatprep.subr.bf16.mxu0 %v2055_v10 }
  0x23   : > { %1846 = vmatpush3.bf16.msra.mxu0 %v2055_v10  ;;  %v467_v10 = vld [vmem:[#allocation2] sm:$0xff] }
  0x24   : > { %1855 = vmatprep.subr.bf16.mxu0 %v2056_v21 }
  0x26   : > { %1848 = vmatmul.mubr.bf16.vlgmr.msra.gmra.mrb[0].mxu0 %v289_v15 }
  0x27   : > { %1851 = vmatprep.mubr.bf16.mxu0 %v290_v16  ;;  %1856 = vmatpush3.bf16.msra.mxu0 %v2056_v21 }
  0x28   : > { %1857 = vmatprep.subr.bf16.mxu0 %v2058_v23 }
  0x2b   : > { %1858 = vmatpush3.bf16.msra.mxu0 %v2058_v23 }
  0x2c   : > { %1867 = vmatprep.subr.bf16.mxu0 %v2061_v26 }
  0x2e   : > { %1852 = vmatmul.mubr.bf16.gmra.mrb[4].mxu0 %v291_v19 }
  0xf9   : > { %v1849_v28 = vpop.f32.mrb[0].mxu0 }
  0xfa   : > { %v406_v29 = vadd.f32 %v1849_v28, %v1684_v27  ;;  %v397_v30 = vpop.f32.mrb[1].mxu0 }
  0xfb   : > { %v398_v31 = vadd.f32 %v1684_v27, %v397_v30  ;;  %v1850_v32 = vpop.f32.mrb[2].mxu0  ;;  %v2066_v30 = vld [vmem:[%s2381_s3 + $0x58] sm:$0xff]  }
  0xfc   : > { %v430_v33 = vmax.f32 %v406_v29, 0.0  ;;  %v409_v34 = vadd.f32 %v1850_v32, %v1684_v27  ;;  %v400_v35 = vpop.f32.mrb[3].mxu0  ;;  %v2067_v32 = vld [vmem:[%s2381_s3 + $0x28] sm:$0xff]  }
  0xfd   : > { %v428_v36 = vmax.f32 %v398_v31, 0.0  ;;  %v401_v37 = vadd.f32 %v1684_v27, %v400_v35 }
  0xfe   : > { %461 = vst.msk [vmem:[#allocation2 + $0x31] sm:$0xff] %vm436_vm0, %v430_v33  ;;  %v431_v38 = vmax.f32 %v409_v34, 0.0  ;;  %v2068_v33 = vld [vmem:[%s2381_s3 + $0x60] sm:$0xff]  }
  0xff   : > { %459 = vst.msk [vmem:[#allocation2 + $0x11] sm:$0xff] %vm436_vm0, %v428_v36  ;;  %v429_v39 = vmax.f32 %v401_v37, 0.0  ;;  %v677_v34 = vld [vmem:[#allocation2 + $0x2] sm:$0xff] }
 0x100   : > { %462 = vst.msk [vmem:[#allocation2 + $0x41] sm:$0xff] %vm436_vm0, %v431_v38 }
 0x101   : > { %460 = vst.msk [vmem:[#allocation2 + $0x21] sm:$0xff] %vm436_vm0, %v429_v39  ;;  %v1853_v40 = vpop.f32.mrb[4].mxu0 }
 0x102   : > { %v422_v41 = vadd.f32 %v1853_v40, %v1684_v27  ;;  %v413_v42 = vpop.f32.mrb[5].mxu0 }
 0x103   : > { %v414_v43 = vadd.f32 %v1684_v27, %v413_v42  ;;  %v1854_v44 = vpop.f32.mrb[6].mxu0 }
 0x104   : > { %v434_v45 = vmax.f32 %v422_v41, 0.0  ;;  %v425_v46 = vadd.f32 %v1854_v44, %v1684_v27  ;;  %v416_v47 = vpop.f32.mrb[7].mxu0 }
 0x105   : > { %v432_v49 = vmax.f32 %v414_v43, 0.0  ;;  %v417_v50 = vadd.f32 %v1684_v27, %v416_v47  ;;  %v486_v55 = vld [vmem:[#allocation2 + $0x31] sm:$0xff] }
 0x106   : > { %465 = vst.msk [vmem:[#allocation2 + $0x71] sm:$0xff] %vm436_vm0, %v434_v45  ;;  %v435_v51 = vmax.f32 %v425_v46, 0.0  ;;  %v484_v52 = vld [vmem:[#allocation2 + $0x11] sm:$0xff] }
 0x107   : > { %463 = vst.msk [vmem:[#allocation2 + $0x51] sm:$0xff] %vm436_vm0, %v432_v49  ;;  %v433_v53 = vmax.f32 %v417_v50, 0.0  ;;  %v491_v54 = vpack.c.bf16 %v484_v52, %v483_v48  ;;  %v793_v56 = vld [vmem:[#allocation2 + $0x40] sm:$0xff]  ;;  %v790_v58 = vld [vmem:[#allocation2 + $0x10] sm:$0xff]  ;;  %v2069_v49 = vld [vmem:[%s2381_s3 + $0x68] sm:$0xff]  }
 0x108   : > { %466 = vst.msk [vmem:[#allocation2 + $0x81] sm:$0xff] %vm436_vm0, %v435_v51  ;;  %v485_v57 = vld [vmem:[#allocation2 + $0x21] sm:$0xff]  ;;  %v792_v62 = vld [vmem:[#allocation2 + $0x30] sm:$0xff]  ;;  %v475_v24 = vpack.c.bf16 %v790_v58, %v467_v10 }
 0x109   : > { %v791_v59 = vld [vmem:[#allocation2 + $0x20] sm:$0xff]  ;;  %464 = vst.msk [vmem:[#allocation2 + $0x61] sm:$0xff] %vm436_vm0, %v433_v53  ;;  %1859 = vmatprep.mubr.msk.bf16.mxu0 %vm436_vm0, %v491_v54  ;;  %v2249_v60 = vpack.c.bf16 %v486_v55, %v485_v57  ;;  %v799_v0 = vpack.c.bf16 %v793_v56, %v792_v62  ;;  %v678_v35 = vld [vmem:[#allocation2 + $0x12] sm:$0xff] }
 0x10a   : > { %v798_v61 = vpack.c.bf16 %v791_v59, %v790_v58  ;;  %v487_v3 = vld [vmem:[#allocation2 + $0x41] sm:$0xff]  ;;  %v476_v27 = vpack.c.bf16 %v792_v62, %v791_v59  ;;  %v685_v39 = vpack.c.bf16 %v678_v35, %v677_v34  ;;  %v680_v44 = vld [vmem:[#allocation2 + $0x32] sm:$0xff] }
 0x10b   : > { %1860 = vmatmul.mubr.msk.bf16.vlgmr.msra.gmra.mrb[8].mxu0 %vm436_vm0, %v2249_v60  ;;  %v912_v29 = vpack.c.bf16 %v487_v3, %v486_v55  ;;  %v1017_v37 = vld [vmem:[#allocation2 + $0x22] sm:$0xff]  ;;  %v2070_v51 = vld [vmem:[%s2381_s3 + $0x70] sm:$0xff]  }
 0x10c   : > { %1895 = vmatprep.mubr.msk.bf16.mxu1 %vm436_vm0, %v798_v61  ;;  %1868 = vmatpush3.bf16.msra.mxu0 %v2061_v26  ;;  %v911_v26 = vpack.c.bf16 %v485_v57, %v484_v52  ;;  %v1024_v41 = vpack.c.bf16 %v1017_v37, %v678_v35  ;;  %v681_v42 = vld [vmem:[#allocation2 + $0x42] sm:$0xff]  ;;  %v686_v46 = vpack.c.bf16 %v680_v44, %v1017_v37  ;;  %v1137_v58 = vld [vmem:[#allocation2 + $0x90] sm:$0xff] }
 0x10d   : > { %1896 = vmatmul.mubr.msk.bf16.vlgmr.msra.gmra.mrb[0].mxu1 %vm436_vm0, %v799_v0  ;;  %1869 = vmatprep.subr.bf16.mxu0 %v2063_v63  ;;  %v490_v9 = vld [vmem:[#allocation2 + $0x71] sm:$0xff]  ;;  %v1025_v48 = vpack.c.bf16 %v681_v42, %v680_v44  ;;  %v2072_v57 = vld [vmem:[%s2381_s3 + $0x80] sm:$0xff]   ;;  %v2073_v61 = vld [vmem:[%s2381_s3 + $0x88] sm:$0xff]  }
 0x10e   : > { %1904 = vmatpush3.bf16.msra.mxu1 %v2060_v25  ;;  %v488_v6 = vld [vmem:[#allocation2 + $0x51] sm:$0xff] }
 0x10f   : > { %1905 = vmatprep.subr.bf16.mxu1 %v2062_v1  ;;  %v2267_v8 = vpack.c.bf16 %v488_v6, %v487_v3  ;;  %v2269_v15 = vld [vmem:[#allocation2 + $0x80] sm:$0xff]  ;;  %v794_v19 = vld [vmem:[#allocation2 + $0x50] sm:$0xff] }
 0x110   : > { %v489_v16 = vld [vmem:[#allocation2 + $0x61] sm:$0xff]  ;;  %1870 = vmatpush3.bf16.msra.mxu0 %v2063_v63  ;;  %v796_v23 = vld [vmem:[#allocation2 + $0x70] sm:$0xff]  ;;  %v477_v28 = vpack.c.bf16 %v794_v19, %v793_v56  ;;  %v2071_v56 = vld [vmem:[%s2381_s3 + $0x78] sm:$0xff]   ;;  %v1141_v59 = vpack.c.bf16 %v1137_v58, %v2269_v15 }
 0x111   : > { %v795_v20 = vld [vmem:[#allocation2 + $0x60] sm:$0xff]  ;;  %1863 = vmatprep.mubr.msk.bf16.mxu0 %vm436_vm0, %v2267_v8  ;;  %v2273_v21 = vpack.c.bf16 %v490_v9, %v489_v16  ;;  %v801_v25 = vpack.c.bf16 %v2269_v15, %v796_v23  ;;  %1879 = vmatprep.subr.bf16.mxu0 %v2065_v7  ;;  %v913_v31 = vpack.c.bf16 %v489_v16, %v488_v6  ;;  %v682_v43 = vld [vmem:[#allocation2 + $0x52] sm:$0xff] }
 0x112   : > { %v800_v22 = vpack.c.bf16 %v795_v20, %v794_v19  ;;  %1906 = vmatpush3.bf16.msra.mxu1 %v2062_v1  ;;  %v910_v36 = vld [vmem:[#allocation2 + $0x81] sm:$0xff]  ;;  %v478_v38 = vpack.c.bf16 %v796_v23, %v795_v20  ;;  %v687_v47 = vpack.c.bf16 %v682_v43, %v681_v42  ;;  %v684_v53 = vld [vmem:[#allocation2 + $0x72] sm:$0xff]  ;;  %v1747_v20 = vld [vmem:[%s2382_s4] ss:$0 sm:$0xff] }
 0x113   : > { %1915 = vmatprep.subr.bf16.mxu1 %v2064_v2  ;;  %1864 = vmatmul.mubr.msk.bf16.gmra.mrb[12].mxu0 %vm436_vm0, %v2273_v21  ;;  %v914_v40 = vpack.c.bf16 %v910_v36, %v490_v9  ;;  %v1021_v45 = vld [vmem:[#allocation2 + $0x62] sm:$0xff]  ;;  %v1250_v62 = vld [vmem:[#allocation2 + $0x91] sm:$0xff] }
 0x114   : > { %1899 = vmatprep.mubr.msk.bf16.mxu1 %vm436_vm0, %v800_v22  ;;  %1871 = vmatprep.mubr.msk.bf16.mxu0 %vm436_vm0, %v475_v24  ;;  %v1026_v50 = vpack.c.bf16 %v1021_v45, %v682_v43  ;;  %v1023_v52 = vld [vmem:[#allocation2 + $0x82] sm:$0xff]  ;;  %v688_v54 = vpack.c.bf16 %v684_v53, %v1021_v45  ;;  %v1254_v63 = vpack.c.bf16 %v1250_v62, %v910_v36 }
 0x115   : > { %1900 = vmatmul.mubr.msk.bf16.gmra.mrb[4].mxu1 %vm436_vm0, %v801_v25  ;;  %v1027_v55 = vpack.c.bf16 %v1023_v52, %v684_v53  ;;  %v2074_v1 = vld [vmem:[%s2383_s5] sm:$0xff]  }
 0x116   : > { %1907 = vmatprep.mubr.msk.bf16.mxu1 %vm436_vm0, %v911_v26 }
 0x11b   : > { %1872 = vmatmul.mubr.msk.bf16.vlgmr.msra.gmra.mrb[8].mxu0 %vm436_vm0, %v476_v27 }
 0x11c   : > { %1875 = vmatprep.mubr.msk.bf16.mxu0 %vm436_vm0, %v477_v28  ;;  %1880 = vmatpush3.bf16.msra.mxu0 %v2065_v7 }
 0x11d   : > { %1908 = vmatmul.mubr.msk.bf16.vlgmr.msra.gmra.mrb[0].mxu1 %vm436_vm0, %v912_v29  ;;  %1881 = vmatprep.subr.bf16.mxu0 %v2067_v32 }
 0x11e   : > { %1916 = vmatpush3.bf16.msra.mxu1 %v2064_v2  ;;  %1911 = vmatprep.mubr.msk.bf16.mxu1 %vm436_vm0, %v913_v31  ;;  %v2075_v2 = vld [vmem:[%s2383_s5 + $0x8] sm:$0xff]  }
 0x11f   : > { %1917 = vmatprep.subr.bf16.mxu1 %v2066_v30 }
 0x120   : > { %1882 = vmatpush3.bf16.msra.mxu0 %v2067_v32 }
 0x121   : > { %1963 = vmatprep.subr.bf16.mxu0 %v2074_v1 }
 0x122   : > { %1918 = vmatpush3.bf16.msra.mxu1 %v2066_v30 }
 0x123   : > { %1927 = vmatprep.subr.bf16.mxu1 %v2068_v33  ;;  %1876 = vmatmul.mubr.msk.bf16.gmra.mrb[12].mxu0 %vm436_vm0, %v478_v38 }
 0x124   : > { %1883 = vmatprep.mubr.msk.bf16.mxu0 %vm436_vm0, %v685_v39 }
 0x125   : > { %1912 = vmatmul.mubr.msk.bf16.gmra.mrb[4].mxu1 %vm436_vm0, %v914_v40 }
 0x126   : > { %1919 = vmatprep.mubr.msk.bf16.mxu1 %vm436_vm0, %v1024_v41 }
 0x12b   : > { %1884 = vmatmul.mubr.msk.bf16.vlgmr.msra.gmra.mrb[8].mxu0 %vm436_vm0, %v686_v46 }
 0x12c   : > { %1887 = vmatprep.mubr.msk.bf16.mxu0 %vm436_vm0, %v687_v47  ;;  %1964 = vmatpush3.bf16.msra.mxu0 %v2074_v1 }
 0x12d   : > { %1920 = vmatmul.mubr.msk.bf16.vlgmr.msra.gmra.mrb[0].mxu1 %vm436_vm0, %v1025_v48  ;;  %1965 = vmatprep.subr.bf16.mxu0 %v2075_v2 }
 0x12e   : > { %1928 = vmatpush3.bf16.msra.mxu1 %v2068_v33  ;;  %1923 = vmatprep.mubr.msk.bf16.mxu1 %vm436_vm0, %v1026_v50 }
 0x12f   : > { %1929 = vmatprep.subr.bf16.mxu1 %v2069_v49 }
 0x130   : > { %1966 = vmatpush3.bf16.msra.mxu0 %v2075_v2 }
 0x132   : > { %1930 = vmatpush3.bf16.msra.mxu1 %v2069_v49 }
 0x133   : > { %1939 = vmatprep.subr.bf16.mxu1 %v2070_v51  ;;  %1888 = vmatmul.mubr.msk.bf16.gmra.mrb[12].mxu0 %vm436_vm0, %v688_v54 }
 0x135   : > { %1924 = vmatmul.mubr.msk.bf16.gmra.mrb[4].mxu1 %vm436_vm0, %v1027_v55 }
 0x136   : > { %1931 = vmatprep.mubr.msk.bf16.mxu1 %vm436_vm0, %v476_v27 }
 0x13d   : > { %1932 = vmatmul.mubr.msk.bf16.vlgmr.msra.gmra.mrb[0].mxu1 %vm436_vm0, %v477_v28 }
 0x13e   : > { %1940 = vmatpush3.bf16.msra.mxu1 %v2070_v51  ;;  %1935 = vmatprep.mubr.msk.bf16.mxu1 %vm436_vm0, %v478_v38 }
 0x13f   : > { %1941 = vmatprep.subr.bf16.mxu1 %v2071_v56 }
 0x142   : > { %1942 = vmatpush3.bf16.msra.mxu1 %v2071_v56  ;;  %v1748_v56 = vld [vmem:[%s2384_s6] ss:$0 sm:$0xff] }
 0x143   : > { %1951 = vmatprep.subr.bf16.mxu1 %v2072_v57 }
 0x145   : > { %1936 = vmatmul.mubr.msk.bf16.gmra.mrb[4].mxu1 %vm436_vm0, %v1141_v59 }
 0x146   : > { %1943 = vmatprep.mubr.msk.bf16.mxu1 %vm436_vm0, %v2249_v60  ;;  %v1363_v60 = vld [vmem:[#allocation2 + $0x92] sm:$0xff] }
 0x147   : > { %v1367_v0 = vpack.c.bf16 %v1363_v60, %v1023_v52 }
 0x14d   : > { %1944 = vmatmul.mubr.msk.bf16.vlgmr.msra.gmra.mrb[0].mxu1 %vm436_vm0, %v2267_v8 }
 0x14e   : > { %1952 = vmatpush3.bf16.msra.mxu1 %v2072_v57  ;;  %1947 = vmatprep.mubr.msk.bf16.mxu1 %vm436_vm0, %v2273_v21 }
 0x14f   : > { %1953 = vmatprep.subr.bf16.mxu1 %v2073_v61 }
 0x152   : > { %1954 = vmatpush3.bf16.msra.mxu1 %v2073_v61 }
 0x155   : > { %1948 = vmatmul.mubr.msk.bf16.gmra.mrb[4].mxu1 %vm436_vm0, %v1254_v63 }
 0x156   : > { %1955 = vmatprep.mubr.msk.bf16.mxu1 %vm436_vm0, %v686_v46 }
 0x15d   : > { %1956 = vmatmul.mubr.msk.bf16.vlgmr.msra.gmra.mrb[0].mxu1 %vm436_vm0, %v687_v47 }
 0x15e   : > { %1959 = vmatprep.mubr.msk.bf16.mxu1 %vm436_vm0, %v688_v54 }
 0x165   : > { %1960 = vmatmul.mubr.msk.bf16.gmra.mrb[4].mxu1 %vm436_vm0, %v1367_v0 }
 0x1fe   : > { %v1885_v3 = vpop.f32.mrb[8].mxu0 }
 0x1ff   : > { %v751_v6 = vpop.f32.mrb[9].mxu0 }
 0x200   : > { %v1886_v7 = vpop.f32.mrb[10].mxu0 }
 0x201   : > { %v754_v8 = vpop.f32.mrb[11].mxu0 }
 0x206   : > { %v1889_v9 = vpop.f32.mrb[12].mxu0 }
 0x207   : > { %v767_v10 = vpop.f32.mrb[13].mxu0 }
 0x208   : > { %v1890_v15 = vpop.f32.mrb[14].mxu0 }
 0x209   : > { %v770_v16 = vpop.f32.mrb[15].mxu0 }
 0x230   : > { %v1957_v19 = vpop.f32.mrb[0].mxu1 }
 0x231   : > { %v1975_v21 = vadd.f32 %v1957_v19, %v1885_v3  ;;  %v1430_v22 = vpop.f32.mrb[1].mxu1 }
 0x232   : > { %v1976_v23 = vadd.f32 %v1430_v22, %v751_v6  ;;  %v1958_v24 = vpop.f32.mrb[2].mxu1 }
 0x233   : > { %v1478_v25 = vadd.f32 %v1975_v21, %v1747_v20  ;;  %v1977_v26 = vadd.f32 %v1958_v24, %v1886_v7  ;;  %v1433_v27 = vpop.f32.mrb[3].mxu1 }
 0x234   : > { %v1476_v28 = vadd.f32 %v1976_v23, %v1747_v20  ;;  %v1978_v29 = vadd.f32 %v1433_v27, %v754_v8 }
 0x235   : > { %v1479_v30 = vadd.f32 %v1977_v26, %v1747_v20  ;;  %v1486_v32 = vmax.f32 %v1478_v25, 0.0 }
 0x236   : > { %v1477_v31 = vadd.f32 %v1978_v29, %v1747_v20  ;;  %v1484_v34 = vmax.f32 %v1476_v28, 0.0 }
 0x237   : > { %v1487_v33 = vmax.f32 %v1479_v30, 0.0 }
 0x238   : > { %v1485_v35 = vmax.f32 %v1477_v31, 0.0  ;;  %v1961_v36 = vpop.f32.mrb[4].mxu1 }
 0x239   : > { %v1493_v37 = vpack.c.bf16 %v1487_v33, %v1486_v32  ;;  %v1979_v38 = vadd.f32 %v1961_v36, %v1889_v9  ;;  %v1446_v39 = vpop.f32.mrb[5].mxu1 }
 0x23a   : > { %v1492_v40 = vpack.c.bf16 %v1485_v35, %v1484_v34  ;;  %v1980_v41 = vadd.f32 %v1446_v39, %v767_v10  ;;  %v1962_v42 = vpop.f32.mrb[6].mxu1 }
 0x23b   : > { %v1482_v43 = vadd.f32 %v1979_v38, %v1747_v20  ;;  %v1981_v44 = vadd.f32 %v1962_v42, %v1890_v15  ;;  %v1449_v45 = vpop.f32.mrb[7].mxu1 }
 0x23c   : > { %v1480_v46 = vadd.f32 %v1980_v41, %v1747_v20  ;;  %v1982_v47 = vadd.f32 %v1449_v45, %v770_v16  ;;  %1967 = vmatprep.mubr.msk.bf16.mxu0 %vm436_vm0, %v1492_v40 }
 0x23d   : > { %v1483_v48 = vadd.f32 %v1981_v44, %v1747_v20  ;;  %1968 = vmatmul.mubr.msk.bf16.vlgmr.msra.gmra.mrb[16].mxu0 %vm436_vm0, %v1493_v37  ;;  %v1490_v50 = vmax.f32 %v1482_v43, 0.0 }
 0x23e   : > { %v1481_v49 = vadd.f32 %v1982_v47, %v1747_v20  ;;  %v1488_v52 = vmax.f32 %v1480_v46, 0.0 }
 0x23f   : > { %v1491_v51 = vmax.f32 %v1483_v48, 0.0 }
 0x240   : > { %v1489_v53 = vmax.f32 %v1481_v49, 0.0 }
 0x241   : > { %v1495_v54 = vpack.c.bf16 %v1491_v51, %v1490_v50 }
 0x242   : > { %v1494_v55 = vpack.c.bf16 %v1489_v53, %v1488_v52 }
 0x244   : > { %1971 = vmatprep.mubr.msk.bf16.mxu0 %vm436_vm0, %v1494_v55 }
 0x245   : > { %1972 = vmatmul.mubr.msk.bf16.gmra.mrb[20].mxu0 %vm436_vm0, %v1495_v54 }
 0x310   : > { %v1969_v57 = vpop.f32.mrb[16].mxu0 }
 0x311   : > { %v1574_v58 = vadd.f32 %v1969_v57, %v1748_v56  ;;  %v1565_v59 = vpop.f32.mrb[17].mxu0 }
 0x312   : > { %v1566_v61 = vadd.f32 %v1748_v56, %v1565_v59  ;;  %v1970_v62 = vpop.f32.mrb[18].mxu0 }
 0x313   : > { %v1598_v63 = vadd.f32 %v1574_v58, %v2176_v11  ;;  %v1577_v60 = vadd.f32 %v1970_v62, %v1748_v56  ;;  %v1568_v0 = vpop.f32.mrb[19].mxu0 }
 0x314   : > { %v1596_v1 = vadd.f32 %v1566_v61, %v2156_v4  ;;  %v1569_v2 = vadd.f32 %v1748_v56, %v1568_v0 }
 0x315   : > { %v1606_v3 = vmax.f32 %v1598_v63, 0.0  ;;  %v1599_v6 = vadd.f32 %v1577_v60, %v2179_v12 }
 0x316   : > { %v1604_v7 = vmax.f32 %v1596_v1, 0.0  ;;  %v1597_v11 = vadd.f32 %v1569_v2, %v2159_v5 }
 0x317   : > { %1614 = vst [vmem:[%s2358_s11 + $0x10] sm:$0xff] %v1606_v3  ;;  %v1607_v8 = vmax.f32 %v1599_v6, 0.0 }
 0x318   : > { %1612 = vst [vmem:[%s2358_s11] sm:$0xff] %v1604_v7  ;;  %v1605_v9 = vmax.f32 %v1597_v11, 0.0  ;;  %v1973_v10 = vpop.f32.mrb[20].mxu0 }
 0x319   : > { %1615 = vst [vmem:[%s2358_s11 + $0x18] sm:$0xff] %v1607_v8  ;;  %v1590_v15 = vadd.f32 %v1973_v10, %v1748_v56  ;;  %v1581_v16 = vpop.f32.mrb[21].mxu0 }
 0x31a   : > { %1613 = vst [vmem:[%s2358_s11 + $0x8] sm:$0xff] %v1605_v9  ;;  %v1582_v4 = vadd.f32 %v1748_v56, %v1581_v16  ;;  %v1974_v19 = vpop.f32.mrb[22].mxu0 }
 0x31b   : > { %v1602_v12 = vadd.f32 %v1590_v15, %v2192_v17  ;;  %v1593_v20 = vadd.f32 %v1974_v19, %v1748_v56  ;;  %v1584_v21 = vpop.f32.mrb[23].mxu0 }
 0x31c   : > { %v1600_v5 = vadd.f32 %v1582_v4, %v2182_v13  ;;  %v1585_v22 = vadd.f32 %v1748_v56, %v1584_v21 }
 0x31d   : > { %v1610_v23 = vmax.f32 %v1602_v12, 0.0  ;;  %v1603_v24 = vadd.f32 %v1593_v20, %v2195_v18 }
 0x31e   : > { %v1608_v25 = vmax.f32 %v1600_v5, 0.0  ;;  %v1601_v26 = vadd.f32 %v1585_v22, %v2185_v14 }
 0x31f   : > { %1618 = vst [vmem:[%s2358_s11 + $0x30] sm:$0xff] %v1610_v23  ;;  %v1611_v27 = vmax.f32 %v1603_v24, 0.0 }
 0x320   : > { %1616 = vst [vmem:[%s2358_s11 + $0x20] sm:$0xff] %v1608_v25  ;;  %v1609_v28 = vmax.f32 %v1601_v26, 0.0 }
 0x321   : > { %1619 = vst [vmem:[%s2358_s11 + $0x38] sm:$0xff] %v1611_v27 }
 0x322   : > { %1617 = vst [vmem:[%s2358_s11 + $0x28] sm:$0xff] %v1609_v28 }
 0x323 PF: > { %s17_s24 = sadd.s32 1, %s2082_s24  }
 0x324   : > { %p14_p4 = scmp.ge.s32.totalorder %s17_s24, 4  }
 0x326   :  { %16 = sbr.rel (!%p14_p4) target bundleno = 1 (0x1), region = 80 }

// kernel: shared_module_bh_forward.9
= control target key start
LH: loop header
LB: loop body
LE: loop exit
PB: predicated region body
PF: predicated region fallthrough
CT: control target
= control target key end

     0   :  { %s2846_s30 = smov 0   ;;  %s2848_s10 = smov 0   ;;  %s3491_s0 = inlined_call_operand.vmem [shape: f32[4,2,64,64], index: 0, kind: input, shape index: {}]   ;;  %s3492_s1 = inlined_call_operand.vmem [shape: bf16[64,32], index: 1, kind: input, shape index: {}]   ;;  %s3493_s2 = inlined_call_operand.vmem [shape: f32[1,32], index: 2, kind: input, shape index: {}]   ;;  %s3494_s3 = inlined_call_operand.vmem [shape: bf16[288,32], index: 3, kind: input, shape index: {}]   ;;  %s3495_s4 = inlined_call_operand.vmem [shape: f32[1,32], index: 4, kind: input, shape index: {}]   ;;  %s3496_s5 = inlined_call_operand.vmem [shape: bf16[32,128], index: 5, kind: input, shape index: {}]   ;;  %s3497_s6 = inlined_call_operand.vmem [shape: f32[1,128], index: 6, kind: input, shape index: {}]   ;;  %s3498_s7 = inlined_call_operand.vmem [shape: bf16[64,128], index: 7, kind: input, shape index: {}]   ;;  %s3499_s8 = inlined_call_operand.vmem [shape: f32[1,128], index: 8, kind: input, shape index: {}]   ;;  %s3500_s9 = inlined_call_operand.vmem [shape: f32[2,64,128], index: 9, kind: output, shape index: {}]  }
   0x1   :  { %s2850_s11 = smov 0  }
   0x2 LB: > { %s2259_s12 = sadd.s32 4294967295, %s2793_s11   ;;  %s2863_s13 = sadd.s32 1, %s2793_s11   ;;  %s2793_s11 = sphi %s2850_s11, %s3503_s11   ;;  %s2789_s10 = sphi %s2848_s10, %s3502_s10   ;;  %s2785_s30 = sphi %s2846_s30, %s3501_s30  }
   0x3   : > { %s23_s14 = ssub.s32 %s2793_s11, %s2863_s13  ;;  %s26_s15 = sadd.s32 1, %s2789_s10 }
   0x4   : > { %p24_p0 = scmp.eq.s32.totalorder %s23_s14, 0  ;;  %p33_p1 = scmp.ne.s32.totalorder %s2789_s10, %s2785_s30 }
   0x5   : > { %p34_p2 = scmp.eq.s32.totalorder %s2793_s11, 0  ;;  %p2262_p4 = scmp.ge.s32.totalorder %s2793_s11, 2 }
   0x6   : > { %s2872_s16 = scalar_select %p24_p0, %s2789_s10, %s26_s15  }
   0x7   : > { %p35_p3 = por %p34_p2, %p33_p1  ;;  %277 = sbr.rel (%p2262_p4) target bundleno = 34 (0x22), region = 48 }
   0xe   : > { %280 = sbr.rel (!%p35_p3) target bundleno = 34 (0x22), region = 52  ;;  %s282_s17 = sand.u32 (%p35_p3), 1, %s2789_s10  }
   0xf   : > { %s2364_s18 = sshll.u32 (%p35_p3), %s2793_s11, 6  ;;  %s2263_s19 = sshll.u32 (%p35_p3), %s282_s17, 8 }
  0x10   : > { %s2880_s22 = scalar_lea.vmem (%p35_p3), %s3491_s0, %s2364_s18  ;;  %s2885_s23 = scalar_lea.vmem (%p35_p3), [#allocation3], %s2263_s19 }
  0x11   : > { %v377_v0 = vld [vmem:[%s2880_s22] sm:$0xff] (%p35_p3)  ;;  %v379_v1 = vld [vmem:[%s2880_s22 + $0x8] sm:$0xff] (%p35_p3)  ;;  %v381_v2 = vld [vmem:[%s2880_s22 + $0x10] sm:$0xff] (%p35_p3) }
  0x12   : > { %378 = vst [vmem:[%s2885_s23] sm:$0xff] (%p35_p3), %v377_v0  ;;  %380 = vst [vmem:[%s2885_s23 + $0x8] sm:$0xff] (%p35_p3), %v379_v1  ;;  %v383_v3 = vld [vmem:[%s2880_s22 + $0x18] sm:$0xff] (%p35_p3)  ;;  %v385_v4 = vld [vmem:[%s2880_s22 + $0x20] sm:$0xff] (%p35_p3) }
  0x13   : > { %382 = vst [vmem:[%s2885_s23 + $0x10] sm:$0xff] (%p35_p3), %v381_v2  ;;  %v387_v5 = vld [vmem:[%s2880_s22 + $0x28] sm:$0xff] (%p35_p3)  ;;  %384 = vst [vmem:[%s2885_s23 + $0x18] sm:$0xff] (%p35_p3), %v383_v3  ;;  %v389_v6 = vld [vmem:[%s2880_s22 + $0x30] sm:$0xff] (%p35_p3) }
  0x14   : > { %386 = vst [vmem:[%s2885_s23 + $0x20] sm:$0xff] (%p35_p3), %v385_v4  ;;  %388 = vst [vmem:[%s2885_s23 + $0x28] sm:$0xff] (%p35_p3), %v387_v5  ;;  %v391_v7 = vld [vmem:[%s2880_s22 + $0x38] sm:$0xff] (%p35_p3)  ;;  %v393_v8 = vld [vmem:[%s2880_s22 + $0x80] sm:$0xff] (%p35_p3) }
  0x15   : > { %390 = vst [vmem:[%s2885_s23 + $0x30] sm:$0xff] %v389_v6  ;;  %392 = vst [vmem:[%s2885_s23 + $0x38] sm:$0xff] %v391_v7  ;;  %v395_v9 = vld [vmem:[%s2880_s22 + $0x88] sm:$0xff]  ;;  %v397_v10 = vld [vmem:[%s2880_s22 + $0x90] sm:$0xff] }
  0x16   : > { %394 = vst [vmem:[%s2885_s23 + $0x40] sm:$0xff] %v393_v8  ;;  %v399_v11 = vld [vmem:[%s2880_s22 + $0x98] sm:$0xff]  ;;  %396 = vst [vmem:[%s2885_s23 + $0x48] sm:$0xff] %v395_v9  ;;  %v401_v12 = vld [vmem:[%s2880_s22 + $0xa0] sm:$0xff] }
  0x17   : > { %398 = vst [vmem:[%s2885_s23 + $0x50] sm:$0xff] %v397_v10  ;;  %400 = vst [vmem:[%s2885_s23 + $0x58] sm:$0xff] %v399_v11  ;;  %v403_v13 = vld [vmem:[%s2880_s22 + $0xa8] sm:$0xff]  ;;  %v405_v14 = vld [vmem:[%s2880_s22 + $0xb0] sm:$0xff] }
  0x18   : > { %402 = vst [vmem:[%s2885_s23 + $0x60] sm:$0xff] %v401_v12  ;;  %404 = vst [vmem:[%s2885_s23 + $0x68] sm:$0xff] %v403_v13  ;;  %v407_v15 = vld [vmem:[%s2880_s22 + $0xb8] sm:$0xff]  ;;  %v409_v16 = vld [vmem:[%s2880_s22 + $0x100] sm:$0xff] }
  0x19   : > { %406 = vst [vmem:[%s2885_s23 + $0x70] sm:$0xff] %v405_v14  ;;  %v411_v17 = vld [vmem:[%s2880_s22 + $0x108] sm:$0xff]  ;;  %408 = vst [vmem:[%s2885_s23 + $0x78] sm:$0xff] %v407_v15  ;;  %v413_v18 = vld [vmem:[%s2880_s22 + $0x110] sm:$0xff] }
  0x1a   : > { %410 = vst [vmem:[%s2885_s23 + $0x80] sm:$0xff] %v409_v16  ;;  %412 = vst [vmem:[%s2885_s23 + $0x88] sm:$0xff] %v411_v17  ;;  %v415_v19 = vld [vmem:[%s2880_s22 + $0x118] sm:$0xff]  ;;  %v417_v20 = vld [vmem:[%s2880_s22 + $0x120] sm:$0xff] }
  0x1b   : > { %414 = vst [vmem:[%s2885_s23 + $0x90] sm:$0xff] %v413_v18  ;;  %416 = vst [vmem:[%s2885_s23 + $0x98] sm:$0xff] %v415_v19  ;;  %v419_v21 = vld [vmem:[%s2880_s22 + $0x128] sm:$0xff]  ;;  %v421_v22 = vld [vmem:[%s2880_s22 + $0x130] sm:$0xff] }
  0x1c   : > { %418 = vst [vmem:[%s2885_s23 + $0xa0] sm:$0xff] %v417_v20  ;;  %v423_v23 = vld [vmem:[%s2880_s22 + $0x138] sm:$0xff]  ;;  %420 = vst [vmem:[%s2885_s23 + $0xa8] sm:$0xff] %v419_v21  ;;  %v425_v24 = vld [vmem:[%s2880_s22 + $0x180] sm:$0xff] }
  0x1d   : > { %422 = vst [vmem:[%s2885_s23 + $0xb0] sm:$0xff] %v421_v22  ;;  %424 = vst [vmem:[%s2885_s23 + $0xb8] sm:$0xff] %v423_v23  ;;  %v427_v25 = vld [vmem:[%s2880_s22 + $0x188] sm:$0xff]  ;;  %v429_v26 = vld [vmem:[%s2880_s22 + $0x190] sm:$0xff] }
  0x1e   : > { %426 = vst [vmem:[%s2885_s23 + $0xc0] sm:$0xff] %v425_v24  ;;  %428 = vst [vmem:[%s2885_s23 + $0xc8] sm:$0xff] %v427_v25  ;;  %v431_v27 = vld [vmem:[%s2880_s22 + $0x198] sm:$0xff]  ;;  %v433_v28 = vld [vmem:[%s2880_s22 + $0x1a0] sm:$0xff] }
  0x1f   : > { %430 = vst [vmem:[%s2885_s23 + $0xd0] sm:$0xff] %v429_v26  ;;  %v435_v29 = vld [vmem:[%s2880_s22 + $0x1a8] sm:$0xff]  ;;  %432 = vst [vmem:[%s2885_s23 + $0xd8] sm:$0xff] %v431_v27  ;;  %v437_v30 = vld [vmem:[%s2880_s22 + $0x1b0] sm:$0xff] }
  0x20   : > { %434 = vst [vmem:[%s2885_s23 + $0xe0] sm:$0xff] %v433_v28  ;;  %436 = vst [vmem:[%s2885_s23 + $0xe8] sm:$0xff] %v435_v29  ;;  %v439_v31 = vld [vmem:[%s2880_s22 + $0x1b8] sm:$0xff] }
  0x21   : > { %438 = vst [vmem:[%s2885_s23 + $0xf0] sm:$0xff] %v437_v30  ;;  %440 = vst [vmem:[%s2885_s23 + $0xf8] sm:$0xff] %v439_v31 }
  0x22 PF: > { %p2266_p5 = scmp.ge.s32.totalorder %s2793_s11, 1  ;;  %p445_p6 = scmp.lt.s32.totalorder %s2793_s11, 3 }
  0x24   : > { %p446_p7 = pnand %p2266_p5, %p445_p6 }
  0x25   : > { %v2743_v32 = vld [vmem:[%s3492_s1] sm:$0xff] (!%p446_p7)   ;;  %s452_s26 = sand.u32 (!%p446_p7), 1, %s2785_s30   ;;  %v2744_v33 = vld [vmem:[%s3492_s1 + $0x8] sm:$0xff] (!%p446_p7)   ;;  %v2745_v34 = vld [vmem:[%s3492_s1 + $0x10] sm:$0xff] (!%p446_p7)   ;;  %vm580_vm0 = vcmask (!%p446_p7), 523264   ;;  %vm822_vm1 = vcmask (!%p446_p7), 261120  }
  0x26   : > { %449 = sbr.rel (%p446_p7) target bundleno = 896 (0x380), region = 90  ;;  %s2267_s29 = sshll.u32 (!%p446_p7), %s452_s26, 8  ;;  %2454 = vmatprep.subr.bf16.mxu0 (!%p446_p7), %v2743_v32  ;;  %v2746_v38 = vld [vmem:[%s3492_s1 + $0x18] sm:$0xff] (!%p446_p7)   ;;  %vm824_vm2 = vcmask (!%p446_p7), 254976   ;;  %v2795_v20 = vmov (!%p446_p7), 0.0   ;;  %v2747_v21 = vld [vmem:[%s3494_s3 + $0x10] sm:$0xff] (!%p446_p7)  }
  0x27   : > { %2455 = vmatpush3.bf16.msra.mxu0 (!%p446_p7), %v2743_v32  ;;  %s2960_s17 = scalar_lea.vmem (!%p446_p7), [#allocation3], %s2267_s29  ;;  %830 = vst.msk [vmem:[#allocation2 + $0x30] sm:$0xff] (!%p446_p7), %vm822_vm1, %v2795_v20  ;;  %826 = vst.msk [vmem:[#allocation2 + $0x10] sm:$0xff] (!%p446_p7), %vm822_vm1, %v2795_v20  ;;  %v2748_v22 = vld [vmem:[%s3494_s3 + $0x18] sm:$0xff] (!%p446_p7)   ;;  %v2749_v23 = vld [vmem:[%s3494_s3] sm:$0xff] (!%p446_p7)   ;;  %p487_p8 = scmp.lt.s32.totalorder (!%p446_p7), %s2259_s12, 1 }
  0x28   : > { %2456 = vmatprep.subr.bf16.mxu0 (!%p446_p7), %v2744_v33  ;;  %v493_v35 = vld [vmem:[%s2960_s17] sm:$0xff] (!%p446_p7)  ;;  %v494_v36 = vld [vmem:[%s2960_s17 + $0x8] sm:$0xff] (!%p446_p7)  ;;  %v495_v39 = vld [vmem:[%s2960_s17 + $0x10] sm:$0xff] (!%p446_p7)  ;;  %831 = vst.msk [vmem:[#allocation2 + $0x38] sm:$0x3] (!%p446_p7), %vm824_vm2, %v2795_v20  ;;  %2506 = vmatprep.subr.bf16.mxu1 (!%p446_p7), %v2749_v23 }
  0x29   : > { %v2964_v37 = vpack.c.bf16 (!%p446_p7), %v494_v36, %v493_v35  ;;  %v496_v40 = vld [vmem:[%s2960_s17 + $0x18] sm:$0xff] (!%p446_p7)  ;;  %v497_v41 = vld [vmem:[%s2960_s17 + $0x20] sm:$0xff] (!%p446_p7)  ;;  %v498_v42 = vld [vmem:[%s2960_s17 + $0x28] sm:$0xff] (!%p446_p7)  ;;  %827 = vst.msk [vmem:[#allocation2 + $0x18] sm:$0x3] (!%p446_p7), %vm824_vm2, %v2795_v20  ;;  %2507 = vmatpush3.bf16.msra.mxu1 (!%p446_p7), %v2749_v23 }
  0x2a   : > { %v2975_v43 = vpack.c.bf16 (!%p446_p7), %v496_v40, %v495_v39  ;;  %v2977_v44 = vpack.c.bf16 (!%p446_p7), %v498_v42, %v497_v41  ;;  %v499_v45 = vld [vmem:[%s2960_s17 + $0x30] sm:$0xff] (!%p446_p7)  ;;  %v500_v46 = vld [vmem:[%s2960_s17 + $0x38] sm:$0xff] (!%p446_p7)  ;;  %v501_v47 = vld [vmem:[%s2960_s17 + $0x40] sm:$0xff] (!%p446_p7)  ;;  %828 = vst.msk [vmem:[#allocation2 + $0x20] sm:$0xff] (!%p446_p7), %vm822_vm1, %v2795_v20 }
  0x2b   : > { %2457 = vmatpush3.bf16.msra.mxu0 (!%p446_p7), %v2744_v33  ;;  %2462 = vmatprep.mubr.msk.bf16.mxu0 (!%p446_p7), %vm580_vm0, %v2964_v37  ;;  %v502_v48 = vld [vmem:[%s2960_s17 + $0x48] sm:$0xff] (!%p446_p7)  ;;  %v2987_v49 = vpack.c.bf16 (!%p446_p7), %v500_v46, %v499_v45  ;;  %v503_v51 = vld [vmem:[%s2960_s17 + $0x50] sm:$0xff] (!%p446_p7)  ;;  %v504_v52 = vld [vmem:[%s2960_s17 + $0x58] sm:$0xff] (!%p446_p7)  ;;  %829 = vst.msk [vmem:[#allocation2 + $0x28] sm:$0x3] (!%p446_p7), %vm824_vm2, %v2795_v20 }
  0x2c   : > { %2458 = vmatprep.subr.bf16.mxu0 (!%p446_p7), %v2745_v34  ;;  %v529_v50 = vpack.c.bf16 (!%p446_p7), %v502_v48, %v501_v47  ;;  %v505_v53 = vld [vmem:[%s2960_s17 + $0x60] sm:$0xff] (!%p446_p7)  ;;  %v506_v54 = vld [vmem:[%s2960_s17 + $0x68] sm:$0xff] (!%p446_p7)  ;;  %v530_v55 = vpack.c.bf16 (!%p446_p7), %v504_v52, %v503_v51  ;;  %v507_v57 = vld [vmem:[%s2960_s17 + $0x70] sm:$0xff] (!%p446_p7)  ;;  %832 = vst.msk [vmem:[#allocation2 + $0x40] sm:$0xff] (!%p446_p7), %vm822_vm1, %v2795_v20 }
  0x2d   : > { %v531_v56 = vpack.c.bf16 %v506_v54, %v505_v53  ;;  %v508_v58 = vld [vmem:[%s2960_s17 + $0x78] sm:$0xff]  ;;  %v509_v59 = vld [vmem:[%s2960_s17 + $0x80] sm:$0xff]  ;;  %v510_v60 = vld [vmem:[%s2960_s17 + $0x88] sm:$0xff]  ;;  %833 = vst.msk [vmem:[#allocation2 + $0x48] sm:$0x3] %vm824_vm2, %v2795_v20  ;;  %s3505_s12 = smov (!%p487_p8, %s2259_s12), 1 }
  0x2e   : > { %v532_v61 = vpack.c.bf16 %v508_v58, %v507_v57  ;;  %v533_v62 = vpack.c.bf16 %v510_v60, %v509_v59  ;;  %v511_v63 = vld [vmem:[%s2960_s17 + $0x90] sm:$0xff]  ;;  %v512_v0 = vld [vmem:[%s2960_s17 + $0x98] sm:$0xff]  ;;  %v513_v1 = vld [vmem:[%s2960_s17 + $0xa0] sm:$0xff]  ;;  %834 = vst.msk [vmem:[#allocation2 + $0x50] sm:$0xff] %vm822_vm1, %v2795_v20  ;;  %s2365_s27 = sshll.u32 %s3505_s12, 6 }
  0x2f   : > { %2459 = vmatpush3.bf16.msra.mxu0 %v2745_v34  ;;  %v514_v2 = vld [vmem:[%s2960_s17 + $0xa8] sm:$0xff]  ;;  %v534_v3 = vpack.c.bf16 %v512_v0, %v511_v63  ;;  %v515_v5 = vld [vmem:[%s2960_s17 + $0xb0] sm:$0xff]  ;;  %v516_v6 = vld [vmem:[%s2960_s17 + $0xb8] sm:$0xff]  ;;  %835 = vst.msk [vmem:[#allocation2 + $0x58] sm:$0x3] %vm824_vm2, %v2795_v20  ;;  %s491_s14 = scalar_lea.vmem %s3500_s9, %s2365_s27 }
  0x30   : > { %2460 = vmatprep.subr.bf16.mxu0 %v2746_v38  ;;  %v535_v4 = vpack.c.bf16 %v514_v2, %v513_v1  ;;  %v517_v7 = vld [vmem:[%s2960_s17 + $0xc0] sm:$0xff]  ;;  %v518_v8 = vld [vmem:[%s2960_s17 + $0xc8] sm:$0xff]  ;;  %v536_v9 = vpack.c.bf16 %v516_v6, %v515_v5  ;;  %v519_v11 = vld [vmem:[%s2960_s17 + $0xd0] sm:$0xff]  ;;  %836 = vst.msk [vmem:[#allocation2 + $0x60] sm:$0xff] %vm822_vm1, %v2795_v20 }
  0x31   : > { %v537_v10 = vpack.c.bf16 %v518_v8, %v517_v7  ;;  %v520_v12 = vld [vmem:[%s2960_s17 + $0xd8] sm:$0xff]  ;;  %v521_v13 = vld [vmem:[%s2960_s17 + $0xe0] sm:$0xff]  ;;  %v522_v14 = vld [vmem:[%s2960_s17 + $0xe8] sm:$0xff]  ;;  %837 = vst.msk [vmem:[#allocation2 + $0x68] sm:$0x3] %vm824_vm2, %v2795_v20 }
  0x32   : > { %v538_v15 = vpack.c.bf16 %v520_v12, %v519_v11  ;;  %v539_v16 = vpack.c.bf16 %v522_v14, %v521_v13  ;;  %v523_v17 = vld [vmem:[%s2960_s17 + $0xf0] sm:$0xff]  ;;  %v524_v18 = vld [vmem:[%s2960_s17 + $0xf8] sm:$0xff]  ;;  %838 = vst.msk [vmem:[#allocation2 + $0x70] sm:$0xff] %vm822_vm1, %v2795_v20  ;;  %840 = vst.msk [vmem:[#allocation2 + $0x80] sm:$0xff] %vm822_vm1, %v2795_v20 }
  0x33   : > { %2461 = vmatpush3.bf16.msra.mxu0 %v2746_v38  ;;  %v540_v19 = vpack.c.bf16 %v524_v18, %v523_v17  ;;  %839 = vst.msk [vmem:[#allocation2 + $0x78] sm:$0x3] %vm824_vm2, %v2795_v20  ;;  %841 = vst.msk [vmem:[#allocation2 + $0x88] sm:$0x3] %vm824_vm2, %v2795_v20  ;;  %v2750_v24 = vld [vmem:[%s3494_s3 + $0x8] sm:$0xff]   ;;  %v3176_v25 = vld [vmem:[%s3494_s3 + $0x20] sm:$0xff]  }
  0x34   : > { %846 = vst.msk [vmem:[#allocation2 + $0xb0] sm:$0xff] %vm822_vm1, %v2795_v20  ;;  %848 = vst.msk [vmem:[#allocation2 + $0xc0] sm:$0xff] %vm822_vm1, %v2795_v20  ;;  %2494 = vmatprep.subr.bf16.mxu0 %v2747_v21  ;;  %2508 = vmatprep.subr.bf16.mxu1 %v2750_v24  ;;  %v3182_v26 = vld [vmem:[%s3493_s2] ss:$0 sm:$0xff] }
  0x35   : > { %847 = vst.msk [vmem:[#allocation2 + $0xb8] sm:$0x3] %vm824_vm2, %v2795_v20  ;;  %849 = vst.msk [vmem:[#allocation2 + $0xc8] sm:$0x3] %vm824_vm2, %v2795_v20  ;;  %2509 = vmatpush3.bf16.msra.mxu1 %v2750_v24 }
  0x36   : > { %2463 = vmatmul.mubr.msk.bf16.vlgmr.msra.gmra.mrb[0].mxu0 %vm580_vm0, %v2975_v43  ;;  %850 = vst.msk [vmem:[#allocation2 + $0xd0] sm:$0xff] %vm822_vm1, %v2795_v20  ;;  %852 = vst.msk [vmem:[#allocation2 + $0xe0] sm:$0xff] %vm822_vm1, %v2795_v20  ;;  %2518 = vmatprep.subr.bf16.mxu1 %v3176_v25 }
  0x37   : > { %2466 = vmatprep.mubr.msk.bf16.mxu0 %vm580_vm0, %v2977_v44  ;;  %851 = vst.msk [vmem:[#allocation2 + $0xd8] sm:$0x3] %vm824_vm2, %v2795_v20  ;;  %853 = vst.msk [vmem:[#allocation2 + $0xe8] sm:$0x3] %vm824_vm2, %v2795_v20  ;;  %2495 = vmatpush3.bf16.msra.mxu0 %v2747_v21 }
  0x38   : > { %854 = vst.msk [vmem:[#allocation2 + $0xf0] sm:$0xff] %vm822_vm1, %v2795_v20  ;;  %856 = vst.msk [vmem:[#allocation2 + $0x100] sm:$0xff] %vm822_vm1, %v2795_v20  ;;  %2496 = vmatprep.subr.bf16.mxu0 %v2748_v22 }
  0x39   : > { %855 = vst.msk [vmem:[#allocation2 + $0xf8] sm:$0x3] %vm824_vm2, %v2795_v20  ;;  %857 = vst.msk [vmem:[#allocation2 + $0x108] sm:$0x3] %vm824_vm2, %v2795_v20 }
  0x3a   : > { %858 = vst.msk [vmem:[#allocation2 + $0x110] sm:$0xff] %vm822_vm1, %v2795_v20  ;;  %860 = vst.msk [vmem:[#allocation2 + $0x120] sm:$0xff] %vm822_vm1, %v2795_v20 }
  0x3b   : > { %859 = vst.msk [vmem:[#allocation2 + $0x118] sm:$0x3] %vm824_vm2, %v2795_v20  ;;  %861 = vst.msk [vmem:[#allocation2 + $0x128] sm:$0x3] %vm824_vm2, %v2795_v20  ;;  %2497 = vmatpush3.bf16.msra.mxu0 %v2748_v22 }
  0x3c   : > { %864 = vst.msk [vmem:[#allocation2 + $0x140] sm:$0xff] %vm822_vm1, %v2795_v20  ;;  %866 = vst.msk [vmem:[#allocation2 + $0x150] sm:$0xff] %vm822_vm1, %v2795_v20 }
  0x3d   : > { %865 = vst.msk [vmem:[#allocation2 + $0x148] sm:$0x3] %vm824_vm2, %v2795_v20  ;;  %867 = vst.msk [vmem:[#allocation2 + $0x158] sm:$0x3] %vm824_vm2, %v2795_v20 }
  0x3e   : > { %2467 = vmatmul.mubr.msk.bf16.gmra.mrb[4].mxu0 %vm580_vm0, %v2987_v49  ;;  %868 = vst.msk [vmem:[#allocation2 + $0x160] sm:$0xff] %vm822_vm1, %v2795_v20  ;;  %870 = vst.msk [vmem:[#allocation2 + $0x170] sm:$0xff] %vm822_vm1, %v2795_v20 }
  0x3f   : > { %2470 = vmatprep.mubr.msk.bf16.mxu0 %vm580_vm0, %v529_v50  ;;  %869 = vst.msk [vmem:[#allocation2 + $0x168] sm:$0x3] %vm824_vm2, %v2795_v20  ;;  %871 = vst.msk [vmem:[#allocation2 + $0x178] sm:$0x3] %vm824_vm2, %v2795_v20 }
  0x40   : > { %872 = vst.msk [vmem:[#allocation2 + $0x180] sm:$0xff] %vm822_vm1, %v2795_v20  ;;  %874 = vst.msk [vmem:[#allocation2 + $0x190] sm:$0xff] %vm822_vm1, %v2795_v20 }
  0x41   : > { %873 = vst.msk [vmem:[#allocation2 + $0x188] sm:$0x3] %vm824_vm2, %v2795_v20  ;;  %875 = vst.msk [vmem:[#allocation2 + $0x198] sm:$0x3] %vm824_vm2, %v2795_v20 }
  0x42   : > { %876 = vst.msk [vmem:[#allocation2 + $0x1a0] sm:$0xff] %vm822_vm1, %v2795_v20  ;;  %878 = vst.msk [vmem:[#allocation2 + $0x1b0] sm:$0xff] %vm822_vm1, %v2795_v20 }
  0x43   : > { %877 = vst.msk [vmem:[#allocation2 + $0x1a8] sm:$0x3] %vm824_vm2, %v2795_v20  ;;  %879 = vst.msk [vmem:[#allocation2 + $0x1b8] sm:$0x3] %vm824_vm2, %v2795_v20 }
  0x44   : > { %880 = vst.msk [vmem:[#allocation2 + $0x1c0] sm:$0xff] %vm822_vm1, %v2795_v20  ;;  %884 = vst.msk [vmem:[#allocation2 + $0x1e0] sm:$0xff] %vm822_vm1, %v2795_v20 }
  0x45   : > { %881 = vst.msk [vmem:[#allocation2 + $0x1c8] sm:$0x3] %vm824_vm2, %v2795_v20  ;;  %885 = vst.msk [vmem:[#allocation2 + $0x1e8] sm:$0x3] %vm824_vm2, %v2795_v20 }
  0x46   : > { %2471 = vmatmul.mubr.msk.bf16.gmra.mrb[8].mxu0 %vm580_vm0, %v530_v55  ;;  %886 = vst.msk [vmem:[#allocation2 + $0x1f0] sm:$0xff] %vm822_vm1, %v2795_v20  ;;  %888 = vst.msk [vmem:[#allocation2 + $0x200] sm:$0xff] %vm822_vm1, %v2795_v20 }
  0x47   : > { %2474 = vmatprep.mubr.msk.bf16.mxu0 %vm580_vm0, %v531_v56  ;;  %887 = vst.msk [vmem:[#allocation2 + $0x1f8] sm:$0x3] %vm824_vm2, %v2795_v20  ;;  %889 = vst.msk [vmem:[#allocation2 + $0x208] sm:$0x3] %vm824_vm2, %v2795_v20 }
  0x48   : > { %890 = vst.msk [vmem:[#allocation2 + $0x210] sm:$0xff] %vm822_vm1, %v2795_v20  ;;  %892 = vst.msk [vmem:[#allocation2 + $0x220] sm:$0xff] %vm822_vm1, %v2795_v20 }
  0x49   : > { %891 = vst.msk [vmem:[#allocation2 + $0x218] sm:$0x3] %vm824_vm2, %v2795_v20  ;;  %893 = vst.msk [vmem:[#allocation2 + $0x228] sm:$0x3] %vm824_vm2, %v2795_v20 }
  0x4a   : > { %894 = vst.msk [vmem:[#allocation2 + $0x230] sm:$0xff] %vm822_vm1, %v2795_v20  ;;  %896 = vst.msk [vmem:[#allocation2 + $0x240] sm:$0xff] %vm822_vm1, %v2795_v20 }
  0x4b   : > { %895 = vst.msk [vmem:[#allocation2 + $0x238] sm:$0x3] %vm824_vm2, %v2795_v20  ;;  %897 = vst.msk [vmem:[#allocation2 + $0x248] sm:$0x3] %vm824_vm2, %v2795_v20 }
  0x4c   : > { %898 = vst.msk [vmem:[#allocation2 + $0x250] sm:$0xff] %vm822_vm1, %v2795_v20  ;;  %900 = vst.msk [vmem:[#allocation2 + $0x260] sm:$0xff] %vm822_vm1, %v2795_v20 }
  0x4d   : > { %899 = vst.msk [vmem:[#allocation2 + $0x258] sm:$0x3] %vm824_vm2, %v2795_v20  ;;  %901 = vst.msk [vmem:[#allocation2 + $0x268] sm:$0x3] %vm824_vm2, %v2795_v20 }
  0x4e   : > { %2475 = vmatmul.mubr.msk.bf16.gmra.mrb[12].mxu0 %vm580_vm0, %v532_v61 }
  0x4f   : > { %2478 = vmatprep.mubr.msk.bf16.mxu0 %vm580_vm0, %v533_v62 }
  0x56   : > { %2479 = vmatmul.mubr.msk.bf16.gmra.mrb[16].mxu0 %vm580_vm0, %v534_v3 }
  0x57   : > { %2482 = vmatprep.mubr.msk.bf16.mxu0 %vm580_vm0, %v535_v4 }
  0x5e   : > { %2483 = vmatmul.mubr.msk.bf16.gmra.mrb[20].mxu0 %vm580_vm0, %v536_v9 }
  0x5f   : > { %2486 = vmatprep.mubr.msk.bf16.mxu0 %vm580_vm0, %v537_v10 }
  0x66   : > { %2487 = vmatmul.mubr.msk.bf16.gmra.mrb[24].mxu0 %vm580_vm0, %v538_v15 }
  0x67   : > { %2490 = vmatprep.mubr.msk.bf16.mxu0 %vm580_vm0, %v539_v16 }
  0x6e   : > { %2491 = vmatmul.mubr.msk.bf16.gmra.mrb[28].mxu0 %vm580_vm0, %v540_v19 }
 0x109   : > { %v2464_v27 = vpop.f32.mrb[0].mxu0 }
 0x10a   : > { %v672_v28 = vadd.f32 %v2464_v27, %v3182_v26  ;;  %v663_v29 = vpop.f32.mrb[1].mxu0 }
 0x10b   : > { %v664_v30 = vadd.f32 %v3182_v26, %v663_v29  ;;  %v2465_v31 = vpop.f32.mrb[2].mxu0 }
 0x10c   : > { %v792_v32 = vmax.f32 %v672_v28, 0.0  ;;  %v675_v33 = vadd.f32 %v2465_v31, %v3182_v26  ;;  %v666_v34 = vpop.f32.mrb[3].mxu0 }
 0x10d   : > { %v790_v35 = vmax.f32 %v664_v30, 0.0  ;;  %v667_v36 = vadd.f32 %v3182_v26, %v666_v34 }
 0x10e   : > { %907 = vst.msk [vmem:[#allocation2 + $0x31] sm:$0xff] %vm822_vm1, %v792_v32  ;;  %v793_v38 = vmax.f32 %v675_v33, 0.0 }
 0x10f   : > { %905 = vst.msk [vmem:[#allocation2 + $0x11] sm:$0xff] %vm822_vm1, %v790_v35  ;;  %v791_v39 = vmax.f32 %v667_v36, 0.0 }
 0x110   : > { %908 = vst.msk [vmem:[#allocation2 + $0x41] sm:$0xff] %vm822_vm1, %v793_v38  ;;  %v955_v38 = vld [vmem:[#allocation2 + $0x141] sm:$0xff] }
 0x111   : > { %906 = vst.msk [vmem:[#allocation2 + $0x21] sm:$0xff] %vm822_vm1, %v791_v39  ;;  %v2468_v40 = vpop.f32.mrb[4].mxu0 }
 0x112   : > { %v688_v41 = vadd.f32 %v2468_v40, %v3182_v26  ;;  %v679_v42 = vpop.f32.mrb[5].mxu0 }
 0x113   : > { %v680_v45 = vadd.f32 %v3182_v26, %v679_v42  ;;  %v2469_v46 = vpop.f32.mrb[6].mxu0 }
 0x114   : > { %v796_v47 = vmax.f32 %v688_v41, 0.0  ;;  %v691_v48 = vadd.f32 %v2469_v46, %v3182_v26  ;;  %v682_v50 = vpop.f32.mrb[7].mxu0 }
 0x115   : > { %v794_v51 = vmax.f32 %v680_v45, 0.0  ;;  %v683_v52 = vadd.f32 %v3182_v26, %v682_v50 }
 0x116   : > { %911 = vst.msk [vmem:[#allocation2 + $0x71] sm:$0xff] %vm822_vm1, %v796_v47  ;;  %v797_v53 = vmax.f32 %v691_v48, 0.0 }
 0x117   : > { %909 = vst.msk [vmem:[#allocation2 + $0x51] sm:$0xff] %vm822_vm1, %v794_v51  ;;  %v795_v54 = vmax.f32 %v683_v52, 0.0 }
 0x118   : > { %912 = vst.msk [vmem:[#allocation2 + $0x81] sm:$0xff] %vm822_vm1, %v797_v53 }
 0x119   : > { %910 = vst.msk [vmem:[#allocation2 + $0x61] sm:$0xff] %vm822_vm1, %v795_v54  ;;  %v2472_v55 = vpop.f32.mrb[8].mxu0 }
 0x11a   : > { %v704_v56 = vadd.f32 %v2472_v55, %v3182_v26  ;;  %v695_v57 = vpop.f32.mrb[9].mxu0 }
 0x11b   : > { %v696_v58 = vadd.f32 %v3182_v26, %v695_v57  ;;  %v2473_v59 = vpop.f32.mrb[10].mxu0 }
 0x11c   : > { %v800_v60 = vmax.f32 %v704_v56, 0.0  ;;  %v707_v61 = vadd.f32 %v2473_v59, %v3182_v26  ;;  %v698_v62 = vpop.f32.mrb[11].mxu0 }
 0x11d   : > { %v798_v63 = vmax.f32 %v696_v58, 0.0  ;;  %v699_v0 = vadd.f32 %v3182_v26, %v698_v62 }
 0x11e   : > { %915 = vst.msk [vmem:[#allocation2 + $0xd1] sm:$0xff] %vm822_vm1, %v800_v60  ;;  %v801_v1 = vmax.f32 %v707_v61, 0.0 }
 0x11f   : > { %913 = vst.msk [vmem:[#allocation2 + $0xb1] sm:$0xff] %vm822_vm1, %v798_v63  ;;  %v799_v2 = vmax.f32 %v699_v0, 0.0 }
 0x120   : > { %916 = vst.msk [vmem:[#allocation2 + $0xe1] sm:$0xff] %vm822_vm1, %v801_v1 }
 0x121   : > { %914 = vst.msk [vmem:[#allocation2 + $0xc1] sm:$0xff] %vm822_vm1, %v799_v2  ;;  %v2476_v3 = vpop.f32.mrb[12].mxu0 }
 0x122   : > { %v720_v4 = vadd.f32 %v2476_v3, %v3182_v26  ;;  %v711_v5 = vpop.f32.mrb[13].mxu0 }
 0x123   : > { %v712_v6 = vadd.f32 %v3182_v26, %v711_v5  ;;  %v2477_v7 = vpop.f32.mrb[14].mxu0 }
 0x124   : > { %v804_v8 = vmax.f32 %v720_v4, 0.0  ;;  %v723_v9 = vadd.f32 %v2477_v7, %v3182_v26  ;;  %v714_v10 = vpop.f32.mrb[15].mxu0 }
 0x125   : > { %v802_v11 = vmax.f32 %v712_v6, 0.0  ;;  %v715_v12 = vadd.f32 %v3182_v26, %v714_v10 }
 0x126   : > { %919 = vst.msk [vmem:[#allocation2 + $0x111] sm:$0xff] %vm822_vm1, %v804_v8  ;;  %v805_v13 = vmax.f32 %v723_v9, 0.0 }
 0x127   : > { %917 = vst.msk [vmem:[#allocation2 + $0xf1] sm:$0xff] %vm822_vm1, %v802_v11  ;;  %v803_v14 = vmax.f32 %v715_v12, 0.0 }
 0x128   : > { %920 = vst.msk [vmem:[#allocation2 + $0x121] sm:$0xff] %vm822_vm1, %v805_v13 }
 0x129   : > { %918 = vst.msk [vmem:[#allocation2 + $0x101] sm:$0xff] %vm822_vm1, %v803_v14  ;;  %v2480_v15 = vpop.f32.mrb[16].mxu0 }
 0x12a   : > { %v736_v16 = vadd.f32 %v2480_v15, %v3182_v26  ;;  %v727_v17 = vpop.f32.mrb[17].mxu0 }
 0x12b   : > { %v728_v18 = vadd.f32 %v3182_v26, %v727_v17  ;;  %v2481_v19 = vpop.f32.mrb[18].mxu0 }
 0x12c   : > { %v808_v20 = vmax.f32 %v736_v16, 0.0  ;;  %v739_v21 = vadd.f32 %v2481_v19, %v3182_v26  ;;  %v730_v22 = vpop.f32.mrb[19].mxu0  ;;  %v938_v16 = vld [vmem:[#allocation2 + $0x1e0] sm:$0xff] }
 0x12d   : > { %v806_v23 = vmax.f32 %v728_v18, 0.0  ;;  %v731_v24 = vadd.f32 %v3182_v26, %v730_v22 }
 0x12e   : > { %923 = vst.msk [vmem:[#allocation2 + $0x171] sm:$0xff] %vm822_vm1, %v808_v20  ;;  %v809_v27 = vmax.f32 %v739_v21, 0.0 }
 0x12f   : > { %921 = vst.msk [vmem:[#allocation2 + $0x151] sm:$0xff] %vm822_vm1, %v806_v23  ;;  %v807_v28 = vmax.f32 %v731_v24, 0.0 }
 0x130   : > { %924 = vst.msk [vmem:[#allocation2 + $0x181] sm:$0xff] %vm822_vm1, %v809_v27 }
 0x131   : > { %922 = vst.msk [vmem:[#allocation2 + $0x161] sm:$0xff] %vm822_vm1, %v807_v28  ;;  %v2484_v29 = vpop.f32.mrb[20].mxu0 }
 0x132   : > { %v752_v30 = vadd.f32 %v2484_v29, %v3182_v26  ;;  %v743_v31 = vpop.f32.mrb[21].mxu0 }
 0x133   : > { %v744_v32 = vadd.f32 %v3182_v26, %v743_v31  ;;  %v2485_v33 = vpop.f32.mrb[22].mxu0 }
 0x134   : > { %v812_v34 = vmax.f32 %v752_v30, 0.0  ;;  %v755_v35 = vadd.f32 %v2485_v33, %v3182_v26  ;;  %v746_v36 = vpop.f32.mrb[23].mxu0  ;;  %v2752_v33 = vld [vmem:[%s3494_s3 + $0x28] sm:$0xff]  }
 0x135   : > { %v810_v39 = vmax.f32 %v744_v32, 0.0  ;;  %v747_v40 = vadd.f32 %v3182_v26, %v746_v36  ;;  %v3233_v47 = vld [vmem:[#allocation2 + $0x171] sm:$0xff] }
 0x136   : > { %927 = vst.msk [vmem:[#allocation2 + $0x1b1] sm:$0xff] %vm822_vm1, %v812_v34  ;;  %v813_v41 = vmax.f32 %v755_v35, 0.0  ;;  %v3229_v42 = vld [vmem:[#allocation2 + $0x151] sm:$0xff] }
 0x137   : > { %925 = vst.msk [vmem:[#allocation2 + $0x191] sm:$0xff] %vm822_vm1, %v810_v39  ;;  %v811_v45 = vmax.f32 %v747_v40, 0.0  ;;  %v963_v46 = vpack.c.bf16 %v3229_v42, %v955_v38  ;;  %v3235_v48 = vld [vmem:[#allocation2 + $0x181] sm:$0xff]  ;;  %v2753_v36 = vld [vmem:[%s3494_s3 + $0x30] sm:$0xff]  }
 0x138   : > { %928 = vst.msk [vmem:[#allocation2 + $0x1c1] sm:$0xff] %vm822_vm1, %v813_v41  ;;  %v3238_v50 = vld [vmem:[#allocation2 + $0x161] sm:$0xff]  ;;  %v1726_v51 = vpack.c.bf16 %v3235_v48, %v3233_v47 }
 0x139   : > { %926 = vst.msk [vmem:[#allocation2 + $0x1a1] sm:$0xff] %vm822_vm1, %v811_v45  ;;  %v2488_v52 = vpop.f32.mrb[24].mxu0  ;;  %2498 = vmatprep.mubr.msk.bf16.mxu0 %vm822_vm1, %v963_v46  ;;  %v964_v53 = vpack.c.bf16 %v3233_v47, %v3238_v50  ;;  %v1725_v54 = vpack.c.bf16 %v3238_v50, %v3229_v42  ;;  %v1149_v40 = vld [vmem:[#allocation2 + $0x1e1] sm:$0xff] }
 0x13a   : > { %v768_v55 = vadd.f32 %v2488_v52, %v3182_v26  ;;  %v759_v56 = vpop.f32.mrb[25].mxu0 }
 0x13b   : > { %v760_v57 = vadd.f32 %v3182_v26, %v759_v56  ;;  %v2489_v58 = vpop.f32.mrb[26].mxu0  ;;  %2499 = vmatmul.mubr.msk.bf16.vlgmr.msra.gmra.mrb[32].mxu0 %vm822_vm1, %v964_v53 }
 0x13c   : > { %v816_v59 = vmax.f32 %v768_v55, 0.0  ;;  %v771_v60 = vadd.f32 %v2489_v58, %v3182_v26  ;;  %v762_v61 = vpop.f32.mrb[27].mxu0  ;;  %v2754_v58 = vld [vmem:[%s3494_s3 + $0x38] sm:$0xff]  }
 0x13d   : > { %v814_v62 = vmax.f32 %v760_v57, 0.0  ;;  %v763_v63 = vadd.f32 %v3182_v26, %v762_v61  ;;  %v3262_v5 = vld [vmem:[#allocation2 + $0x1b1] sm:$0xff]  ;;  %v1264_v61 = vld [vmem:[#allocation2 + $0xc0] sm:$0xff] }
 0x13e   : > { %931 = vst.msk [vmem:[#allocation2 + $0x211] sm:$0xff] %vm822_vm1, %v816_v59  ;;  %v817_v0 = vmax.f32 %v771_v60, 0.0  ;;  %v3254_v1 = vld [vmem:[#allocation2 + $0x191] sm:$0xff]  ;;  %v2755_v60 = vld [vmem:[%s3494_s3 + $0x40] sm:$0xff]  }
 0x13f   : > { %929 = vst.msk [vmem:[#allocation2 + $0x1f1] sm:$0xff] %vm822_vm1, %v814_v62  ;;  %v815_v2 = vmax.f32 %v763_v63, 0.0  ;;  %v965_v3 = vpack.c.bf16 %v3254_v1, %v3235_v48  ;;  %v1724_v42 = vld [vmem:[#allocation2 + $0x1c1] sm:$0xff] }
 0x140   : > { %932 = vst.msk [vmem:[#allocation2 + $0x221] sm:$0xff] %vm822_vm1, %v817_v0  ;;  %v3260_v4 = vld [vmem:[#allocation2 + $0x1a1] sm:$0xff]  ;;  %v1263_v0 = vld [vmem:[#allocation2 + $0xb0] sm:$0xff]  ;;  %v1728_v47 = vpack.c.bf16 %v1724_v42, %v3262_v5 }
 0x141   : > { %930 = vst.msk [vmem:[#allocation2 + $0x201] sm:$0xff] %vm822_vm1, %v815_v2  ;;  %v2492_v6 = vpop.f32.mrb[28].mxu0  ;;  %2502 = vmatprep.mubr.msk.bf16.mxu0 %vm822_vm1, %v965_v3  ;;  %v966_v7 = vpack.c.bf16 %v3262_v5, %v3260_v4  ;;  %v1727_v8 = vpack.c.bf16 %v3260_v4, %v3254_v1  ;;  %v1271_v2 = vpack.c.bf16 %v1264_v61, %v1263_v0  ;;  %v1266_v3 = vld [vmem:[#allocation2 + $0xe0] sm:$0xff]  ;;  %v2770_v1 = vld [vmem:[%s3496_s5 + $0x8] sm:$0xff]  }
 0x142   : > { %v784_v9 = vadd.f32 %v2492_v6, %v3182_v26  ;;  %v775_v10 = vpop.f32.mrb[29].mxu0  ;;  %v1268_v6 = vld [vmem:[#allocation2 + $0x100] sm:$0xff] }
 0x143   : > { %v776_v11 = vadd.f32 %v3182_v26, %v775_v10  ;;  %v2493_v12 = vpop.f32.mrb[30].mxu0  ;;  %2503 = vmatmul.mubr.msk.bf16.gmra.mrb[36].mxu0 %vm822_vm1, %v966_v7  ;;  %v1265_v7 = vld [vmem:[#allocation2 + $0xd0] sm:$0xff]  ;;  %v1494_v0 = vld [vmem:[#allocation2 + $0x101] sm:$0xff] }
 0x144   : > { %v820_v13 = vmax.f32 %v784_v9, 0.0  ;;  %v787_v14 = vadd.f32 %v2493_v12, %v3182_v26  ;;  %v778_v15 = vpop.f32.mrb[31].mxu0  ;;  %2610 = vmatprep.mubr.msk.bf16.mxu0 %vm580_vm0, %v2964_v37  ;;  %v1272_v9 = vpack.c.bf16 %v1266_v3, %v1265_v7  ;;  %v1267_v10 = vld [vmem:[#allocation2 + $0xf0] sm:$0xff]  ;;  %v2760_v7 = vld [vmem:[%s3494_s3 + $0x68] sm:$0xff]  }
 0x145   : > { %v818_v17 = vmax.f32 %v776_v11, 0.0  ;;  %v779_v18 = vadd.f32 %v3182_v26, %v778_v15  ;;  %v3280_v21 = vld [vmem:[#allocation2 + $0x210] sm:$0xff]  ;;  %v2756_v11 = vld [vmem:[%s3494_s3 + $0x48] sm:$0xff]   ;;  %v1273_v12 = vpack.c.bf16 %v1268_v6, %v1267_v10 }
 0x146   : > { %935 = vst.msk [vmem:[#allocation2 + $0x251] sm:$0xff] %vm822_vm1, %v820_v13  ;;  %v821_v19 = vmax.f32 %v787_v14, 0.0  ;;  %v3278_v20 = vld [vmem:[#allocation2 + $0x1f0] sm:$0xff]  ;;  %v1270_v14 = vld [vmem:[#allocation2 + $0x120] sm:$0xff] }
 0x147   : > { %933 = vst.msk [vmem:[#allocation2 + $0x231] sm:$0xff] %vm822_vm1, %v818_v17  ;;  %v819_v22 = vmax.f32 %v779_v18, 0.0  ;;  %v946_v23 = vpack.c.bf16 %v3278_v20, %v938_v16  ;;  %v3284_v24 = vld [vmem:[#allocation2 + $0x220] sm:$0xff]  ;;  %v3286_v27 = vld [vmem:[#allocation2 + $0x211] sm:$0xff] }
 0x148   : > { %v3288_v37 = vld [vmem:[#allocation2 + $0x221] sm:$0xff]  ;;  %936 = vst.msk [vmem:[#allocation2 + $0x261] sm:$0xff] %vm822_vm1, %v821_v19  ;;  %v3293_v28 = vld [vmem:[#allocation2 + $0x1f1] sm:$0xff]  ;;  %v1612_v30 = vpack.c.bf16 %v3284_v24, %v3280_v21 }
 0x149   : > { %v3291_v26 = vld [vmem:[#allocation2 + $0x200] sm:$0xff]  ;;  %v1839_v31 = vpack.c.bf16 %v3288_v37, %v3286_v27  ;;  %934 = vst.msk [vmem:[#allocation2 + $0x241] sm:$0xff] %vm822_vm1, %v819_v22  ;;  %2510 = vmatprep.mubr.msk.bf16.mxu1 %vm822_vm1, %v946_v23  ;;  %v1157_v55 = vpack.c.bf16 %v3293_v28, %v1149_v40  ;;  %v2757_v13 = vld [vmem:[%s3494_s3 + $0x50] sm:$0xff]  }
 0x14a   : > { %v3295_v29 = vld [vmem:[#allocation2 + $0x201] sm:$0xff]  ;;  %v947_v32 = vpack.c.bf16 %v3280_v21, %v3291_v26  ;;  %v1611_v34 = vpack.c.bf16 %v3291_v26, %v3278_v20  ;;  %v1269_v16 = vld [vmem:[#allocation2 + $0x110] sm:$0xff] }
 0x14b   : > { %v1838_v35 = vpack.c.bf16 %v3295_v29, %v3293_v28  ;;  %v1158_v57 = vpack.c.bf16 %v3286_v27, %v3295_v29  ;;  %v1377_v15 = vld [vmem:[#allocation2 + $0x21] sm:$0xff]  ;;  %v1274_v17 = vpack.c.bf16 %v1270_v14, %v1269_v16  ;;  %v1376_v18 = vld [vmem:[#allocation2 + $0x11] sm:$0xff] }
 0x14c   : > { %2511 = vmatmul.mubr.msk.bf16.vlgmr.msra.gmra.mrb[0].mxu1 %vm822_vm1, %v947_v32  ;;  %v1384_v19 = vpack.c.bf16 %v1377_v15, %v1376_v18  ;;  %v1379_v22 = vld [vmem:[#allocation2 + $0x41] sm:$0xff]  ;;  %v1378_v32 = vld [vmem:[#allocation2 + $0x31] sm:$0xff] }
 0x14d   : > { %2519 = vmatpush3.bf16.msra.mxu1 %v3176_v25  ;;  %v3323_v45 = vld [vmem:[#allocation2 + $0x250] sm:$0xff]  ;;  %v1381_v23 = vld [vmem:[#allocation2 + $0x61] sm:$0xff]  ;;  %v2762_v14 = vld [vmem:[%s3494_s3 + $0x78] sm:$0xff]  }
 0x14e   : > { %2520 = vmatprep.subr.bf16.mxu1 %v2752_v33  ;;  %v3317_v38 = vld [vmem:[#allocation2 + $0x230] sm:$0xff]  ;;  %v2765_v15 = vld [vmem:[%s3498_s7] sm:$0xff]   ;;  %v2766_v16 = vld [vmem:[%s3498_s7 + $0x8] sm:$0xff]  }
 0x14f   : > { %v948_v39 = vpack.c.bf16 %v3317_v38, %v3284_v24  ;;  %v3330_v52 = vld [vmem:[#allocation2 + $0x231] sm:$0xff]  ;;  %2602 = vmatprep.subr.bf16.mxu0 %v2765_v15  ;;  %v2763_v20 = vld [vmem:[%s3494_s3 + $0x80] sm:$0xff]  }
 0x150   : > { %v3321_v41 = vld [vmem:[#allocation2 + $0x240] sm:$0xff]  ;;  %v1159_v59 = vpack.c.bf16 %v3330_v52, %v3288_v37  ;;  %v3351_v62 = vld [vmem:[#allocation2 + $0x251] sm:$0xff]  ;;  %2603 = vmatpush3.bf16.msra.mxu0 %v2765_v15 }
 0x151   : > { %2521 = vmatpush3.bf16.msra.mxu1 %v2752_v33  ;;  %v3325_v46 = vld [vmem:[#allocation2 + $0x241] sm:$0xff]  ;;  %2514 = vmatprep.mubr.msk.bf16.mxu1 %vm822_vm1, %v948_v39  ;;  %v949_v25 = vpack.c.bf16 %v3323_v45, %v3321_v41  ;;  %v1613_v53 = vpack.c.bf16 %v3321_v41, %v3317_v38  ;;  %v1385_v33 = vpack.c.bf16 %v1379_v22, %v1378_v32  ;;  %v2758_v39 = vld [vmem:[%s3494_s3 + $0x58] sm:$0xff]   ;;  %v2761_v10 = vld [vmem:[%s3494_s3 + $0x70] sm:$0xff]  }
 0x152   : > { %2530 = vmatprep.subr.bf16.mxu1 %v2753_v36  ;;  %v1840_v56 = vpack.c.bf16 %v3325_v46, %v3330_v52  ;;  %v1160_v63 = vpack.c.bf16 %v3351_v62, %v3325_v46  ;;  %v1493_v6 = vld [vmem:[#allocation2 + $0xf1] sm:$0xff]  ;;  %v1610_v26 = vld [vmem:[#allocation2 + $0x260] sm:$0xff]  ;;  %2604 = vmatprep.subr.bf16.mxu0 %v2766_v16  ;;  %v2764_v38 = vld [vmem:[%s3494_s3 + $0x88] sm:$0xff]  }
 0x153   : > { %v2767_v21 = vld [vmem:[%s3498_s7 + $0x10] sm:$0xff]   ;;  %v1614_v24 = vpack.c.bf16 %v1610_v26, %v3323_v45  ;;  %v2345_v37 = vld [vmem:[%s3495_s4] ss:$0 sm:$0xff] }
 0x154   : > { %2515 = vmatmul.mubr.msk.bf16.gmra.mrb[4].mxu1 %vm822_vm1, %v949_v25  ;;  %v2759_v25 = vld [vmem:[%s3494_s3 + $0x60] sm:$0xff]   ;;  %2605 = vmatpush3.bf16.msra.mxu0 %v2766_v16 }
 0x155   : > { %2522 = vmatprep.mubr.msk.bf16.mxu1 %vm822_vm1, %v1157_v55  ;;  %v1383_v55 = vld [vmem:[#allocation2 + $0x81] sm:$0xff]  ;;  %2606 = vmatprep.subr.bf16.mxu0 %v2767_v21 }
 0x158   : > { %2607 = vmatpush3.bf16.msra.mxu0 %v2767_v21 }
 0x15c   : > { %2523 = vmatmul.mubr.msk.bf16.vlgmr.msra.gmra.mrb[0].mxu1 %vm822_vm1, %v1158_v57  ;;  %v1490_v57 = vld [vmem:[#allocation2 + $0xc1] sm:$0xff] }
 0x15d   : > { %2531 = vmatpush3.bf16.msra.mxu1 %v2753_v36  ;;  %2526 = vmatprep.mubr.msk.bf16.mxu1 %vm822_vm1, %v1159_v59  ;;  %v1380_v36 = vld [vmem:[#allocation2 + $0x51] sm:$0xff] }
 0x15e   : > { %2532 = vmatprep.subr.bf16.mxu1 %v2754_v58  ;;  %v1386_v40 = vpack.c.bf16 %v1381_v23, %v1380_v36 }
 0x161   : > { %2533 = vmatpush3.bf16.msra.mxu1 %v2754_v58  ;;  %v1382_v58 = vld [vmem:[#allocation2 + $0x71] sm:$0xff] }
 0x162   : > { %2542 = vmatprep.subr.bf16.mxu1 %v2755_v60  ;;  %v1387_v59 = vpack.c.bf16 %v1383_v55, %v1382_v58 }
 0x164   : > { %2527 = vmatmul.mubr.msk.bf16.gmra.mrb[4].mxu1 %vm822_vm1, %v1160_v63  ;;  %v1492_v63 = vld [vmem:[#allocation2 + $0xe1] sm:$0xff] }
 0x165   : > { %2534 = vmatprep.mubr.msk.bf16.mxu1 %vm822_vm1, %v1271_v2  ;;  %v1491_v2 = vld [vmem:[#allocation2 + $0xd1] sm:$0xff] }
 0x166   : > { %v1498_v3 = vpack.c.bf16 %v1492_v63, %v1491_v2 }
 0x16c   : > { %2535 = vmatmul.mubr.msk.bf16.vlgmr.msra.gmra.mrb[0].mxu1 %vm822_vm1, %v1272_v9  ;;  %v1499_v9 = vpack.c.bf16 %v1494_v0, %v1493_v6 }
 0x16d   : > { %2543 = vmatpush3.bf16.msra.mxu1 %v2755_v60  ;;  %2538 = vmatprep.mubr.msk.bf16.mxu1 %vm822_vm1, %v1273_v12  ;;  %v1489_v60 = vld [vmem:[#allocation2 + $0xb1] sm:$0xff] }
 0x16e   : > { %2544 = vmatprep.subr.bf16.mxu1 %v2756_v11  ;;  %v1497_v61 = vpack.c.bf16 %v1490_v57, %v1489_v60  ;;  %v1495_v12 = vld [vmem:[#allocation2 + $0x111] sm:$0xff] }
 0x171   : > { %2545 = vmatpush3.bf16.msra.mxu1 %v2756_v11  ;;  %v1496_v11 = vld [vmem:[#allocation2 + $0x121] sm:$0xff] }
 0x172   : > { %2554 = vmatprep.subr.bf16.mxu1 %v2757_v13 }
 0x174   : > { %2539 = vmatmul.mubr.msk.bf16.gmra.mrb[4].mxu1 %vm822_vm1, %v1274_v17 }
 0x175   : > { %2546 = vmatprep.mubr.msk.bf16.mxu1 %vm822_vm1, %v1384_v19 }
 0x17c   : > { %2547 = vmatmul.mubr.msk.bf16.vlgmr.msra.gmra.mrb[0].mxu1 %vm822_vm1, %v1385_v33 }
 0x17d   : > { %2555 = vmatpush3.bf16.msra.mxu1 %v2757_v13  ;;  %2550 = vmatprep.mubr.msk.bf16.mxu1 %vm822_vm1, %v1386_v40  ;;  %v1500_v13 = vpack.c.bf16 %v1496_v11, %v1495_v12  ;;  %v2355_v11 = vld [vmem:[%s3497_s6] ss:$0 sm:$0xff] }
 0x17e   : > { %2556 = vmatprep.subr.bf16.mxu1 %v2758_v39 }
 0x181   : > { %2557 = vmatpush3.bf16.msra.mxu1 %v2758_v39 }
 0x182   : > { %2566 = vmatprep.subr.bf16.mxu1 %v2759_v25 }
 0x184   : > { %2551 = vmatmul.mubr.msk.bf16.gmra.mrb[4].mxu1 %vm822_vm1, %v1387_v59 }
 0x185   : > { %2558 = vmatprep.mubr.msk.bf16.mxu1 %vm822_vm1, %v1497_v61 }
 0x18c   : > { %2559 = vmatmul.mubr.msk.bf16.vlgmr.msra.gmra.mrb[0].mxu1 %vm822_vm1, %v1498_v3 }
 0x18d   : > { %2567 = vmatpush3.bf16.msra.mxu1 %v2759_v25  ;;  %2562 = vmatprep.mubr.msk.bf16.mxu1 %vm822_vm1, %v1499_v9 }
 0x18e   : > { %2568 = vmatprep.subr.bf16.mxu1 %v2760_v7 }
 0x191   : > { %2569 = vmatpush3.bf16.msra.mxu1 %v2760_v7 }
 0x192   : > { %2578 = vmatprep.subr.bf16.mxu1 %v2761_v10 }
 0x194   : > { %2563 = vmatmul.mubr.msk.bf16.gmra.mrb[4].mxu1 %vm822_vm1, %v1500_v13 }
 0x195   : > { %2570 = vmatprep.mubr.msk.bf16.mxu1 %vm822_vm1, %v1611_v34  ;;  %v2769_v34 = vld [vmem:[%s3496_s5] sm:$0xff]  }
 0x19c   : > { %2571 = vmatmul.mubr.msk.bf16.vlgmr.msra.gmra.mrb[0].mxu1 %vm822_vm1, %v1612_v30  ;;  %v2768_v30 = vld [vmem:[%s3498_s7 + $0x18] sm:$0xff]  }
 0x19d   : > { %2579 = vmatpush3.bf16.msra.mxu1 %v2761_v10  ;;  %2574 = vmatprep.mubr.msk.bf16.mxu1 %vm822_vm1, %v1613_v53  ;;  %v2346_v10 = vld [vmem:[%s3499_s8] ss:$0 sm:$0xff] }
 0x19e   : > { %2580 = vmatprep.subr.bf16.mxu1 %v2762_v14  ;;  %2608 = vmatprep.subr.bf16.mxu0 %v2768_v30  ;;  %v2644_v12 = vadd.f32 %v2355_v11, %v2346_v10 }
 0x19f   : > { %2609 = vmatpush3.bf16.msra.mxu0 %v2768_v30 }
 0x1a0   : > { %2618 = vmatprep.subr.bf16.mxu0 %v2769_v34 }
 0x1a1   : > { %2581 = vmatpush3.bf16.msra.mxu1 %v2762_v14 }
 0x1a2   : > { %2590 = vmatprep.subr.bf16.mxu1 %v2763_v20  ;;  %2611 = vmatmul.mubr.msk.bf16.vlgmr.msra.gmra.mrb[40].mxu0 %vm580_vm0, %v2975_v43  ;;  %v1837_v43 = vld [vmem:[#allocation2 + $0x261] sm:$0xff] }
 0x1a3   : > { %2619 = vmatpush3.bf16.msra.mxu0 %v2769_v34  ;;  %2614 = vmatprep.mubr.msk.bf16.mxu0 %vm580_vm0, %v2977_v44  ;;  %v1841_v44 = vpack.c.bf16 %v1837_v43, %v3351_v62 }
 0x1a4   : > { %2575 = vmatmul.mubr.msk.bf16.gmra.mrb[4].mxu1 %vm822_vm1, %v1614_v24  ;;  %2620 = vmatprep.subr.bf16.mxu0 %v2770_v1 }
 0x1a5   : > { %2582 = vmatprep.mubr.msk.bf16.mxu1 %vm822_vm1, %v1725_v54 }
 0x1a7   : > { %2621 = vmatpush3.bf16.msra.mxu0 %v2770_v1 }
 0x1aa   : > { %2615 = vmatmul.mubr.msk.bf16.gmra.mrb[44].mxu0 %vm580_vm0, %v2987_v49 }
 0x1ac   : > { %2583 = vmatmul.mubr.msk.bf16.vlgmr.msra.gmra.mrb[0].mxu1 %vm822_vm1, %v1726_v51 }
 0x1ad   : > { %2591 = vmatpush3.bf16.msra.mxu1 %v2763_v20  ;;  %2586 = vmatprep.mubr.msk.bf16.mxu1 %vm822_vm1, %v1727_v8 }
 0x1ae   : > { %2592 = vmatprep.subr.bf16.mxu1 %v2764_v38 }
 0x1b1   : > { %2593 = vmatpush3.bf16.msra.mxu1 %v2764_v38 }
 0x1b4   : > { %2587 = vmatmul.mubr.msk.bf16.gmra.mrb[4].mxu1 %vm822_vm1, %v1728_v47 }
 0x1b5   : > { %2594 = vmatprep.mubr.msk.bf16.mxu1 %vm822_vm1, %v1838_v35 }
 0x1bc   : > { %2595 = vmatmul.mubr.msk.bf16.vlgmr.msra.gmra.mrb[0].mxu1 %vm822_vm1, %v1839_v31 }
 0x1bd   : > { %2598 = vmatprep.mubr.msk.bf16.mxu1 %vm822_vm1, %v1840_v56 }
 0x1c4   : > { %2599 = vmatmul.mubr.msk.bf16.gmra.mrb[4].mxu1 %vm822_vm1, %v1841_v44 }
 0x20e   : > { %v2500_v48 = vpop.f32.mrb[32].mxu0 }
 0x20f   : > { %v1029_v50 = vpop.f32.mrb[33].mxu0 }
 0x210   : > { %v2501_v51 = vpop.f32.mrb[34].mxu0 }
 0x211   : > { %v1032_v54 = vpop.f32.mrb[35].mxu0 }
 0x216   : > { %v2504_v49 = vpop.f32.mrb[36].mxu0 }
 0x217   : > { %v1045_v4 = vpop.f32.mrb[37].mxu0 }
 0x218   : > { %v2505_v5 = vpop.f32.mrb[38].mxu0 }
 0x219   : > { %v1048_v8 = vpop.f32.mrb[39].mxu0 }
 0x28f   : > { %v2596_v27 = vpop.f32.mrb[0].mxu1 }
 0x290   : > { %v2630_v28 = vadd.f32 %v2596_v27, %v2500_v48  ;;  %v1904_v29 = vpop.f32.mrb[1].mxu1 }
 0x291   : > { %v2631_v31 = vadd.f32 %v1904_v29, %v1029_v50  ;;  %v2597_v35 = vpop.f32.mrb[2].mxu1 }
 0x292   : > { %v1952_v41 = vadd.f32 %v2630_v28, %v2345_v37  ;;  %v2632_v45 = vadd.f32 %v2597_v35, %v2501_v51  ;;  %v1907_v46 = vpop.f32.mrb[3].mxu1 }
 0x293   : > { %v1950_v52 = vadd.f32 %v2631_v31, %v2345_v37  ;;  %v2633_v53 = vadd.f32 %v1907_v46, %v1032_v54 }
 0x294   : > { %v1953_v56 = vadd.f32 %v2632_v45, %v2345_v37  ;;  %v1960_v17 = vmax.f32 %v1952_v41, 0.0 }
 0x295   : > { %v1951_v62 = vadd.f32 %v2633_v53, %v2345_v37  ;;  %v1958_v19 = vmax.f32 %v1950_v52, 0.0 }
 0x296   : > { %v1961_v18 = vmax.f32 %v1953_v56, 0.0 }
 0x297   : > { %v1959_v22 = vmax.f32 %v1951_v62, 0.0  ;;  %v2600_v23 = vpop.f32.mrb[4].mxu1 }
 0x298   : > { %v1967_v32 = vpack.c.bf16 %v1961_v18, %v1960_v17  ;;  %v2634_v33 = vadd.f32 %v2600_v23, %v2504_v49  ;;  %v1920_v36 = vpop.f32.mrb[5].mxu1 }
 0x299   : > { %v1966_v39 = vpack.c.bf16 %v1959_v22, %v1958_v19  ;;  %v2635_v40 = vadd.f32 %v1920_v36, %v1045_v4  ;;  %v2601_v25 = vpop.f32.mrb[6].mxu1 }
 0x29a   : > { %v1956_v55 = vadd.f32 %v2634_v33, %v2345_v37  ;;  %v2636_v57 = vadd.f32 %v2601_v25, %v2505_v5  ;;  %v1923_v58 = vpop.f32.mrb[7].mxu1 }
 0x29b   : > { %v1954_v59 = vadd.f32 %v2635_v40, %v2345_v37  ;;  %v2637_v60 = vadd.f32 %v1923_v58, %v1048_v8  ;;  %2622 = vmatprep.mubr.msk.bf16.mxu0 %vm822_vm1, %v1966_v39 }
 0x29c   : > { %v1957_v61 = vadd.f32 %v2636_v57, %v2345_v37  ;;  %2623 = vmatmul.mubr.msk.bf16.vlgmr.msra.gmra.mrb[40].mxu0 %vm822_vm1, %v1967_v32  ;;  %v1964_v0 = vmax.f32 %v1956_v55, 0.0 }
 0x29d   : > { %v1955_v63 = vadd.f32 %v2637_v60, %v2345_v37  ;;  %v1962_v3 = vmax.f32 %v1954_v59, 0.0 }
 0x29e   : > { %v1965_v2 = vmax.f32 %v1957_v61, 0.0 }
 0x29f   : > { %v1963_v6 = vmax.f32 %v1955_v63, 0.0 }
 0x2a0   : > { %v1969_v7 = vpack.c.bf16 %v1965_v2, %v1964_v0 }
 0x2a1   : > { %v1968_v9 = vpack.c.bf16 %v1963_v6, %v1962_v3 }
 0x2a3   : > { %2626 = vmatprep.mubr.msk.bf16.mxu0 %vm822_vm1, %v1968_v9 }
 0x2a4   : > { %2627 = vmatmul.mubr.msk.bf16.gmra.mrb[44].mxu0 %vm822_vm1, %v1969_v7 }
 0x36f   : > { %v2624_v13 = vpop.f32.mrb[40].mxu0 }
 0x370   : > { %v2638_v14 = vadd.f32 %v2624_v13, %v2346_v10  ;;  %v2143_v15 = vpop.f32.mrb[41].mxu0 }
 0x371   : > { %v2640_v16 = vadd.f32 %v2346_v10, %v2143_v15  ;;  %v2625_v20 = vpop.f32.mrb[42].mxu0 }
 0x372   : > { %v2639_v26 = vadd.f32 %v2638_v14, %v2355_v11  ;;  %v2643_v21 = vadd.f32 %v2644_v12, %v2625_v20  ;;  %v2146_v24 = vpop.f32.mrb[43].mxu0 }
 0x373   : > { %v2641_v30 = vadd.f32 %v2640_v16, %v2355_v11  ;;  %v2645_v34 = vadd.f32 %v2644_v12, %v2146_v24 }
 0x374   : > { %v2184_v38 = vmax.f32 %v2639_v26, 0.0  ;;  %v2185_v42 = vmax.f32 %v2643_v21, 0.0 }
 0x375   : > { %v2182_v47 = vmax.f32 %v2641_v30, 0.0  ;;  %v2183_v43 = vmax.f32 %v2645_v34, 0.0 }
 0x376   : > { %2192 = vst [vmem:[%s491_s14 + $0x10] sm:$0xff] %v2184_v38  ;;  %2193 = vst [vmem:[%s491_s14 + $0x18] sm:$0xff] %v2185_v42 }
 0x377   : > { %2190 = vst [vmem:[%s491_s14] sm:$0xff] %v2182_v47  ;;  %2191 = vst [vmem:[%s491_s14 + $0x8] sm:$0xff] %v2183_v43  ;;  %v2628_v44 = vpop.f32.mrb[44].mxu0 }
 0x378   : > { %v2647_v48 = vadd.f32 %v2644_v12, %v2628_v44  ;;  %v2159_v50 = vpop.f32.mrb[45].mxu0 }
 0x379   : > { %v2649_v51 = vadd.f32 %v2644_v12, %v2159_v50  ;;  %v2629_v54 = vpop.f32.mrb[46].mxu0 }
 0x37a   : > { %v2188_v49 = vmax.f32 %v2647_v48, 0.0  ;;  %v2651_v1 = vadd.f32 %v2644_v12, %v2629_v54  ;;  %v2162_v4 = vpop.f32.mrb[47].mxu0 }
 0x37b   : > { %v2186_v5 = vmax.f32 %v2649_v51, 0.0  ;;  %v2653_v8 = vadd.f32 %v2644_v12, %v2162_v4 }
 0x37c   : > { %2196 = vst [vmem:[%s491_s14 + $0x30] sm:$0xff] %v2188_v49  ;;  %v2189_v27 = vmax.f32 %v2651_v1, 0.0 }
 0x37d   : > { %2194 = vst [vmem:[%s491_s14 + $0x20] sm:$0xff] %v2186_v5  ;;  %v2187_v37 = vmax.f32 %v2653_v8, 0.0 }
 0x37e   : > { %2197 = vst [vmem:[%s491_s14 + $0x38] sm:$0xff] %v2189_v27 }
 0x37f   : > { %2195 = vst [vmem:[%s491_s14 + $0x28] sm:$0xff] %v2187_v37 }
 0x380 PF: > { %p16_p9 = scmp.ge.s32.totalorder %s2863_s13, 4   ;;  %s3501_s30 = smov %s2789_s10 }
 0x381   : > { %s3502_s10 = smov %s2872_s16  ;;  %s3503_s11 = smov %s2863_s13 }
 0x382   :  { %18 = sbr.rel (!%p16_p9) target bundleno = 2 (0x2), region = 135 }

// kernel: shared_module_bh_forward.15
= control target key start
LH: loop header
LB: loop body
LE: loop exit
PB: predicated region body
PF: predicated region fallthrough
CT: control target
= control target key end

     0   :  { %s2760_s30 = smov 0   ;;  %s3219_s0 = inlined_call_operand.vmem [shape: f32[2,8,8,128], index: 0, kind: input, shape index: {}]   ;;  %s3220_s1 = inlined_call_operand.vmem [shape: bf16[128,64], index: 1, kind: input, shape index: {}]   ;;  %s3221_s2 = inlined_call_operand.vmem [shape: f32[1,64], index: 2, kind: input, shape index: {}]   ;;  %s3222_s3 = inlined_call_operand.vmem [shape: bf16[576,64], index: 3, kind: input, shape index: {}]   ;;  %s3223_s4 = inlined_call_operand.vmem [shape: f32[1,64], index: 4, kind: input, shape index: {}]   ;;  %s3224_s5 = inlined_call_operand.vmem [shape: bf16[64,256], index: 5, kind: input, shape index: {}]   ;;  %s3225_s6 = inlined_call_operand.vmem [shape: f32[1,256], index: 6, kind: input, shape index: {}]   ;;  %s3226_s7 = inlined_call_operand.vmem [shape: bf16[128,256], index: 7, kind: input, shape index: {}]   ;;  %s3227_s8 = inlined_call_operand.vmem [shape: f32[1,256], index: 8, kind: input, shape index: {}]   ;;  %s3228_s9 = inlined_call_operand.vmem [shape: f32[2,64,256], index: 9, kind: output, shape index: {}]  }
   0x1 LB: > { %s2123_s10 = sadd.s32 4294967295, %s2706_s30   ;;  %p2127_p0 = scmp.ge.s32.totalorder %s2706_s30, 1  ;;  %s2706_s30 = sphi %s2760_s30, %s19_s30  }
   0x2   : > { %p287_p1 = scmp.lt.s32.totalorder %s2706_s30, 3 }
   0x4   : > { %p288_p2 = pnand %p2127_p0, %p287_p1 }
   0x5   : > { %v2620_v0 = vld [vmem:[%s3220_s1] sm:$0xff] (!%p288_p2)   ;;  %p323_p3 = scmp.lt.s32.totalorder (!%p288_p2), %s2123_s10, 1  ;;  %v2621_v1 = vld [vmem:[%s3220_s1 + $0x8] sm:$0xff] (!%p288_p2)   ;;  %v2622_v2 = vld [vmem:[%s3220_s1 + $0x10] sm:$0xff] (!%p288_p2)   ;;  %vm490_vm0 = vcmask (!%p288_p2), 523264   ;;  %vm492_vm1 = vcmask (!%p288_p2), 517120  }
   0x6   : > { %291 = sbr.rel (%p288_p2) target bundleno = 847 (0x34f), region = 56  ;;  %2330 = vmatprep.subr.bf16.mxu0 (!%p288_p2), %v2620_v0  ;;  %v2623_v3 = vld [vmem:[%s3220_s1 + $0x18] sm:$0xff] (!%p288_p2)   ;;  %v2624_v7 = vld [vmem:[%s3220_s1 + $0x20] sm:$0xff] (!%p288_p2)   ;;  %v2625_v8 = vld [vmem:[%s3220_s1 + $0x28] sm:$0xff] (!%p288_p2)   ;;  %v2708_v22 = vmov (!%p288_p2), 0.0  }
   0x7   : > { %2331 = vmatpush3.bf16.msra.mxu0 (!%p288_p2), %v2620_v0  ;;  %v2626_v9 = vld [vmem:[%s3220_s1 + $0x30] sm:$0xff] (!%p288_p2)   ;;  %v2627_v10 = vld [vmem:[%s3220_s1 + $0x38] sm:$0xff] (!%p288_p2)   ;;  %v2628_v20 = vld [vmem:[%s3222_s3] sm:$0xff] (!%p288_p2)   ;;  %498 = vst.msk [vmem:[#allocation2 + $0x30] sm:$0xff] (!%p288_p2), %vm490_vm0, %v2708_v22 }
   0x8   : > { %2332 = vmatprep.subr.bf16.mxu0 (!%p288_p2), %v2621_v1  ;;  %v2629_v21 = vld [vmem:[%s3222_s3 + $0x20] sm:$0xff] (!%p288_p2)   ;;  %2370 = vmatprep.subr.bf16.mxu1 (!%p288_p2), %v2628_v20  ;;  %499 = vst.msk [vmem:[#allocation2 + $0x38] sm:$0x3] (!%p288_p2), %vm492_vm1, %v2708_v22  ;;  %493 = vst.msk [vmem:[#allocation2 + $0x8] sm:$0x3] (!%p288_p2), %vm492_vm1, %v2708_v22  ;;  %v2630_v23 = vld [vmem:[%s3222_s3 + $0x8] sm:$0xff] (!%p288_p2)  }
   0x9   : > { %2371 = vmatpush3.bf16.msra.mxu1 (!%p288_p2), %v2628_v20  ;;  %491 = vst.msk [vmem:[#allocation2] sm:$0xff] (!%p288_p2), %vm490_vm0, %v2708_v22  ;;  %494 = vst.msk [vmem:[#allocation2 + $0x10] sm:$0xff] (!%p288_p2), %vm490_vm0, %v2708_v22  ;;  %v2631_v24 = vld [vmem:[%s3222_s3 + $0x28] sm:$0xff] (!%p288_p2)   ;;  %v2632_v25 = vld [vmem:[%s3222_s3 + $0x10] sm:$0xff] (!%p288_p2)  }
   0xa   : > { %495 = vst.msk [vmem:[#allocation2 + $0x18] sm:$0x3] (!%p288_p2), %vm492_vm1, %v2708_v22  ;;  %497 = vst.msk [vmem:[#allocation2 + $0x28] sm:$0x3] (!%p288_p2), %vm492_vm1, %v2708_v22  ;;  %2372 = vmatprep.subr.bf16.mxu1 (!%p288_p2), %v2630_v23  ;;  %v2633_v26 = vld [vmem:[%s3222_s3 + $0x30] sm:$0xff] (!%p288_p2)   ;;  %v2634_v27 = vld [vmem:[%s3222_s3 + $0x18] sm:$0xff] (!%p288_p2)  }
   0xb   : > { %2333 = vmatpush3.bf16.msra.mxu0 (!%p288_p2), %v2621_v1  ;;  %496 = vst.msk [vmem:[#allocation2 + $0x20] sm:$0xff] (!%p288_p2), %vm490_vm0, %v2708_v22  ;;  %500 = vst.msk [vmem:[#allocation2 + $0x40] sm:$0xff] (!%p288_p2), %vm490_vm0, %v2708_v22  ;;  %v2635_v28 = vld [vmem:[%s3222_s3 + $0x38] sm:$0xff] (!%p288_p2)   ;;  %v2636_v29 = vld [vmem:[%s3222_s3 + $0x40] sm:$0xff] (!%p288_p2)  }
   0xc   : > { %2334 = vmatprep.subr.bf16.mxu0 (!%p288_p2), %v2622_v2  ;;  %501 = vst.msk [vmem:[#allocation2 + $0x48] sm:$0x3] (!%p288_p2), %vm492_vm1, %v2708_v22  ;;  %503 = vst.msk [vmem:[#allocation2 + $0x58] sm:$0x3] (!%p288_p2), %vm492_vm1, %v2708_v22  ;;  %v2132_v30 = vld [vmem:[%s3221_s2] ss:$0 sm:$0xff] (!%p288_p2) }
   0xd   : > { %s3230_s10 = smov (!%p323_p3, %s2123_s10), 1  ;;  %502 = vst.msk [vmem:[#allocation2 + $0x50] sm:$0xff] %vm490_vm0, %v2708_v22  ;;  %504 = vst.msk [vmem:[#allocation2 + $0x60] sm:$0xff] %vm490_vm0, %v2708_v22  ;;  %2373 = vmatpush3.bf16.msra.mxu1 %v2630_v23  ;;  %v2639_v23 = vld [vmem:[%s3222_s3 + $0x58] sm:$0xff]  }
   0xe   : > { %s2244_s17 = sshll.u32 %s3230_s10, 6  ;;  %505 = vst.msk [vmem:[#allocation2 + $0x68] sm:$0x3] %vm492_vm1, %v2708_v22  ;;  %507 = vst.msk [vmem:[#allocation2 + $0x78] sm:$0x3] %vm492_vm1, %v2708_v22  ;;  %2374 = vmatprep.subr.bf16.mxu1 %v2632_v25  ;;  %s2245_s26 = sshll.u32 %s3230_s10, 7 }
   0xf   : > { %s327_s20 = scalar_lea.vmem %s3219_s0, %s2244_s17  ;;  %2335 = vmatpush3.bf16.msra.mxu0 %v2622_v2  ;;  %506 = vst.msk [vmem:[#allocation2 + $0x70] sm:$0xff] %vm490_vm0, %v2708_v22  ;;  %508 = vst.msk [vmem:[#allocation2 + $0x80] sm:$0xff] %vm490_vm0, %v2708_v22  ;;  %s3198_s29 = scalar_lea.vmem %s3228_s9, %s2245_s26 }
  0x10   : > { %v334_v4 = vld [vmem:[%s327_s20] sm:$0xff]  ;;  %v335_v5 = vld [vmem:[%s327_s20 + $0x8] sm:$0xff]  ;;  %2336 = vmatprep.subr.bf16.mxu0 %v2623_v3  ;;  %v336_v11 = vld [vmem:[%s327_s20 + $0x10] sm:$0xff]  ;;  %509 = vst.msk [vmem:[#allocation2 + $0x88] sm:$0x3] %vm492_vm1, %v2708_v22 }
  0x11   : > { %v2786_v6 = vpack.c.bf16 %v335_v5, %v334_v4  ;;  %v337_v12 = vld [vmem:[%s327_s20 + $0x18] sm:$0xff]  ;;  %v338_v13 = vld [vmem:[%s327_s20 + $0x20] sm:$0xff]  ;;  %v339_v14 = vld [vmem:[%s327_s20 + $0x28] sm:$0xff]  ;;  %510 = vst.msk [vmem:[#allocation2 + $0x90] sm:$0xff] %vm490_vm0, %v2708_v22  ;;  %2375 = vmatpush3.bf16.msra.mxu1 %v2632_v25 }
  0x12   : > { %v2801_v15 = vpack.c.bf16 %v337_v12, %v336_v11  ;;  %v2803_v16 = vpack.c.bf16 %v339_v14, %v338_v13  ;;  %v340_v17 = vld [vmem:[%s327_s20 + $0x30] sm:$0xff]  ;;  %v341_v18 = vld [vmem:[%s327_s20 + $0x38] sm:$0xff]  ;;  %511 = vst.msk [vmem:[#allocation2 + $0x98] sm:$0x3] %vm492_vm1, %v2708_v22  ;;  %2376 = vmatprep.subr.bf16.mxu1 %v2634_v27  ;;  %v541_v51 = vld [vmem:[#allocation2 + $0x1] sm:$0xff] }
  0x13   : > { %2346 = vmatprep.mubr.bf16.mxu0 %v2786_v6  ;;  %2337 = vmatpush3.bf16.msra.mxu0 %v2623_v3  ;;  %v2807_v19 = vpack.c.bf16 %v341_v18, %v340_v17  ;;  %v521_v52 = vld [vmem:[#allocation2] sm:$0xff]  ;;  %v2637_v3 = vld [vmem:[%s3222_s3 + $0x48] sm:$0xff]   ;;  %v2638_v5 = vld [vmem:[%s3222_s3 + $0x50] sm:$0xff]  }
  0x14   : > { %2338 = vmatprep.subr.bf16.mxu0 %v2624_v7  ;;  %v763_v13 = vld [vmem:[#allocation2 + $0x2] sm:$0xff] }
  0x15   : > { %2377 = vmatpush3.bf16.msra.mxu1 %v2634_v27  ;;  %v2640_v25 = vld [vmem:[%s3222_s3 + $0x60] sm:$0xff]  }
  0x16   : > { %2386 = vmatprep.subr.bf16.mxu1 %v2636_v29 }
  0x17   : > { %2339 = vmatpush3.bf16.msra.mxu0 %v2624_v7 }
  0x18   : > { %2340 = vmatprep.subr.bf16.mxu0 %v2625_v8 }
  0x1b   : > { %2341 = vmatpush3.bf16.msra.mxu0 %v2625_v8 }
  0x1c   : > { %2342 = vmatprep.subr.bf16.mxu0 %v2626_v9 }
  0x1f   : > { %2343 = vmatpush3.bf16.msra.mxu0 %v2626_v9 }
  0x20   : > { %2344 = vmatprep.subr.bf16.mxu0 %v2627_v10 }
  0x23   : > { %2345 = vmatpush3.bf16.msra.mxu0 %v2627_v10 }
  0x24   : > { %2354 = vmatprep.subr.bf16.mxu0 %v2629_v21 }
  0x26   : > { %2347 = vmatmul.mubr.bf16.vlgmr.msra.gmra.mrb[0].mxu0 %v2801_v15 }
  0x27   : > { %2350 = vmatprep.mubr.bf16.mxu0 %v2803_v16  ;;  %2355 = vmatpush3.bf16.msra.mxu0 %v2629_v21 }
  0x28   : > { %2356 = vmatprep.subr.bf16.mxu0 %v2631_v24 }
  0x2b   : > { %2357 = vmatpush3.bf16.msra.mxu0 %v2631_v24 }
  0x2c   : > { %2358 = vmatprep.subr.bf16.mxu0 %v2633_v26 }
  0x2e   : > { %2351 = vmatmul.mubr.bf16.gmra.mrb[4].mxu0 %v2807_v19 }
  0x2f   : > { %2359 = vmatpush3.bf16.msra.mxu0 %v2633_v26 }
  0x30   : > { %2360 = vmatprep.subr.bf16.mxu0 %v2635_v28 }
  0x33   : > { %2361 = vmatpush3.bf16.msra.mxu0 %v2635_v28 }
  0xf9   : > { %v2348_v31 = vpop.f32.mrb[0].mxu0 }
  0xfa   : > { %v460_v32 = vadd.f32 %v2348_v31, %v2132_v30  ;;  %v451_v33 = vpop.f32.mrb[1].mxu0  ;;  %v2641_v31 = vld [vmem:[%s3222_s3 + $0x68] sm:$0xff]  }
  0xfb   : > { %v452_v34 = vadd.f32 %v2132_v30, %v451_v33  ;;  %v2349_v35 = vpop.f32.mrb[2].mxu0  ;;  %v2642_v33 = vld [vmem:[%s3222_s3 + $0x70] sm:$0xff]  }
  0xfc   : > { %v484_v36 = vmax.f32 %v460_v32, 0.0  ;;  %v463_v37 = vadd.f32 %v2349_v35, %v2132_v30  ;;  %v454_v38 = vpop.f32.mrb[3].mxu0 }
  0xfd   : > { %v482_v39 = vmax.f32 %v452_v34, 0.0  ;;  %v455_v40 = vadd.f32 %v2132_v30, %v454_v38 }
  0xfe   : > { %515 = vst.msk [vmem:[#allocation2 + $0x31] sm:$0xff] %vm490_vm0, %v484_v36  ;;  %v485_v41 = vmax.f32 %v463_v37, 0.0  ;;  %v2643_v37 = vld [vmem:[%s3222_s3 + $0x78] sm:$0xff]  }
  0xff   : > { %513 = vst.msk [vmem:[#allocation2 + $0x11] sm:$0xff] %vm490_vm0, %v482_v39  ;;  %v483_v42 = vmax.f32 %v455_v40, 0.0  ;;  %v2644_v39 = vld [vmem:[%s3222_s3 + $0x80] sm:$0xff]  }
 0x100   : > { %516 = vst.msk [vmem:[#allocation2 + $0x41] sm:$0xff] %vm490_vm0, %v485_v41  ;;  %v2645_v41 = vld [vmem:[%s3222_s3 + $0x88] sm:$0xff]  }
 0x101   : > { %514 = vst.msk [vmem:[#allocation2 + $0x21] sm:$0xff] %vm490_vm0, %v483_v42  ;;  %v2352_v43 = vpop.f32.mrb[4].mxu0 }
 0x102   : > { %v476_v44 = vadd.f32 %v2352_v43, %v2132_v30  ;;  %v467_v45 = vpop.f32.mrb[5].mxu0  ;;  %v2646_v43 = vld [vmem:[%s3222_s3 + $0x90] sm:$0xff]  }
 0x103   : > { %v468_v46 = vadd.f32 %v2132_v30, %v467_v45  ;;  %v2353_v47 = vpop.f32.mrb[6].mxu0 }
 0x104   : > { %v488_v48 = vmax.f32 %v476_v44, 0.0  ;;  %v479_v49 = vadd.f32 %v2353_v47, %v2132_v30  ;;  %v470_v50 = vpop.f32.mrb[7].mxu0 }
 0x105   : > { %v486_v53 = vmax.f32 %v468_v46, 0.0  ;;  %v471_v54 = vadd.f32 %v2132_v30, %v470_v50  ;;  %v2872_v61 = vld [vmem:[#allocation2 + $0x31] sm:$0xff]  ;;  %v2649_v50 = vld [vmem:[%s3222_s3 + $0xa8] sm:$0xff]  }
 0x106   : > { %519 = vst.msk [vmem:[#allocation2 + $0x71] sm:$0xff] %vm490_vm0, %v488_v48  ;;  %v489_v55 = vmax.f32 %v479_v49, 0.0  ;;  %v2865_v56 = vld [vmem:[#allocation2 + $0x11] sm:$0xff]  ;;  %v2648_v48 = vld [vmem:[%s3222_s3 + $0xa0] sm:$0xff]  }
 0x107   : > { %v2867_v57 = vld [vmem:[#allocation2 + $0x10] sm:$0xff]  ;;  %517 = vst.msk [vmem:[#allocation2 + $0x51] sm:$0xff] %vm490_vm0, %v486_v53  ;;  %v487_v58 = vmax.f32 %v471_v54, 0.0  ;;  %v549_v59 = vpack.c.bf16 %v2865_v56, %v541_v51  ;;  %v2899_v4 = vld [vmem:[#allocation2 + $0x41] sm:$0xff]  ;;  %v2647_v46 = vld [vmem:[%s3222_s3 + $0x98] sm:$0xff]  }
 0x108   : > { %v529_v60 = vpack.c.bf16 %v2867_v57, %v521_v52  ;;  %520 = vst.msk [vmem:[#allocation2 + $0x81] sm:$0xff] %vm490_vm0, %v489_v55  ;;  %v2875_v62 = vld [vmem:[#allocation2 + $0x21] sm:$0xff]  ;;  %v2879_v0 = vld [vmem:[#allocation2 + $0x30] sm:$0xff]  ;;  %v1030_v49 = vpack.c.bf16 %v2899_v4, %v2872_v61  ;;  %v2651_v55 = vld [vmem:[%s3222_s3 + $0xb8] sm:$0xff]  }
 0x109   : > { %v2877_v63 = vld [vmem:[#allocation2 + $0x20] sm:$0xff]  ;;  %518 = vst.msk [vmem:[#allocation2 + $0x61] sm:$0xff] %vm490_vm0, %v487_v58  ;;  %2362 = vmatprep.mubr.msk.bf16.mxu0 %vm490_vm0, %v549_v59  ;;  %v2886_v1 = vpack.c.bf16 %v2872_v61, %v2875_v62  ;;  %v2914_v14 = vld [vmem:[#allocation2 + $0x12] sm:$0xff]  ;;  %v1029_v47 = vpack.c.bf16 %v2875_v62, %v2865_v56  ;;  %v2653_v59 = vld [vmem:[%s3222_s3 + $0xc8] sm:$0xff]  }
 0x10a   : > { %2378 = vmatprep.mubr.msk.bf16.mxu1 %vm490_vm0, %v529_v60  ;;  %v2890_v2 = vpack.c.bf16 %v2879_v0, %v2877_v63  ;;  %v525_v8 = vld [vmem:[#allocation2 + $0x40] sm:$0xff]  ;;  %v771_v24 = vpack.c.bf16 %v2914_v14, %v763_v13  ;;  %v2944_v28 = vld [vmem:[#allocation2 + $0x32] sm:$0xff]  ;;  %v900_v38 = vpack.c.bf16 %v2877_v63, %v2867_v57 }
 0x10b   : > { %2363 = vmatmul.mubr.msk.bf16.vlgmr.msra.gmra.mrb[8].mxu0 %vm490_vm0, %v2886_v1  ;;  %v2940_v26 = vld [vmem:[#allocation2 + $0x22] sm:$0xff]  ;;  %v901_v40 = vpack.c.bf16 %v525_v8, %v2879_v0  ;;  %v2650_v52 = vld [vmem:[%s3222_s3 + $0xb0] sm:$0xff]   ;;  %v2655_v0 = vld [vmem:[%s3222_s3 + $0xd8] sm:$0xff]  }
 0x10c   : > { %2379 = vmatmul.mubr.msk.bf16.vlgmr.msra.gmra.mrb[0].mxu1 %vm490_vm0, %v2890_v2  ;;  %v2950_v30 = vld [vmem:[#allocation2 + $0x42] sm:$0xff]  ;;  %v1158_v56 = vpack.c.bf16 %v2940_v26, %v2914_v14  ;;  %v2654_v61 = vld [vmem:[%s3222_s3 + $0xd0] sm:$0xff]  }
 0x10d   : > { %2387 = vmatpush3.bf16.msra.mxu1 %v2636_v29  ;;  %v2912_v12 = vld [vmem:[#allocation2 + $0x71] sm:$0xff]  ;;  %v2948_v29 = vpack.c.bf16 %v2944_v28, %v2940_v26  ;;  %v2652_v57 = vld [vmem:[%s3222_s3 + $0xc0] sm:$0xff]   ;;  %v1159_v58 = vpack.c.bf16 %v2950_v30, %v2944_v28 }
 0x10e   : > { %2388 = vmatprep.subr.bf16.mxu1 %v2637_v3  ;;  %v2904_v7 = vld [vmem:[#allocation2 + $0x51] sm:$0xff]  ;;  %v2666_v13 = vld [vmem:[%s3226_s7 + $0x4] ss:$8 sps:$4 sm:$0xff]  }
 0x10f   : > { %v526_v9 = vld [vmem:[#allocation2 + $0x50] sm:$0xff]  ;;  %v2908_v10 = vpack.c.bf16 %v2904_v7, %v2899_v4  ;;  %v2991_v44 = vld [vmem:[#allocation2 + $0x80] sm:$0xff]  ;;  %v2657_v4 = vld [vmem:[%s3222_s3 + $0xe8] sm:$0xff]   ;;  %1802 = vmatprep.subr.bf16.mxu0 %v2666_v13 }
 0x110   : > { %v2910_v11 = vpack.c.bf16 %v526_v9, %v525_v8  ;;  %v2916_v17 = vld [vmem:[#allocation2 + $0x61] sm:$0xff]  ;;  %v528_v20 = vld [vmem:[#allocation2 + $0x70] sm:$0xff]  ;;  %v2659_v8 = vld [vmem:[%s3222_s3 + $0xf8] sm:$0xff]  }
 0x111   : > { %2389 = vmatpush3.bf16.msra.mxu1 %v2637_v3  ;;  %v527_v18 = vld [vmem:[#allocation2 + $0x60] sm:$0xff]  ;;  %2366 = vmatprep.mubr.msk.bf16.mxu0 %vm490_vm0, %v2908_v10  ;;  %v2924_v21 = vpack.c.bf16 %v2912_v12, %v2916_v17  ;;  %v2942_v27 = vld [vmem:[#allocation2 + $0x52] sm:$0xff]  ;;  %v903_v45 = vpack.c.bf16 %v2991_v44, %v528_v20  ;;  %v1031_v51 = vpack.c.bf16 %v2916_v17, %v2904_v7 }
 0x112   : > { %2382 = vmatprep.mubr.msk.bf16.mxu1 %vm490_vm0, %v2910_v11  ;;  %v2926_v22 = vpack.c.bf16 %v528_v20, %v527_v18  ;;  %2390 = vmatprep.subr.bf16.mxu1 %v2638_v5  ;;  %v2957_v32 = vpack.c.bf16 %v2942_v27, %v2950_v30  ;;  %v769_v34 = vld [vmem:[#allocation2 + $0x62] sm:$0xff]  ;;  %v2966_v35 = vld [vmem:[#allocation2 + $0x72] sm:$0xff]  ;;  %v902_v42 = vpack.c.bf16 %v527_v18, %v526_v9  ;;  %v2709_v20 = vmov 0  }
 0x113   : > { %2367 = vmatmul.mubr.msk.bf16.gmra.mrb[12].mxu0 %vm490_vm0, %v2924_v21  ;;  %v2969_v36 = vpack.c.bf16 %v2966_v35, %v769_v34  ;;  %v3016_v53 = vld [vmem:[#allocation2 + $0x81] sm:$0xff]  ;;  %v1160_v60 = vpack.c.bf16 %v769_v34, %v2942_v27  ;;  %v2662_v14 = vld [vmem:[%s3222_s3 + $0x110] sm:$0xff]  }
 0x114   : > { %2383 = vmatmul.mubr.msk.bf16.gmra.mrb[4].mxu1 %vm490_vm0, %v2926_v22  ;;  %v1032_v54 = vpack.c.bf16 %v3016_v53, %v2912_v12  ;;  %v3041_v62 = vld [vmem:[#allocation2 + $0x82] sm:$0xff]  ;;  %v2667_v17 = vld [vmem:[%s3226_s7 + $0x10] ss:$8 sps:$4 sm:$0xff]   ;;  %1834 = vmatprep.mubr.bf16.mxu0 %v2709_v20  ;;  %v2681_v28 = vld [vmem:[%s3226_s7 + $0x54] ss:$8 sps:$4 sm:$0xff]  }
 0x115   : > { %2391 = vmatpush3.bf16.msra.mxu1 %v2638_v5  ;;  %2394 = vmatprep.mubr.msk.bf16.mxu1 %vm490_vm0, %v771_v24  ;;  %v1161_v63 = vpack.c.bf16 %v3041_v62, %v2966_v35  ;;  %v2656_v3 = vld [vmem:[%s3222_s3 + $0xe0] sm:$0xff]   ;;  %v1287_v5 = vld [vmem:[#allocation2 + $0x90] sm:$0xff] }
 0x116   : > { %2392 = vmatprep.subr.bf16.mxu1 %v2639_v23  ;;  %v1291_v7 = vpack.c.bf16 %v1287_v5, %v2991_v44  ;;  %v2660_v9 = vld [vmem:[%s3222_s3 + $0x100] sm:$0xff]   ;;  %v1416_v18 = vld [vmem:[#allocation2 + $0x91] sm:$0xff] }
 0x117   : > { %v2664_v12 = vld [vmem:[%s3226_s7] ss:$8 sps:$4 sm:$0xff]   ;;  %v2675_v24 = vld [vmem:[%s3226_s7 + $0x34] ss:$8 sps:$4 sm:$0xff]   ;;  %v2678_v26 = vld [vmem:[%s3226_s7 + $0x44] ss:$8 sps:$4 sm:$0xff]  }
 0x118   : > { %1803 = vmatpush1.bf16.msra.mxu0 %v2664_v12  ;;  %v2676_v27 = vld [vmem:[%s3226_s7 + $0x40] ss:$8 sps:$4 sm:$0xff]   ;;  %v1545_v30 = vld [vmem:[#allocation2 + $0x92] sm:$0xff] }
 0x119   : > { %2393 = vmatpush3.bf16.msra.mxu1 %v2639_v23  ;;  %v2670_v23 = vld [vmem:[%s3226_s7 + $0x20] ss:$8 sps:$4 sm:$0xff]   ;;  %v2687_v34 = vld [vmem:[%s3226_s7 + $0x74] ss:$8 sps:$4 sm:$0xff]   ;;  %v2685_v35 = vld [vmem:[%s3226_s7 + $0x70] ss:$8 sps:$4 sm:$0xff]  }
 0x11a   : > { %2402 = vmatprep.subr.bf16.mxu1 %v2640_v25 }
 0x11c   : > { %2395 = vmatmul.mubr.msk.bf16.vlgmr.msra.gmra.mrb[0].mxu1 %vm490_vm0, %v2948_v29 }
 0x11d   : > { %2403 = vmatpush3.bf16.msra.mxu1 %v2640_v25  ;;  %2398 = vmatprep.mubr.msk.bf16.mxu1 %vm490_vm0, %v2957_v32  ;;  %v2673_v25 = vld [vmem:[%s3226_s7 + $0x30] ss:$8 sps:$4 sm:$0xff]  }
 0x11e   : > { %2404 = vmatprep.subr.bf16.mxu1 %v2641_v31 }
 0x121   : > { %2405 = vmatpush3.bf16.msra.mxu1 %v2641_v31  ;;  %v2684_v31 = vld [vmem:[%s3226_s7 + $0x64] ss:$8 sps:$4 sm:$0xff]  }
 0x122   : > { %2406 = vmatprep.subr.bf16.mxu1 %v2642_v33 }
 0x124   : > { %2399 = vmatmul.mubr.msk.bf16.gmra.mrb[4].mxu1 %vm490_vm0, %v2969_v36 }
 0x125   : > { %2407 = vmatpush3.bf16.msra.mxu1 %v2642_v33  ;;  %2410 = vmatprep.mubr.msk.bf16.mxu1 %vm490_vm0, %v900_v38  ;;  %v1549_v33 = vpack.c.bf16 %v1545_v30, %v3041_v62  ;;  %v2693_v38 = vld [vmem:[%s3224_s5 + $0x14] ss:$8 sps:$4 sm:$0xff]   ;;  %v1883_v30 = vld [vmem:[%s3225_s6] sm:$0x3] }
 0x126   : > { %2408 = vmatprep.subr.bf16.mxu1 %v2643_v37 }
 0x129   : > { %2409 = vmatpush3.bf16.msra.mxu1 %v2643_v37  ;;  %v2688_v37 = vld [vmem:[%s3224_s5] ss:$8 sps:$4 sm:$0xff]  }
 0x12a   : > { %2418 = vmatprep.subr.bf16.mxu1 %v2644_v39 }
 0x12c   : > { %2411 = vmatmul.mubr.msk.bf16.vlgmr.msra.gmra.mrb[0].mxu1 %vm490_vm0, %v901_v40  ;;  %v2696_v40 = vld [vmem:[%s3224_s5 + $0x24] ss:$8 sps:$4 sm:$0xff]  }
 0x12d   : > { %2419 = vmatpush3.bf16.msra.mxu1 %v2644_v39  ;;  %2414 = vmatprep.mubr.msk.bf16.mxu1 %vm490_vm0, %v902_v42  ;;  %v2691_v39 = vld [vmem:[%s3224_s5 + $0x10] ss:$8 sps:$4 sm:$0xff]  }
 0x12e   : > { %2420 = vmatprep.subr.bf16.mxu1 %v2645_v41  ;;  %v2697_v42 = vld [vmem:[%s3224_s5 + $0x30] ss:$8 sps:$4 sm:$0xff]  }
 0x131   : > { %2421 = vmatpush3.bf16.msra.mxu1 %v2645_v41  ;;  %v2694_v41 = vld [vmem:[%s3224_s5 + $0x20] ss:$8 sps:$4 sm:$0xff]  }
 0x132   : > { %2422 = vmatprep.subr.bf16.mxu1 %v2646_v43 }
 0x134   : > { %2415 = vmatmul.mubr.msk.bf16.gmra.mrb[4].mxu1 %vm490_vm0, %v903_v45 }
 0x135   : > { %2423 = vmatpush3.bf16.msra.mxu1 %v2646_v43  ;;  %2426 = vmatprep.mubr.msk.bf16.mxu1 %vm490_vm0, %v1029_v47 }
 0x136   : > { %2424 = vmatprep.subr.bf16.mxu1 %v2647_v46 }
 0x139   : > { %2425 = vmatpush3.bf16.msra.mxu1 %v2647_v46 }
 0x13a   : > { %2434 = vmatprep.subr.bf16.mxu1 %v2648_v48 }
 0x13c   : > { %2427 = vmatmul.mubr.msk.bf16.vlgmr.msra.gmra.mrb[0].mxu1 %vm490_vm0, %v1030_v49  ;;  %v2213_v49 = vld [vmem:[%s3223_s4] ss:$0 sm:$0xff] }
 0x13d   : > { %2435 = vmatpush3.bf16.msra.mxu1 %v2648_v48  ;;  %2430 = vmatprep.mubr.msk.bf16.mxu1 %vm490_vm0, %v1031_v51 }
 0x13e   : > { %2436 = vmatprep.subr.bf16.mxu1 %v2649_v50 }
 0x141   : > { %2437 = vmatpush3.bf16.msra.mxu1 %v2649_v50 }
 0x142   : > { %2438 = vmatprep.subr.bf16.mxu1 %v2650_v52 }
 0x144   : > { %2431 = vmatmul.mubr.msk.bf16.gmra.mrb[4].mxu1 %vm490_vm0, %v1032_v54 }
 0x145   : > { %2439 = vmatpush3.bf16.msra.mxu1 %v2650_v52  ;;  %2442 = vmatprep.mubr.msk.bf16.mxu1 %vm490_vm0, %v1158_v56 }
 0x146   : > { %2440 = vmatprep.subr.bf16.mxu1 %v2651_v55 }
 0x149   : > { %2441 = vmatpush3.bf16.msra.mxu1 %v2651_v55 }
 0x14a   : > { %2450 = vmatprep.subr.bf16.mxu1 %v2652_v57 }
 0x14c   : > { %2443 = vmatmul.mubr.msk.bf16.vlgmr.msra.gmra.mrb[0].mxu1 %vm490_vm0, %v1159_v58 }
 0x14d   : > { %2451 = vmatpush3.bf16.msra.mxu1 %v2652_v57  ;;  %2446 = vmatprep.mubr.msk.bf16.mxu1 %vm490_vm0, %v1160_v60 }
 0x14e   : > { %2452 = vmatprep.subr.bf16.mxu1 %v2653_v59 }
 0x151   : > { %2453 = vmatpush3.bf16.msra.mxu1 %v2653_v59 }
 0x152   : > { %2454 = vmatprep.subr.bf16.mxu1 %v2654_v61 }
 0x154   : > { %2447 = vmatmul.mubr.msk.bf16.gmra.mrb[4].mxu1 %vm490_vm0, %v1161_v63 }
 0x155   : > { %2455 = vmatpush3.bf16.msra.mxu1 %v2654_v61  ;;  %2458 = vmatprep.mubr.msk.bf16.mxu1 %vm490_vm0, %v2890_v2  ;;  %v2658_v2 = vld [vmem:[%s3222_s3 + $0xf0] sm:$0xff]  }
 0x156   : > { %2456 = vmatprep.subr.bf16.mxu1 %v2655_v0 }
 0x159   : > { %2457 = vmatpush3.bf16.msra.mxu1 %v2655_v0 }
 0x15a   : > { %2466 = vmatprep.subr.bf16.mxu1 %v2656_v3 }
 0x15c   : > { %2459 = vmatmul.mubr.msk.bf16.vlgmr.msra.gmra.mrb[0].mxu1 %vm490_vm0, %v2910_v11  ;;  %v2661_v11 = vld [vmem:[%s3222_s3 + $0x108] sm:$0xff]  }
 0x15d   : > { %2467 = vmatpush3.bf16.msra.mxu1 %v2656_v3  ;;  %2462 = vmatprep.mubr.msk.bf16.mxu1 %vm490_vm0, %v2926_v22  ;;  %v2663_v22 = vld [vmem:[%s3222_s3 + $0x118] sm:$0xff]  }
 0x15e   : > { %2468 = vmatprep.subr.bf16.mxu1 %v2657_v4 }
 0x161   : > { %2469 = vmatpush3.bf16.msra.mxu1 %v2657_v4 }
 0x162   : > { %2470 = vmatprep.subr.bf16.mxu1 %v2658_v2 }
 0x164   : > { %2463 = vmatmul.mubr.msk.bf16.gmra.mrb[4].mxu1 %vm490_vm0, %v1291_v7 }
 0x165   : > { %2471 = vmatpush3.bf16.msra.mxu1 %v2658_v2  ;;  %2474 = vmatprep.mubr.msk.bf16.mxu1 %vm490_vm0, %v2886_v1  ;;  %v2669_v1 = vld [vmem:[%s3226_s7 + $0x14] ss:$8 sps:$4 sm:$0xff]  }
 0x166   : > { %2472 = vmatprep.subr.bf16.mxu1 %v2659_v8  ;;  %1804 = vmatprep.subr.bf16.mxu0 %v2669_v1 }
 0x167   : > { %1805 = vmatpush1.bf16.msra.mxu0 %v2667_v17 }
 0x169   : > { %2473 = vmatpush3.bf16.msra.mxu1 %v2659_v8 }
 0x16a   : > { %2482 = vmatprep.subr.bf16.mxu1 %v2660_v9 }
 0x16c   : > { %2475 = vmatmul.mubr.msk.bf16.vlgmr.msra.gmra.mrb[0].mxu1 %vm490_vm0, %v2908_v10  ;;  %v2672_v10 = vld [vmem:[%s3226_s7 + $0x24] ss:$8 sps:$4 sm:$0xff]  }
 0x16d   : > { %2483 = vmatpush3.bf16.msra.mxu1 %v2660_v9  ;;  %2478 = vmatprep.mubr.msk.bf16.mxu1 %vm490_vm0, %v2924_v21  ;;  %v1420_v21 = vpack.c.bf16 %v1416_v18, %v3016_v53 }
 0x16e   : > { %2484 = vmatprep.subr.bf16.mxu1 %v2661_v11  ;;  %1806 = vmatprep.subr.bf16.mxu0 %v2672_v10 }
 0x16f   : > { %1807 = vmatpush1.bf16.msra.mxu0 %v2670_v23 }
 0x170   : > { %1808 = vmatprep.subr.bf16.mxu0 %v2675_v24 }
 0x171   : > { %2485 = vmatpush3.bf16.msra.mxu1 %v2661_v11 }
 0x172   : > { %2486 = vmatprep.subr.bf16.mxu1 %v2662_v14 }
 0x173   : > { %1809 = vmatpush1.bf16.msra.mxu0 %v2673_v25 }
 0x174   : > { %2479 = vmatmul.mubr.msk.bf16.gmra.mrb[4].mxu1 %vm490_vm0, %v1420_v21  ;;  %1810 = vmatprep.subr.bf16.mxu0 %v2678_v26  ;;  %v1712_v26 = vlaneseq }
 0x175   : > { %2487 = vmatpush3.bf16.msra.mxu1 %v2662_v14  ;;  %2490 = vmatprep.mubr.msk.bf16.mxu1 %vm490_vm0, %v2948_v29  ;;  %v2679_v29 = vld [vmem:[%s3226_s7 + $0x50] ss:$8 sps:$4 sm:$0xff]  }
 0x176   : > { %2488 = vmatprep.subr.bf16.mxu1 %v2663_v22 }
 0x177   : > { %1811 = vmatpush1.bf16.msra.mxu0 %v2676_v27  ;;  %v1713_v27 = vshrl.u32 %v1712_v26, 7 }
 0x178   : > { %1812 = vmatprep.subr.bf16.mxu0 %v2681_v28 }
 0x179   : > { %2489 = vmatpush3.bf16.msra.mxu1 %v2663_v22  ;;  %v1714_v28 = vsub.s32 0, %v1713_v27 }
 0x17b   : > { %1813 = vmatpush1.bf16.msra.mxu0 %v2679_v29  ;;  %v1710_v29 = vld [vmem:[%s3227_s8] sm:$0x3] }
 0x17c   : > { %2491 = vmatmul.mubr.msk.bf16.vlgmr.msra.gmra.mrb[0].mxu1 %vm490_vm0, %v2957_v32  ;;  %v2682_v32 = vld [vmem:[%s3226_s7 + $0x60] ss:$8 sps:$4 sm:$0xff]   ;;  %1814 = vmatprep.subr.bf16.mxu0 %v2684_v31  ;;  %v1718_v31 = vsub.s32 1, %v1713_v27 }
 0x17d   : > { %2494 = vmatprep.mubr.msk.bf16.mxu1 %vm490_vm0, %v2969_v36  ;;  %v2690_v36 = vld [vmem:[%s3224_s5 + $0x4] ss:$8 sps:$4 sm:$0xff]  }
 0x17f   : > { %1815 = vmatpush1.bf16.msra.mxu0 %v2682_v32  ;;  %v1888_v32 = vrot.slane %v1883_v30, %v1714_v28 }
 0x180   : > { %1816 = vmatprep.subr.bf16.mxu0 %v2687_v34  ;;  %v1719_v34 = vrot.slane %v1710_v29, %v1718_v31 }
 0x183   : > { %1817 = vmatpush1.bf16.msra.mxu0 %v2685_v35  ;;  %v1892_v35 = vrot.slane %v1883_v30, %v1718_v31 }
 0x184   : > { %2495 = vmatmul.mubr.msk.bf16.gmra.mrb[4].mxu1 %vm490_vm0, %v1549_v33  ;;  %1947 = vmatprep.subr.bf16.mxu0 %v2690_v36  ;;  %v1715_v33 = vrot.slane %v1710_v29, %v1714_v28 }
 0x186   : > { %1835 = vmatmul.mubr.bf16.vlgmr.msra.gmra.mrb[16].mxu0 %v2786_v6  ;;  %v2699_v6 = vld [vmem:[%s3224_s5 + $0x34] ss:$8 sps:$4 sm:$0xff]   ;;  %v2506_v36 = vadd.f32 %v1888_v32, %v1715_v33 }
 0x187   : > { %1948 = vmatpush1.bf16.msra.mxu0 %v2688_v37  ;;  %1844 = vmatprep.mubr.bf16.mxu0 %v2709_v20 }
 0x188   : > { %1949 = vmatprep.subr.bf16.mxu0 %v2693_v38 }
 0x18b   : > { %1950 = vmatpush1.bf16.msra.mxu0 %v2691_v39 }
 0x18c   : > { %1951 = vmatprep.subr.bf16.mxu0 %v2696_v40 }
 0x18e   : > { %1845 = vmatmul.mubr.bf16.gmra.mrb[20].mxu0 %v2801_v15 }
 0x18f   : > { %1854 = vmatprep.mubr.bf16.mxu0 %v2709_v20  ;;  %1952 = vmatpush1.bf16.msra.mxu0 %v2694_v41 }
 0x190   : > { %1953 = vmatprep.subr.bf16.mxu0 %v2699_v6 }
 0x193   : > { %1954 = vmatpush1.bf16.msra.mxu0 %v2697_v42 }
 0x196   : > { %1855 = vmatmul.mubr.bf16.gmra.mrb[24].mxu0 %v2803_v16 }
 0x197   : > { %1864 = vmatprep.mubr.bf16.mxu0 %v2709_v20 }
 0x19e   : > { %1865 = vmatmul.mubr.bf16.gmra.mrb[28].mxu0 %v2807_v19 }
 0x19f   : > { %1979 = vmatprep.mubr.bf16.mxu0 %v2709_v20 }
 0x1de   : > { %v2364_v15 = vpop.f32.mrb[8].mxu0 }
 0x1df   : > { %v631_v43 = vpop.f32.mrb[9].mxu0 }
 0x1e0   : > { %v2365_v44 = vpop.f32.mrb[10].mxu0 }
 0x1e1   : > { %v634_v16 = vpop.f32.mrb[11].mxu0 }
 0x1e6   : > { %v2368_v45 = vpop.f32.mrb[12].mxu0 }
 0x1e7   : > { %v647_v46 = vpop.f32.mrb[13].mxu0 }
 0x1e8   : > { %v2369_v47 = vpop.f32.mrb[14].mxu0 }
 0x1e9   : > { %v650_v19 = vpop.f32.mrb[15].mxu0 }
 0x24f   : > { %v2492_v48 = vpop.f32.mrb[0].mxu1 }
 0x250   : > { %v2498_v50 = vadd.f32 %v2492_v48, %v2364_v15  ;;  %v1628_v51 = vpop.f32.mrb[1].mxu1 }
 0x251   : > { %v2499_v52 = vadd.f32 %v1628_v51, %v631_v43  ;;  %v2493_v53 = vpop.f32.mrb[2].mxu1 }
 0x252   : > { %v1676_v54 = vadd.f32 %v2498_v50, %v2213_v49  ;;  %v2500_v55 = vadd.f32 %v2493_v53, %v2365_v44  ;;  %v1631_v56 = vpop.f32.mrb[3].mxu1 }
 0x253   : > { %v1674_v57 = vadd.f32 %v2499_v52, %v2213_v49  ;;  %v2501_v58 = vadd.f32 %v1631_v56, %v634_v16 }
 0x254   : > { %v1677_v59 = vadd.f32 %v2500_v55, %v2213_v49  ;;  %v1684_v61 = vmax.f32 %v1676_v54, 0.0 }
 0x255   : > { %v1675_v60 = vadd.f32 %v2501_v58, %v2213_v49  ;;  %v1682_v63 = vmax.f32 %v1674_v57, 0.0 }
 0x256   : > { %v1685_v62 = vmax.f32 %v1677_v59, 0.0 }
 0x257   : > { %v1683_v0 = vmax.f32 %v1675_v60, 0.0  ;;  %v2496_v3 = vpop.f32.mrb[4].mxu1 }
 0x258   : > { %v1691_v4 = vpack.c.bf16 %v1685_v62, %v1684_v61  ;;  %v2502_v2 = vadd.f32 %v2496_v3, %v2368_v45  ;;  %v1644_v5 = vpop.f32.mrb[5].mxu1 }
 0x259   : > { %v1690_v7 = vpack.c.bf16 %v1683_v0, %v1682_v63  ;;  %v2503_v8 = vadd.f32 %v1644_v5, %v647_v46  ;;  %v2497_v9 = vpop.f32.mrb[6].mxu1 }
 0x25a   : > { %v1680_v11 = vadd.f32 %v2502_v2, %v2213_v49  ;;  %v2504_v12 = vadd.f32 %v2497_v9, %v2369_v47  ;;  %v1647_v13 = vpop.f32.mrb[7].mxu1 }
 0x25b   : > { %v1678_v1 = vadd.f32 %v2503_v8, %v2213_v49  ;;  %v2505_v14 = vadd.f32 %v1647_v13, %v650_v19  ;;  %2238 = vmatmul.mubr.msk.bf16.vlgmr.msra.gmra.mrb[16].mxu0 %vm490_vm0, %v1690_v7 }
 0x25c   : > { %v1681_v17 = vadd.f32 %v2504_v12, %v2213_v49  ;;  %1989 = vmatprep.mubr.bf16.mxu0 %v2709_v20  ;;  %v1688_v10 = vmax.f32 %v1680_v11, 0.0 }
 0x25d   : > { %v1679_v18 = vadd.f32 %v2505_v14, %v2213_v49  ;;  %v1686_v22 = vmax.f32 %v1678_v1, 0.0 }
 0x25e   : > { %v1689_v21 = vmax.f32 %v1681_v17, 0.0 }
 0x25f   : > { %v1687_v23 = vmax.f32 %v1679_v18, 0.0 }
 0x260   : > { %v1693_v24 = vpack.c.bf16 %v1689_v21, %v1688_v10 }
 0x261   : > { %v1692_v25 = vpack.c.bf16 %v1687_v23, %v1686_v22 }
 0x263   : > { %2239 = vmatmul.mubr.msk.bf16.gmra.mrb[20].mxu0 %vm490_vm0, %v1691_v4 }
 0x264   : > { %1999 = vmatprep.mubr.bf16.mxu0 %v2709_v20 }
 0x26b   : > { %2240 = vmatmul.mubr.msk.bf16.gmra.mrb[24].mxu0 %vm490_vm0, %v1692_v25 }
 0x26c   : > { %2009 = vmatprep.mubr.bf16.mxu0 %v2709_v20  ;;  %v2508_v20 = vadd.f32 %v1892_v35, %v1719_v34 }
 0x273   : > { %2241 = vmatmul.mubr.msk.bf16.gmra.mrb[28].mxu0 %vm490_vm0, %v1693_v24 }
 0x32e   : > { %v1981_v37 = vpop.f32.mrb[16].mxu0 }
 0x32f   : > { %v2507_v38 = vadd.f32 %v2506_v36, %v1981_v37  ;;  %v1983_v39 = vpop.f32.mrb[17].mxu0 }
 0x330   : > { %v2509_v40 = vadd.f32 %v2508_v20, %v1983_v39  ;;  %v1985_v41 = vpop.f32.mrb[18].mxu0 }
 0x331   : > { %v2036_v6 = vmax.f32 %v2507_v38, 0.0  ;;  %v2511_v42 = vadd.f32 %v2506_v36, %v1985_v41  ;;  %v1987_v15 = vpop.f32.mrb[19].mxu0 }
 0x332   : > { %v2037_v43 = vmax.f32 %v2509_v40, 0.0  ;;  %v2513_v44 = vadd.f32 %v2508_v20, %v1987_v15 }
 0x333   : > { %2052 = vst [vmem:[%s3198_s29] sm:$0xff] %v2036_v6  ;;  %v2038_v16 = vmax.f32 %v2511_v42, 0.0 }
 0x334   : > { %2053 = vst [vmem:[%s3198_s29 + $0x8] sm:$0xff] %v2037_v43  ;;  %v2039_v45 = vmax.f32 %v2513_v44, 0.0 }
 0x335   : > { %2054 = vst [vmem:[%s3198_s29 + $0x10] sm:$0xff] %v2038_v16 }
 0x336   : > { %2055 = vst [vmem:[%s3198_s29 + $0x18] sm:$0xff] %v2039_v45  ;;  %v1991_v46 = vpop.f32.mrb[20].mxu0 }
 0x337   : > { %v2515_v47 = vadd.f32 %v2506_v36, %v1991_v46  ;;  %v1993_v19 = vpop.f32.mrb[21].mxu0 }
 0x338   : > { %v2517_v48 = vadd.f32 %v2508_v20, %v1993_v19  ;;  %v1995_v49 = vpop.f32.mrb[22].mxu0 }
 0x339   : > { %v2040_v50 = vmax.f32 %v2515_v47, 0.0  ;;  %v2519_v51 = vadd.f32 %v2506_v36, %v1995_v49  ;;  %v1997_v52 = vpop.f32.mrb[23].mxu0 }
 0x33a   : > { %v2041_v53 = vmax.f32 %v2517_v48, 0.0  ;;  %v2521_v54 = vadd.f32 %v2508_v20, %v1997_v52 }
 0x33b   : > { %2056 = vst [vmem:[%s3198_s29 + $0x20] sm:$0xff] %v2040_v50  ;;  %v2042_v55 = vmax.f32 %v2519_v51, 0.0 }
 0x33c   : > { %2057 = vst [vmem:[%s3198_s29 + $0x28] sm:$0xff] %v2041_v53  ;;  %v2043_v56 = vmax.f32 %v2521_v54, 0.0 }
 0x33d   : > { %2058 = vst [vmem:[%s3198_s29 + $0x30] sm:$0xff] %v2042_v55 }
 0x33e   : > { %2059 = vst [vmem:[%s3198_s29 + $0x38] sm:$0xff] %v2043_v56  ;;  %v2001_v57 = vpop.f32.mrb[24].mxu0 }
 0x33f   : > { %v2523_v58 = vadd.f32 %v2506_v36, %v2001_v57  ;;  %v2003_v59 = vpop.f32.mrb[25].mxu0 }
 0x340   : > { %v2525_v60 = vadd.f32 %v2508_v20, %v2003_v59  ;;  %v2005_v61 = vpop.f32.mrb[26].mxu0 }
 0x341   : > { %v2044_v62 = vmax.f32 %v2523_v58, 0.0  ;;  %v2527_v63 = vadd.f32 %v2506_v36, %v2005_v61  ;;  %v2007_v0 = vpop.f32.mrb[27].mxu0 }
 0x342   : > { %v2045_v3 = vmax.f32 %v2525_v60, 0.0  ;;  %v2529_v4 = vadd.f32 %v2508_v20, %v2007_v0 }
 0x343   : > { %2060 = vst [vmem:[%s3198_s29 + $0x40] sm:$0xff] %v2044_v62  ;;  %v2046_v2 = vmax.f32 %v2527_v63, 0.0 }
 0x344   : > { %2061 = vst [vmem:[%s3198_s29 + $0x48] sm:$0xff] %v2045_v3  ;;  %v2047_v5 = vmax.f32 %v2529_v4, 0.0 }
 0x345   : > { %2062 = vst [vmem:[%s3198_s29 + $0x50] sm:$0xff] %v2046_v2 }
 0x346   : > { %2063 = vst [vmem:[%s3198_s29 + $0x58] sm:$0xff] %v2047_v5  ;;  %v2011_v7 = vpop.f32.mrb[28].mxu0 }
 0x347   : > { %v2531_v8 = vadd.f32 %v2506_v36, %v2011_v7  ;;  %v2013_v9 = vpop.f32.mrb[29].mxu0 }
 0x348   : > { %v2533_v11 = vadd.f32 %v2508_v20, %v2013_v9  ;;  %v2015_v12 = vpop.f32.mrb[30].mxu0 }
 0x349   : > { %v2048_v13 = vmax.f32 %v2531_v8, 0.0  ;;  %v2535_v1 = vadd.f32 %v2506_v36, %v2015_v12  ;;  %v2017_v14 = vpop.f32.mrb[31].mxu0 }
 0x34a   : > { %v2049_v17 = vmax.f32 %v2533_v11, 0.0  ;;  %v2537_v18 = vadd.f32 %v2508_v20, %v2017_v14 }
 0x34b   : > { %2064 = vst [vmem:[%s3198_s29 + $0x60] sm:$0xff] %v2048_v13  ;;  %v2050_v10 = vmax.f32 %v2535_v1, 0.0 }
 0x34c   : > { %2065 = vst [vmem:[%s3198_s29 + $0x68] sm:$0xff] %v2049_v17  ;;  %v2051_v21 = vmax.f32 %v2537_v18, 0.0 }
 0x34d   : > { %2066 = vst [vmem:[%s3198_s29 + $0x70] sm:$0xff] %v2050_v10 }
 0x34e   : > { %2067 = vst [vmem:[%s3198_s29 + $0x78] sm:$0xff] %v2051_v21 }
 0x34f PF: > { %s19_s30 = sadd.s32 1, %s2706_s30  }
 0x350   : > { %p16_p4 = scmp.ge.s32.totalorder %s19_s30, 4  }
 0x352   :  { %18 = sbr.rel (!%p16_p4) target bundleno = 1 (0x1), region = 88 }

// kernel: shared_module_bh_forward.16
= control target key start
LH: loop header
LB: loop body
LE: loop exit
PB: predicated region body
PF: predicated region fallthrough
CT: control target
= control target key end

     0   :  { %s2523_s24 = smov 0   ;;  %s3030_s0 = inlined_call_operand.vmem [shape: f32[2,8,8,256], index: 0, kind: input, shape index: {}]   ;;  %s3031_s1 = inlined_call_operand.vmem [shape: bf16[256,64], index: 1, kind: input, shape index: {}]   ;;  %s3032_s2 = inlined_call_operand.vmem [shape: f32[1,64], index: 2, kind: input, shape index: {}]   ;;  %s3033_s3 = inlined_call_operand.vmem [shape: bf16[576,64], index: 3, kind: input, shape index: {}]   ;;  %s3034_s4 = inlined_call_operand.vmem [shape: f32[1,64], index: 4, kind: input, shape index: {}]   ;;  %s3035_s5 = inlined_call_operand.vmem [shape: bf16[64,256], index: 5, kind: input, shape index: {}]   ;;  %s3036_s6 = inlined_call_operand.vmem [shape: f32[1,256], index: 6, kind: input, shape index: {}]   ;;  %s3037_s7 = inlined_call_operand.vmem [shape: f32[2,64,256], index: 7, kind: output, shape index: {}]  }
   0x1 LB: > { %s1964_s25 = sadd.s32 4294967295, %s2479_s24   ;;  %p1968_p0 = scmp.ge.s32.totalorder %s2479_s24, 1  ;;  %s2479_s24 = sphi %s2523_s24, %s17_s24  }
   0x2   : > { %p237_p1 = scmp.lt.s32.totalorder %s2479_s24, 3 }
   0x4   : > { %p238_p2 = pnand %p1968_p0, %p237_p1 }
   0x5   : > { %v2409_v0 = vld [vmem:[%s3031_s1 + $0x40] sm:$0xff] (!%p238_p2)   ;;  %v2411_v2 = vld [vmem:[%s3031_s1 + $0x48] sm:$0xff] (!%p238_p2)   ;;  %p269_p3 = scmp.lt.s32.totalorder (!%p238_p2), %s1964_s25, 1  ;;  %v2413_v4 = vld [vmem:[%s3031_s1 + $0x50] sm:$0xff] (!%p238_p2)   ;;  %vm512_vm0 = vcmask (!%p238_p2), 523264   ;;  %vm514_vm1 = vcmask (!%p238_p2), 517120  }
   0x6   : > { %241 = sbr.rel (%p238_p2) target bundleno = 849 (0x351), region = 48  ;;  %v2410_v1 = vld [vmem:[%s3031_s1] sm:$0xff] (!%p238_p2)   ;;  %2079 = vmatprep.subr.bf16.mxu0 (!%p238_p2), %v2409_v0  ;;  %v2412_v3 = vld [vmem:[%s3031_s1 + $0x8] sm:$0xff] (!%p238_p2)   ;;  %v2414_v5 = vld [vmem:[%s3031_s1 + $0x10] sm:$0xff] (!%p238_p2)   ;;  %v2481_v40 = vmov (!%p238_p2), 0.0  }
   0x7   : > { %2080 = vmatpush3.bf16.msra.mxu0 (!%p238_p2), %v2410_v1  ;;  %v2415_v6 = vld [vmem:[%s3031_s1 + $0x58] sm:$0xff] (!%p238_p2)   ;;  %v2417_v8 = vld [vmem:[%s3031_s1 + $0x60] sm:$0xff] (!%p238_p2)   ;;  %v2419_v10 = vld [vmem:[%s3031_s1 + $0x68] sm:$0xff] (!%p238_p2)   ;;  %516 = vst.msk [vmem:[#allocation2 + $0x10] sm:$0xff] (!%p238_p2), %vm512_vm0, %v2481_v40 }
   0x8   : > { %2081 = vmatprep.subr.bf16.mxu0 (!%p238_p2), %v2411_v2  ;;  %v2416_v7 = vld [vmem:[%s3031_s1 + $0x18] sm:$0xff] (!%p238_p2)   ;;  %v2418_v9 = vld [vmem:[%s3031_s1 + $0x20] sm:$0xff] (!%p238_p2)   ;;  %v2420_v14 = vld [vmem:[%s3031_s1 + $0x28] sm:$0xff] (!%p238_p2)   ;;  %517 = vst.msk [vmem:[#allocation2 + $0x18] sm:$0x3] (!%p238_p2), %vm514_vm1, %v2481_v40 }
   0x9   : > { %v2421_v15 = vld [vmem:[%s3031_s1 + $0x70] sm:$0xff] (!%p238_p2)   ;;  %v2423_v17 = vld [vmem:[%s3031_s1 + $0x78] sm:$0xff] (!%p238_p2)   ;;  %513 = vst.msk [vmem:[#allocation2] sm:$0xff] (!%p238_p2), %vm512_vm0, %v2481_v40  ;;  %518 = vst.msk [vmem:[#allocation2 + $0x20] sm:$0xff] (!%p238_p2), %vm512_vm0, %v2481_v40 }
   0xa   : > { %v2422_v16 = vld [vmem:[%s3031_s1 + $0x30] sm:$0xff] (!%p238_p2)   ;;  %v2424_v18 = vld [vmem:[%s3031_s1 + $0x38] sm:$0xff] (!%p238_p2)   ;;  %515 = vst.msk [vmem:[#allocation2 + $0x8] sm:$0x3] (!%p238_p2), %vm514_vm1, %v2481_v40  ;;  %519 = vst.msk [vmem:[#allocation2 + $0x28] sm:$0x3] (!%p238_p2), %vm514_vm1, %v2481_v40 }
   0xb   : > { %2082 = vmatpush3.bf16.msra.mxu0 (!%p238_p2), %v2412_v3  ;;  %520 = vst.msk [vmem:[#allocation2 + $0x30] sm:$0xff] (!%p238_p2), %vm512_vm0, %v2481_v40  ;;  %522 = vst.msk [vmem:[#allocation2 + $0x40] sm:$0xff] (!%p238_p2), %vm512_vm0, %v2481_v40  ;;  %v2425_v41 = vld [vmem:[%s3033_s3 + $0x20] sm:$0xff] (!%p238_p2)   ;;  %v2427_v43 = vld [vmem:[%s3033_s3 + $0x28] sm:$0xff] (!%p238_p2)  }
   0xc   : > { %2083 = vmatprep.subr.bf16.mxu0 (!%p238_p2), %v2413_v4  ;;  %521 = vst.msk [vmem:[#allocation2 + $0x38] sm:$0x3] (!%p238_p2), %vm514_vm1, %v2481_v40  ;;  %523 = vst.msk [vmem:[#allocation2 + $0x48] sm:$0x3] (!%p238_p2), %vm514_vm1, %v2481_v40  ;;  %v2426_v42 = vld [vmem:[%s3033_s3 + $0x40] sm:$0xff] (!%p238_p2)   ;;  %v2428_v44 = vld [vmem:[%s3033_s3 + $0x48] sm:$0xff] (!%p238_p2)  }
   0xd   : > { %s3039_s25 = smov (!%p269_p3, %s1964_s25), 1  ;;  %524 = vst.msk [vmem:[#allocation2 + $0x50] sm:$0xff] %vm512_vm0, %v2481_v40  ;;  %526 = vst.msk [vmem:[#allocation2 + $0x60] sm:$0xff] %vm512_vm0, %v2481_v40  ;;  %2223 = vmatprep.subr.bf16.mxu1 %v2426_v42  ;;  %v2429_v45 = vld [vmem:[%s3033_s3 + $0x30] sm:$0xff]   ;;  %v2431_v47 = vld [vmem:[%s3033_s3 + $0x38] sm:$0xff]  }
   0xe   : > { %s2077_s17 = sshll.u32 %s3039_s25, 7  ;;  %525 = vst.msk [vmem:[#allocation2 + $0x58] sm:$0x3] %vm514_vm1, %v2481_v40  ;;  %527 = vst.msk [vmem:[#allocation2 + $0x68] sm:$0x3] %vm514_vm1, %v2481_v40  ;;  %2224 = vmatpush3.bf16.msra.mxu1 %v2426_v42  ;;  %v2430_v46 = vld [vmem:[%s3033_s3 + $0x50] sm:$0xff]  }
   0xf   : > { %2084 = vmatpush3.bf16.msra.mxu0 %v2414_v5  ;;  %s2566_s26 = scalar_lea.vmem %s3030_s0, %s2077_s17  ;;  %528 = vst.msk [vmem:[#allocation2 + $0x70] sm:$0xff] %vm512_vm0, %v2481_v40  ;;  %530 = vst.msk [vmem:[#allocation2 + $0x80] sm:$0xff] %vm512_vm0, %v2481_v40  ;;  %2225 = vmatprep.subr.bf16.mxu1 %v2428_v44  ;;  %v2432_v48 = vld [vmem:[%s3033_s3 + $0x58] sm:$0xff]   ;;  %v2700_v49 = vld [vmem:[%s3033_s3 + $0x60] sm:$0xff]   ;;  %s2981_s14 = scalar_lea.vmem %s3037_s7, %s2077_s17 }
  0x10   : > { %2085 = vmatprep.subr.bf16.mxu0 %v2415_v6  ;;  %v2575_v11 = vld [vmem:[%s2566_s26 + $0x8] sm:$0xff]  ;;  %v2578_v12 = vld [vmem:[%s2566_s26 + $0x18] sm:$0xff]  ;;  %v2598_v19 = vld [vmem:[%s2566_s26] sm:$0xff]  ;;  %529 = vst.msk [vmem:[#allocation2 + $0x78] sm:$0x3] %vm514_vm1, %v2481_v40 }
  0x11   : > { %v297_v13 = vpack.c.bf16 %v2578_v12, %v2575_v11  ;;  %v2601_v20 = vld [vmem:[%s2566_s26 + $0x10] sm:$0xff]  ;;  %v2604_v21 = vld [vmem:[%s2566_s26 + $0x28] sm:$0xff]  ;;  %v2607_v22 = vld [vmem:[%s2566_s26 + $0x38] sm:$0xff]  ;;  %531 = vst.msk [vmem:[#allocation2 + $0x88] sm:$0x3] %vm514_vm1, %v2481_v40 }
  0x12   : > { %v296_v23 = vpack.c.bf16 %v2601_v20, %v2598_v19  ;;  %v299_v24 = vpack.c.bf16 %v2607_v22, %v2604_v21  ;;  %v2614_v25 = vld [vmem:[%s2566_s26 + $0x20] sm:$0xff]  ;;  %v2617_v26 = vld [vmem:[%s2566_s26 + $0x30] sm:$0xff]  ;;  %v2620_v27 = vld [vmem:[%s2566_s26 + $0x48] sm:$0xff]  ;;  %532 = vst.msk [vmem:[#allocation2 + $0x90] sm:$0xff] %vm512_vm0, %v2481_v40  ;;  %2226 = vmatpush3.bf16.msra.mxu1 %v2428_v44 }
  0x13   : > { %2086 = vmatpush3.bf16.msra.mxu0 %v2416_v7  ;;  %471 = vmatprep.mubr.bf16.mxu0 %v297_v13  ;;  %v2623_v28 = vld [vmem:[%s2566_s26 + $0x58] sm:$0xff]  ;;  %v298_v29 = vpack.c.bf16 %v2617_v26, %v2614_v25  ;;  %v2630_v31 = vld [vmem:[%s2566_s26 + $0x40] sm:$0xff]  ;;  %v2633_v32 = vld [vmem:[%s2566_s26 + $0x50] sm:$0xff]  ;;  %533 = vst.msk [vmem:[#allocation2 + $0x98] sm:$0x3] %vm514_vm1, %v2481_v40 }
  0x14   : > { %2087 = vmatprep.subr.bf16.mxu0 %v2417_v8  ;;  %v301_v30 = vpack.c.bf16 %v2623_v28, %v2620_v27  ;;  %v2636_v33 = vld [vmem:[%s2566_s26 + $0x68] sm:$0xff]  ;;  %v2639_v34 = vld [vmem:[%s2566_s26 + $0x78] sm:$0xff]  ;;  %v300_v35 = vpack.c.bf16 %v2633_v32, %v2630_v31  ;;  %v2646_v37 = vld [vmem:[%s2566_s26 + $0x60] sm:$0xff]  ;;  %2227 = vmatprep.subr.bf16.mxu1 %v2430_v46 }
  0x15   : > { %v303_v36 = vpack.c.bf16 %v2639_v34, %v2636_v33  ;;  %v2649_v38 = vld [vmem:[%s2566_s26 + $0x70] sm:$0xff]  ;;  %v2705_v50 = vld [vmem:[%s3033_s3] sm:$0xff]  }
  0x16   : > { %v302_v39 = vpack.c.bf16 %v2649_v38, %v2646_v37  ;;  %2228 = vmatpush3.bf16.msra.mxu1 %v2430_v46  ;;  %v2712_v52 = vld [vmem:[%s3032_s2] ss:$0 sm:$0xff]  ;;  %v563_v5 = vld [vmem:[#allocation2 + $0x1] sm:$0xff] }
  0x17   : > { %2088 = vmatpush3.bf16.msra.mxu0 %v2418_v9  ;;  %2229 = vmatprep.subr.bf16.mxu1 %v2432_v48  ;;  %v785_v6 = vld [vmem:[#allocation2 + $0x2] sm:$0xff] }
  0x18   : > { %2089 = vmatprep.subr.bf16.mxu0 %v2419_v10 }
  0x1a   : > { %2230 = vmatpush3.bf16.msra.mxu1 %v2432_v48  ;;  %v2436_v48 = vld [vmem:[%s3033_s3 + $0x8] sm:$0xff]  }
  0x1b   : > { %2090 = vmatpush3.bf16.msra.mxu0 %v2420_v14  ;;  %2239 = vmatprep.subr.bf16.mxu1 %v2700_v49 }
  0x1c   : > { %2091 = vmatprep.subr.bf16.mxu0 %v2421_v15 }
  0x1f   : > { %2092 = vmatpush3.bf16.msra.mxu0 %v2422_v16 }
  0x20   : > { %2093 = vmatprep.subr.bf16.mxu0 %v2423_v17 }
  0x23   : > { %2094 = vmatpush3.bf16.msra.mxu0 %v2424_v18 }
  0x24   : > { %2191 = vmatprep.subr.bf16.mxu0 %v2425_v41 }
  0x26   : > { %472 = vmatmul.mubr.bf16.vlgmr.msra.gmra.mrb[0].mxu0 %v296_v23 }
  0x27   : > { %479 = vmatprep.mubr.bf16.mxu0 %v299_v24  ;;  %2192 = vmatpush3.bf16.msra.mxu0 %v2425_v41 }
  0x28   : > { %2193 = vmatprep.subr.bf16.mxu0 %v2427_v43 }
  0x2b   : > { %2194 = vmatpush3.bf16.msra.mxu0 %v2427_v43 }
  0x2c   : > { %2195 = vmatprep.subr.bf16.mxu0 %v2429_v45 }
  0x2e   : > { %480 = vmatmul.mubr.bf16.gmra.mrb[4].mxu0 %v298_v29 }
  0x2f   : > { %487 = vmatprep.mubr.bf16.mxu0 %v301_v30  ;;  %2196 = vmatpush3.bf16.msra.mxu0 %v2429_v45 }
  0x30   : > { %2197 = vmatprep.subr.bf16.mxu0 %v2431_v47 }
  0x33   : > { %2198 = vmatpush3.bf16.msra.mxu0 %v2431_v47  ;;  %v2435_v47 = vld [vmem:[%s3033_s3 + $0x68] sm:$0xff]  }
  0x34   : > { %2207 = vmatprep.subr.bf16.mxu0 %v2705_v50 }
  0x36   : > { %488 = vmatmul.mubr.bf16.gmra.mrb[8].mxu0 %v300_v35 }
  0x37   : > { %495 = vmatprep.mubr.bf16.mxu0 %v303_v36 }
  0x3e   : > { %496 = vmatmul.mubr.bf16.gmra.mrb[12].mxu0 %v302_v39 }
  0xf9   : > { %v2095_v51 = vpop.f32.mrb[0].mxu0 }
  0xfa   : > { %v2096_v53 = vpop.f32.mrb[1].mxu0 }
  0xfb   : > { %v2097_v54 = vadd.f32 %v2096_v53, %v2095_v51  ;;  %v2098_v55 = vpop.f32.mrb[2].mxu0 }
  0xfc   : > { %v2099_v56 = vpop.f32.mrb[3].mxu0 }
  0xfd   : > { %v474_v57 = vadd.f32 %v2097_v54, %v2712_v52  ;;  %v2100_v58 = vadd.f32 %v2099_v56, %v2098_v55 }
  0xff   : > { %v504_v59 = vmax.f32 %v474_v57, 0.0  ;;  %v477_v60 = vadd.f32 %v2100_v58, %v2712_v52  ;;  %v2437_v58 = vld [vmem:[%s3033_s3 + $0x70] sm:$0xff]  }
 0x101   : > { %535 = vst.msk [vmem:[#allocation2 + $0x11] sm:$0xff] %vm512_vm0, %v504_v59  ;;  %v505_v61 = vmax.f32 %v477_v60, 0.0  ;;  %v2101_v62 = vpop.f32.mrb[4].mxu0  ;;  %v2438_v59 = vld [vmem:[%s3033_s3 + $0x10] sm:$0xff]  }
 0x102   : > { %v2102_v63 = vpop.f32.mrb[5].mxu0 }
 0x103   : > { %536 = vst.msk [vmem:[#allocation2 + $0x21] sm:$0xff] %vm512_vm0, %v505_v61  ;;  %v2103_v0 = vadd.f32 %v2102_v63, %v2101_v62  ;;  %v2104_v1 = vpop.f32.mrb[6].mxu0 }
 0x104   : > { %v2105_v2 = vpop.f32.mrb[7].mxu0 }
 0x105   : > { %v482_v3 = vadd.f32 %v2103_v0, %v2712_v52  ;;  %v2106_v4 = vadd.f32 %v2105_v2, %v2104_v1  ;;  %v2439_v2 = vld [vmem:[%s3033_s3 + $0x78] sm:$0xff]  }
 0x107   : > { %v506_v7 = vmax.f32 %v482_v3, 0.0  ;;  %v485_v8 = vadd.f32 %v2106_v4, %v2712_v52  ;;  %v2440_v3 = vld [vmem:[%s3033_s3 + $0x18] sm:$0xff]   ;;  %v2441_v4 = vld [vmem:[%s3033_s3 + $0x80] sm:$0xff]  }
 0x108   : > { %v2720_v9 = vld [vmem:[#allocation2 + $0x11] sm:$0xff] }
 0x109   : > { %v2722_v10 = vld [vmem:[#allocation2 + $0x12] sm:$0xff]  ;;  %537 = vst.msk [vmem:[#allocation2 + $0x31] sm:$0xff] %vm512_vm0, %v506_v7  ;;  %v507_v13 = vmax.f32 %v485_v8, 0.0  ;;  %v2107_v14 = vpop.f32.mrb[8].mxu0  ;;  %v571_v15 = vpack.c.bf16 %v2720_v9, %v563_v5  ;;  %v543_v5 = vld [vmem:[#allocation2] sm:$0xff] }
 0x10a   : > { %v793_v16 = vpack.c.bf16 %v2722_v10, %v785_v6  ;;  %v2108_v17 = vpop.f32.mrb[9].mxu0  ;;  %v2732_v39 = vld [vmem:[#allocation2 + $0x21] sm:$0xff]  ;;  %v544_v7 = vld [vmem:[#allocation2 + $0x10] sm:$0xff] }
 0x10b   : > { %538 = vst.msk [vmem:[#allocation2 + $0x41] sm:$0xff] %vm512_vm0, %v507_v13  ;;  %v2109_v18 = vadd.f32 %v2108_v17, %v2107_v14  ;;  %v2110_v23 = vpop.f32.mrb[10].mxu0  ;;  %2199 = vmatprep.mubr.msk.bf16.mxu0 %vm512_vm0, %v571_v15  ;;  %v2736_v41 = vld [vmem:[#allocation2 + $0x22] sm:$0xff] }
 0x10c   : > { %2231 = vmatprep.mubr.msk.bf16.mxu1 %vm512_vm0, %v793_v16  ;;  %v2111_v24 = vpop.f32.mrb[11].mxu0  ;;  %v915_v8 = vld [vmem:[#allocation2 + $0x20] sm:$0xff] }
 0x10d   : > { %v490_v29 = vadd.f32 %v2109_v18, %v2712_v52  ;;  %v2112_v30 = vadd.f32 %v2111_v24, %v2110_v23  ;;  %v551_v18 = vpack.c.bf16 %v544_v7, %v543_v5  ;;  %v922_v23 = vpack.c.bf16 %v915_v8, %v544_v7  ;;  %v2455_v7 = vld [vmem:[%s3033_s3 + $0xf0] sm:$0xff]  }
 0x10f   : > { %v508_v35 = vmax.f32 %v490_v29, 0.0  ;;  %v493_v36 = vadd.f32 %v2112_v30, %v2712_v52 }
 0x110   : > { %v2734_v40 = vld [vmem:[#allocation2 + $0x31] sm:$0xff] }
 0x111   : > { %v2738_v42 = vld [vmem:[#allocation2 + $0x32] sm:$0xff]  ;;  %539 = vst.msk [vmem:[#allocation2 + $0x51] sm:$0xff] %vm512_vm0, %v508_v35  ;;  %v509_v43 = vmax.f32 %v493_v36, 0.0  ;;  %v2113_v44 = vpop.f32.mrb[12].mxu0  ;;  %v2743_v45 = vpack.c.bf16 %v2734_v40, %v2732_v39 }
 0x112   : > { %v2747_v46 = vpack.c.bf16 %v2738_v42, %v2736_v41  ;;  %v2114_v51 = vpop.f32.mrb[13].mxu0  ;;  %v2770_v62 = vld [vmem:[#allocation2 + $0x41] sm:$0xff]  ;;  %v546_v24 = vld [vmem:[#allocation2 + $0x30] sm:$0xff] }
 0x113   : > { %540 = vst.msk [vmem:[#allocation2 + $0x61] sm:$0xff] %vm512_vm0, %v509_v43  ;;  %v2115_v53 = vadd.f32 %v2114_v51, %v2113_v44  ;;  %v2116_v54 = vpop.f32.mrb[14].mxu0  ;;  %2200 = vmatmul.mubr.msk.bf16.vlgmr.msra.gmra.mrb[16].mxu0 %vm512_vm0, %v2743_v45  ;;  %v917_v29 = vld [vmem:[#allocation2 + $0x40] sm:$0xff]  ;;  %v2817_v36 = vpack.c.bf16 %v546_v24, %v915_v8  ;;  %v2442_v44 = vld [vmem:[%s3033_s3 + $0x88] sm:$0xff]   ;;  %v2443_v51 = vld [vmem:[%s3033_s3 + $0x90] sm:$0xff]  }
 0x114   : > { %2232 = vmatmul.mubr.msk.bf16.vlgmr.msra.gmra.mrb[0].mxu1 %vm512_vm0, %v2747_v46  ;;  %v2117_v55 = vpop.f32.mrb[15].mxu0  ;;  %2208 = vmatpush3.bf16.msra.mxu0 %v2705_v50  ;;  %v2774_v50 = vld [vmem:[#allocation2 + $0x42] sm:$0xff]  ;;  %v923_v43 = vpack.c.bf16 %v917_v29, %v546_v24  ;;  %v1309_v8 = vld [vmem:[#allocation2 + $0x90] sm:$0xff] }
 0x115   : > { %2240 = vmatpush3.bf16.msra.mxu1 %v2700_v49  ;;  %v498_v56 = vadd.f32 %v2115_v53, %v2712_v52  ;;  %v2118_v57 = vadd.f32 %v2117_v55, %v2116_v54  ;;  %2209 = vmatprep.subr.bf16.mxu0 %v2436_v48 }
 0x116   : > { %2241 = vmatprep.subr.bf16.mxu1 %v2435_v47 }
 0x117   : > { %v510_v60 = vmax.f32 %v498_v56, 0.0  ;;  %v501_v61 = vadd.f32 %v2118_v57, %v2712_v52  ;;  %v2444_v57 = vld [vmem:[%s3033_s3 + $0x98] sm:$0xff]  }
 0x118   : > { %v2772_v49 = vld [vmem:[#allocation2 + $0x51] sm:$0xff]  ;;  %2210 = vmatpush3.bf16.msra.mxu0 %v2436_v48 }
 0x119   : > { %v2776_v63 = vld [vmem:[#allocation2 + $0x52] sm:$0xff]  ;;  %2242 = vmatpush3.bf16.msra.mxu1 %v2435_v47  ;;  %541 = vst.msk [vmem:[#allocation2 + $0x71] sm:$0xff] %vm512_vm0, %v510_v60  ;;  %v511_v0 = vmax.f32 %v501_v61, 0.0  ;;  %v2781_v1 = vpack.c.bf16 %v2772_v49, %v2770_v62  ;;  %2211 = vmatprep.subr.bf16.mxu0 %v2438_v59  ;;  %v1052_v60 = vpack.c.bf16 %v2770_v62, %v2734_v40 }
 0x11a   : > { %v2785_v52 = vpack.c.bf16 %v2776_v63, %v2774_v50  ;;  %2243 = vmatprep.subr.bf16.mxu1 %v2437_v58  ;;  %v569_v6 = vld [vmem:[#allocation2 + $0x61] sm:$0xff]  ;;  %v548_v30 = vld [vmem:[#allocation2 + $0x50] sm:$0xff]  ;;  %v2448_v62 = vld [vmem:[%s3033_s3 + $0xb8] sm:$0xff]  }
 0x11b   : > { %542 = vst.msk [vmem:[#allocation2 + $0x81] sm:$0xff] %vm512_vm0, %v511_v0  ;;  %2203 = vmatprep.mubr.msk.bf16.mxu0 %vm512_vm0, %v2781_v1  ;;  %v2801_v14 = vld [vmem:[#allocation2 + $0x62] sm:$0xff]  ;;  %v2822_v47 = vpack.c.bf16 %v548_v30, %v917_v29  ;;  %v2447_v61 = vld [vmem:[%s3033_s3 + $0xb0] sm:$0xff]   ;;  %v2460_v29 = vld [vmem:[%s3033_s3 + $0x118] sm:$0xff]  }
 0x11c   : > { %2235 = vmatprep.mubr.msk.bf16.mxu1 %vm512_vm0, %v2785_v52  ;;  %2212 = vmatpush3.bf16.msra.mxu0 %v2438_v59  ;;  %v919_v35 = vld [vmem:[#allocation2 + $0x60] sm:$0xff] }
 0x11d   : > { %2244 = vmatpush3.bf16.msra.mxu1 %v2437_v58  ;;  %2213 = vmatprep.subr.bf16.mxu0 %v2440_v3  ;;  %v924_v48 = vpack.c.bf16 %v919_v35, %v548_v30  ;;  %v1051_v58 = vpack.c.bf16 %v2732_v39, %v2720_v9  ;;  %v2445_v59 = vld [vmem:[%s3033_s3 + $0xa0] sm:$0xff]   ;;  %v2446_v9 = vld [vmem:[%s3033_s3 + $0xa8] sm:$0xff]   ;;  %v1053_v39 = vpack.c.bf16 %v569_v6, %v2772_v49 }
 0x11e   : > { %2245 = vmatprep.subr.bf16.mxu1 %v2439_v2  ;;  %v1180_v49 = vpack.c.bf16 %v2736_v41, %v2722_v10  ;;  %v1182_v10 = vpack.c.bf16 %v2801_v14, %v2776_v63  ;;  %v2451_v41 = vld [vmem:[%s3033_s3 + $0xd0] sm:$0xff]   ;;  %v2453_v63 = vld [vmem:[%s3033_s3 + $0xe0] sm:$0xff]  }
 0x11f   : > { %v2461_v30 = vld [vmem:[%s3035_s5] ss:$8 sps:$4 sm:$0xff]  }
 0x120   : > { %v570_v13 = vld [vmem:[#allocation2 + $0x71] sm:$0xff]  ;;  %2214 = vmatpush3.bf16.msra.mxu0 %v2440_v3  ;;  %v1181_v3 = vpack.c.bf16 %v2774_v50, %v2738_v42 }
 0x121   : > { %v2803_v15 = vld [vmem:[#allocation2 + $0x72] sm:$0xff]  ;;  %2246 = vmatpush3.bf16.msra.mxu1 %v2439_v2  ;;  %v2805_v16 = vpack.c.bf16 %v570_v13, %v569_v6  ;;  %v2449_v2 = vld [vmem:[%s3033_s3 + $0xc0] sm:$0xff]   ;;  %v2454_v6 = vld [vmem:[%s3033_s3 + $0xe8] sm:$0xff]  }
 0x122   : > { %v2809_v17 = vpack.c.bf16 %v2803_v15, %v2801_v14  ;;  %2255 = vmatprep.subr.bf16.mxu1 %v2441_v4  ;;  %v550_v53 = vld [vmem:[#allocation2 + $0x70] sm:$0xff]  ;;  %v2833_v54 = vld [vmem:[#allocation2 + $0x80] sm:$0xff]  ;;  %v2452_v50 = vld [vmem:[%s3033_s3 + $0xd8] sm:$0xff]  }
 0x123   : > { %2204 = vmatmul.mubr.msk.bf16.gmra.mrb[20].mxu0 %vm512_vm0, %v2805_v16  ;;  %v554_v55 = vpack.c.bf16 %v550_v53, %v919_v35  ;;  %v925_v56 = vpack.c.bf16 %v2833_v54, %v550_v53  ;;  %v2858_v0 = vld [vmem:[#allocation2 + $0x81] sm:$0xff]  ;;  %v2456_v14 = vld [vmem:[%s3033_s3 + $0xf8] sm:$0xff]  }
 0x124   : > { %2236 = vmatmul.mubr.msk.bf16.gmra.mrb[4].mxu1 %vm512_vm0, %v2809_v17  ;;  %2215 = vmatprep.mubr.msk.bf16.mxu0 %vm512_vm0, %v551_v18  ;;  %v1054_v40 = vpack.c.bf16 %v2858_v0, %v570_v13  ;;  %v1179_v5 = vld [vmem:[#allocation2 + $0x82] sm:$0xff]  ;;  %v1313_v13 = vpack.c.bf16 %v1309_v8, %v2833_v54  ;;  %v2466_v35 = vld [vmem:[%s3035_s5 + $0x14] ss:$8 sps:$4 sm:$0xff]  }
 0x125   : > { %2247 = vmatprep.mubr.msk.bf16.mxu1 %vm512_vm0, %v922_v23  ;;  %v1183_v42 = vpack.c.bf16 %v1179_v5, %v2803_v15  ;;  %v2457_v15 = vld [vmem:[%s3033_s3 + $0x100] sm:$0xff]   ;;  %v2458_v18 = vld [vmem:[%s3033_s3 + $0x108] sm:$0xff]   ;;  %v1438_v23 = vld [vmem:[#allocation2 + $0x91] sm:$0xff] }
 0x126   : > { %v1442_v24 = vpack.c.bf16 %v1438_v23, %v2858_v0 }
 0x12b   : > { %2216 = vmatmul.mubr.msk.bf16.vlgmr.msra.gmra.mrb[16].mxu0 %vm512_vm0, %v2817_v36 }
 0x12c   : > { %2248 = vmatmul.mubr.msk.bf16.vlgmr.msra.gmra.mrb[0].mxu1 %vm512_vm0, %v923_v43  ;;  %2219 = vmatprep.mubr.msk.bf16.mxu0 %vm512_vm0, %v2822_v47  ;;  %v2472_v43 = vld [vmem:[%s3035_s5 + $0x34] ss:$8 sps:$4 sm:$0xff]  }
 0x12d   : > { %2256 = vmatpush3.bf16.msra.mxu1 %v2441_v4  ;;  %2251 = vmatprep.mubr.msk.bf16.mxu1 %vm512_vm0, %v924_v48  ;;  %v2450_v4 = vld [vmem:[%s3033_s3 + $0xc8] sm:$0xff]  }
 0x12e   : > { %2257 = vmatprep.subr.bf16.mxu1 %v2442_v44 }
 0x131   : > { %2258 = vmatpush3.bf16.msra.mxu1 %v2442_v44  ;;  %v2470_v44 = vld [vmem:[%s3035_s5 + $0x30] ss:$8 sps:$4 sm:$0xff]  }
 0x132   : > { %2259 = vmatprep.subr.bf16.mxu1 %v2443_v51 }
 0x133   : > { %2220 = vmatmul.mubr.msk.bf16.gmra.mrb[20].mxu0 %vm512_vm0, %v554_v55 }
 0x134   : > { %2252 = vmatmul.mubr.msk.bf16.gmra.mrb[4].mxu1 %vm512_vm0, %v925_v56 }
 0x135   : > { %2260 = vmatpush3.bf16.msra.mxu1 %v2443_v51  ;;  %2263 = vmatprep.mubr.msk.bf16.mxu1 %vm512_vm0, %v1051_v58 }
 0x136   : > { %2261 = vmatprep.subr.bf16.mxu1 %v2444_v57 }
 0x139   : > { %2262 = vmatpush3.bf16.msra.mxu1 %v2444_v57 }
 0x13a   : > { %2271 = vmatprep.subr.bf16.mxu1 %v2445_v59 }
 0x13c   : > { %2264 = vmatmul.mubr.msk.bf16.vlgmr.msra.gmra.mrb[0].mxu1 %vm512_vm0, %v1052_v60  ;;  %v2062_v60 = vld [vmem:[%s3034_s4] ss:$0 sm:$0xff] }
 0x13d   : > { %2272 = vmatpush3.bf16.msra.mxu1 %v2445_v59  ;;  %2267 = vmatprep.mubr.msk.bf16.mxu1 %vm512_vm0, %v1053_v39 }
 0x13e   : > { %2273 = vmatprep.subr.bf16.mxu1 %v2446_v9 }
 0x141   : > { %2274 = vmatpush3.bf16.msra.mxu1 %v2446_v9 }
 0x142   : > { %2275 = vmatprep.subr.bf16.mxu1 %v2447_v61 }
 0x144   : > { %2268 = vmatmul.mubr.msk.bf16.gmra.mrb[4].mxu1 %vm512_vm0, %v1054_v40 }
 0x145   : > { %2276 = vmatpush3.bf16.msra.mxu1 %v2447_v61  ;;  %2279 = vmatprep.mubr.msk.bf16.mxu1 %vm512_vm0, %v1180_v49 }
 0x146   : > { %2277 = vmatprep.subr.bf16.mxu1 %v2448_v62 }
 0x149   : > { %2278 = vmatpush3.bf16.msra.mxu1 %v2448_v62 }
 0x14a   : > { %2287 = vmatprep.subr.bf16.mxu1 %v2449_v2 }
 0x14c   : > { %2280 = vmatmul.mubr.msk.bf16.vlgmr.msra.gmra.mrb[0].mxu1 %vm512_vm0, %v1181_v3 }
 0x14d   : > { %2288 = vmatpush3.bf16.msra.mxu1 %v2449_v2  ;;  %2283 = vmatprep.mubr.msk.bf16.mxu1 %vm512_vm0, %v1182_v10 }
 0x14e   : > { %2289 = vmatprep.subr.bf16.mxu1 %v2450_v4 }
 0x151   : > { %2290 = vmatpush3.bf16.msra.mxu1 %v2450_v4 }
 0x152   : > { %2291 = vmatprep.subr.bf16.mxu1 %v2451_v41 }
 0x154   : > { %2284 = vmatmul.mubr.msk.bf16.gmra.mrb[4].mxu1 %vm512_vm0, %v1183_v42 }
 0x155   : > { %2292 = vmatpush3.bf16.msra.mxu1 %v2451_v41  ;;  %2295 = vmatprep.mubr.msk.bf16.mxu1 %vm512_vm0, %v2817_v36  ;;  %v2467_v36 = vld [vmem:[%s3035_s5 + $0x20] ss:$8 sps:$4 sm:$0xff]  }
 0x156   : > { %2293 = vmatprep.subr.bf16.mxu1 %v2452_v50 }
 0x159   : > { %2294 = vmatpush3.bf16.msra.mxu1 %v2452_v50 }
 0x15a   : > { %2303 = vmatprep.subr.bf16.mxu1 %v2453_v63 }
 0x15c   : > { %2296 = vmatmul.mubr.msk.bf16.vlgmr.msra.gmra.mrb[0].mxu1 %vm512_vm0, %v2822_v47  ;;  %v2482_v47 = vmov 0  }
 0x15d   : > { %2304 = vmatpush3.bf16.msra.mxu1 %v2453_v63  ;;  %2299 = vmatprep.mubr.msk.bf16.mxu1 %vm512_vm0, %v554_v55 }
 0x15e   : > { %2305 = vmatprep.subr.bf16.mxu1 %v2454_v6  ;;  %1820 = vmatprep.mubr.bf16.mxu0 %v2482_v47 }
 0x161   : > { %2306 = vmatpush3.bf16.msra.mxu1 %v2454_v6 }
 0x162   : > { %2307 = vmatprep.subr.bf16.mxu1 %v2455_v7 }
 0x164   : > { %2300 = vmatmul.mubr.msk.bf16.gmra.mrb[4].mxu1 %vm512_vm0, %v1313_v13 }
 0x165   : > { %2308 = vmatpush3.bf16.msra.mxu1 %v2455_v7  ;;  %2311 = vmatprep.mubr.msk.bf16.mxu1 %vm512_vm0, %v2743_v45  ;;  %v2459_v45 = vld [vmem:[%s3033_s3 + $0x110] sm:$0xff]  }
 0x166   : > { %2309 = vmatprep.subr.bf16.mxu1 %v2456_v14 }
 0x169   : > { %2310 = vmatpush3.bf16.msra.mxu1 %v2456_v14 }
 0x16a   : > { %2319 = vmatprep.subr.bf16.mxu1 %v2457_v15 }
 0x16c   : > { %2312 = vmatmul.mubr.msk.bf16.vlgmr.msra.gmra.mrb[0].mxu1 %vm512_vm0, %v2781_v1  ;;  %v1567_v1 = vld [vmem:[#allocation2 + $0x92] sm:$0xff] }
 0x16d   : > { %2320 = vmatpush3.bf16.msra.mxu1 %v2457_v15  ;;  %2315 = vmatprep.mubr.msk.bf16.mxu1 %vm512_vm0, %v2805_v16  ;;  %v1571_v16 = vpack.c.bf16 %v1567_v1, %v1179_v5 }
 0x16e   : > { %2321 = vmatprep.subr.bf16.mxu1 %v2458_v18 }
 0x171   : > { %2322 = vmatpush3.bf16.msra.mxu1 %v2458_v18 }
 0x172   : > { %2323 = vmatprep.subr.bf16.mxu1 %v2459_v45 }
 0x174   : > { %2316 = vmatmul.mubr.msk.bf16.gmra.mrb[4].mxu1 %vm512_vm0, %v1442_v24 }
 0x175   : > { %2324 = vmatpush3.bf16.msra.mxu1 %v2459_v45  ;;  %2327 = vmatprep.mubr.msk.bf16.mxu1 %vm512_vm0, %v2747_v46  ;;  %v2463_v46 = vld [vmem:[%s3035_s5 + $0x4] ss:$8 sps:$4 sm:$0xff]  }
 0x176   : > { %2325 = vmatprep.subr.bf16.mxu1 %v2460_v29  ;;  %1788 = vmatprep.subr.bf16.mxu0 %v2463_v46 }
 0x177   : > { %1789 = vmatpush1.bf16.msra.mxu0 %v2461_v30 }
 0x178   : > { %1790 = vmatprep.subr.bf16.mxu0 %v2466_v35 }
 0x179   : > { %2326 = vmatpush3.bf16.msra.mxu1 %v2460_v29 }
 0x17c   : > { %2328 = vmatmul.mubr.msk.bf16.vlgmr.msra.gmra.mrb[0].mxu1 %vm512_vm0, %v2785_v52  ;;  %v2464_v52 = vld [vmem:[%s3035_s5 + $0x10] ss:$8 sps:$4 sm:$0xff]  }
 0x17d   : > { %2331 = vmatprep.mubr.msk.bf16.mxu1 %vm512_vm0, %v2809_v17  ;;  %1791 = vmatpush1.bf16.msra.mxu0 %v2464_v52  ;;  %v2469_v17 = vld [vmem:[%s3035_s5 + $0x24] ss:$8 sps:$4 sm:$0xff]  }
 0x17e   : > { %1792 = vmatprep.subr.bf16.mxu0 %v2469_v17 }
 0x181   : > { %1793 = vmatpush1.bf16.msra.mxu0 %v2467_v36 }
 0x182   : > { %1794 = vmatprep.subr.bf16.mxu0 %v2472_v43  ;;  %v1726_v43 = vlaneseq }
 0x184   : > { %2332 = vmatmul.mubr.msk.bf16.gmra.mrb[4].mxu1 %vm512_vm0, %v1571_v16 }
 0x185   : > { %1795 = vmatpush1.bf16.msra.mxu0 %v2470_v44  ;;  %v1727_v44 = vshrl.u32 %v1726_v43, 7 }
 0x1fe   : > { %v2217_v48 = vpop.f32.mrb[16].mxu0 }
 0x1ff   : > { %v754_v51 = vpop.f32.mrb[17].mxu0 }
 0x200   : > { %v2218_v53 = vpop.f32.mrb[18].mxu0 }
 0x201   : > { %v757_v54 = vpop.f32.mrb[19].mxu0 }
 0x206   : > { %v2221_v55 = vpop.f32.mrb[20].mxu0 }
 0x207   : > { %v770_v56 = vpop.f32.mrb[21].mxu0 }
 0x208   : > { %v2222_v57 = vpop.f32.mrb[22].mxu0 }
 0x209   : > { %v773_v58 = vpop.f32.mrb[23].mxu0 }
 0x24f   : > { %v2329_v59 = vpop.f32.mrb[0].mxu1 }
 0x250   : > { %v2335_v9 = vadd.f32 %v2329_v59, %v2217_v48  ;;  %v1650_v39 = vpop.f32.mrb[1].mxu1  ;;  %v1728_v48 = vsub.s32 0, %v1727_v44 }
 0x251   : > { %v2336_v61 = vadd.f32 %v1650_v39, %v754_v51  ;;  %v2330_v0 = vpop.f32.mrb[2].mxu1  ;;  %v1724_v51 = vld [vmem:[%s3036_s6] sm:$0x3] }
 0x252   : > { %v1698_v40 = vadd.f32 %v2335_v9, %v2062_v60  ;;  %v2337_v62 = vadd.f32 %v2330_v0, %v2218_v53  ;;  %v1653_v49 = vpop.f32.mrb[3].mxu1  ;;  %v1732_v53 = vsub.s32 1, %v1727_v44 }
 0x253   : > { %v1696_v2 = vadd.f32 %v2336_v61, %v2062_v60  ;;  %v2338_v3 = vadd.f32 %v1653_v49, %v757_v54  ;;  %v2968_v54 = vrot.slane %v1724_v51, %v1728_v48 }
 0x254   : > { %v1699_v4 = vadd.f32 %v2337_v62, %v2062_v60  ;;  %v1706_v41 = vmax.f32 %v1698_v40, 0.0 }
 0x255   : > { %v1697_v10 = vadd.f32 %v2338_v3, %v2062_v60  ;;  %v1704_v42 = vmax.f32 %v1696_v2, 0.0 }
 0x256   : > { %v1707_v5 = vmax.f32 %v1699_v4, 0.0 }
 0x257   : > { %v1705_v50 = vmax.f32 %v1697_v10, 0.0  ;;  %v2333_v63 = vpop.f32.mrb[4].mxu1 }
 0x258   : > { %v1713_v6 = vpack.c.bf16 %v1707_v5, %v1706_v41  ;;  %v2339_v7 = vadd.f32 %v2333_v63, %v2221_v55  ;;  %v1666_v8 = vpop.f32.mrb[5].mxu1  ;;  %v2970_v55 = vrot.slane %v1724_v51, %v1732_v53 }
 0x259   : > { %v1712_v13 = vpack.c.bf16 %v1705_v50, %v1704_v42  ;;  %v2340_v14 = vadd.f32 %v1666_v8, %v770_v56  ;;  %v2334_v15 = vpop.f32.mrb[6].mxu1 }
 0x25a   : > { %v1702_v18 = vadd.f32 %v2339_v7, %v2062_v60  ;;  %v2341_v45 = vadd.f32 %v2334_v15, %v2222_v57  ;;  %v1669_v23 = vpop.f32.mrb[7].mxu1 }
 0x25b   : > { %v1700_v24 = vadd.f32 %v2340_v14, %v2062_v60  ;;  %v2342_v29 = vadd.f32 %v1669_v23, %v773_v58  ;;  %2071 = vmatmul.mubr.msk.bf16.vlgmr.msra.gmra.mrb[24].mxu0 %vm512_vm0, %v1712_v13 }
 0x25c   : > { %v1703_v1 = vadd.f32 %v2341_v45, %v2062_v60  ;;  %1830 = vmatprep.mubr.bf16.mxu0 %v2482_v47  ;;  %v1710_v30 = vmax.f32 %v1702_v18, 0.0 }
 0x25d   : > { %v1701_v16 = vadd.f32 %v2342_v29, %v2062_v60  ;;  %v1708_v35 = vmax.f32 %v1700_v24, 0.0 }
 0x25e   : > { %v1711_v46 = vmax.f32 %v1703_v1, 0.0 }
 0x25f   : > { %v1709_v52 = vmax.f32 %v1701_v16, 0.0 }
 0x260   : > { %v1715_v17 = vpack.c.bf16 %v1711_v46, %v1710_v30 }
 0x261   : > { %v1714_v36 = vpack.c.bf16 %v1709_v52, %v1708_v35 }
 0x263   : > { %2072 = vmatmul.mubr.msk.bf16.gmra.mrb[28].mxu0 %vm512_vm0, %v1713_v6 }
 0x264   : > { %1840 = vmatprep.mubr.bf16.mxu0 %v2482_v47 }
 0x26b   : > { %2073 = vmatmul.mubr.msk.bf16.gmra.mrb[32].mxu0 %vm512_vm0, %v1714_v36 }
 0x26c   : > { %1850 = vmatprep.mubr.bf16.mxu0 %v2482_v47 }
 0x273   : > { %2074 = vmatmul.mubr.msk.bf16.gmra.mrb[36].mxu0 %vm512_vm0, %v1715_v17 }
 0x32e   : > { %v1822_v56 = vpop.f32.mrb[24].mxu0 }
 0x32f   : > { %v1823_v57 = vadd.f32 %v1822_v56, %v2968_v54  ;;  %v1824_v58 = vpop.f32.mrb[25].mxu0 }
 0x330   : > { %v1825_v47 = vadd.f32 %v1824_v58, %v2970_v55  ;;  %v1826_v59 = vpop.f32.mrb[26].mxu0 }
 0x331   : > { %v1861_v60 = vadd.f32 %v1823_v57, %v2598_v19  ;;  %v1827_v9 = vadd.f32 %v1826_v59, %v2968_v54  ;;  %v1828_v39 = vpop.f32.mrb[27].mxu0 }
 0x332   : > { %v1862_v61 = vadd.f32 %v1825_v47, %v2575_v11  ;;  %v1829_v0 = vadd.f32 %v1828_v39, %v2970_v55 }
 0x333   : > { %v1877_v40 = vmax.f32 %v1861_v60, 0.0  ;;  %v1863_v19 = vadd.f32 %v1827_v9, %v2601_v20 }
 0x334   : > { %v1878_v62 = vmax.f32 %v1862_v61, 0.0  ;;  %v1864_v49 = vadd.f32 %v1829_v0, %v2578_v12 }
 0x335   : > { %1893 = vst [vmem:[%s2981_s14] sm:$0xff] %v1877_v40  ;;  %v1879_v2 = vmax.f32 %v1863_v19, 0.0 }
 0x336   : > { %1894 = vst [vmem:[%s2981_s14 + $0x8] sm:$0xff] %v1878_v62  ;;  %v1880_v3 = vmax.f32 %v1864_v49, 0.0  ;;  %v1832_v4 = vpop.f32.mrb[28].mxu0 }
 0x337   : > { %1895 = vst [vmem:[%s2981_s14 + $0x10] sm:$0xff] %v1879_v2  ;;  %v1833_v10 = vadd.f32 %v1832_v4, %v2968_v54  ;;  %v1834_v41 = vpop.f32.mrb[29].mxu0 }
 0x338   : > { %1896 = vst [vmem:[%s2981_s14 + $0x18] sm:$0xff] %v1880_v3  ;;  %v1835_v11 = vadd.f32 %v1834_v41, %v2970_v55  ;;  %v1836_v5 = vpop.f32.mrb[30].mxu0 }
 0x339   : > { %v1865_v20 = vadd.f32 %v1833_v10, %v2614_v25  ;;  %v1837_v12 = vadd.f32 %v1836_v5, %v2968_v54  ;;  %v1838_v42 = vpop.f32.mrb[31].mxu0 }
 0x33a   : > { %v1866_v50 = vadd.f32 %v1835_v11, %v2604_v21  ;;  %v1839_v63 = vadd.f32 %v1838_v42, %v2970_v55 }
 0x33b   : > { %v1881_v6 = vmax.f32 %v1865_v20, 0.0  ;;  %v1867_v7 = vadd.f32 %v1837_v12, %v2617_v26 }
 0x33c   : > { %v1882_v8 = vmax.f32 %v1866_v50, 0.0  ;;  %v1868_v13 = vadd.f32 %v1839_v63, %v2607_v22 }
 0x33d   : > { %1897 = vst [vmem:[%s2981_s14 + $0x20] sm:$0xff] %v1881_v6  ;;  %v1883_v14 = vmax.f32 %v1867_v7, 0.0 }
 0x33e   : > { %1898 = vst [vmem:[%s2981_s14 + $0x28] sm:$0xff] %v1882_v8  ;;  %v1884_v15 = vmax.f32 %v1868_v13, 0.0  ;;  %v1842_v18 = vpop.f32.mrb[32].mxu0 }
 0x33f   : > { %1899 = vst [vmem:[%s2981_s14 + $0x30] sm:$0xff] %v1883_v14  ;;  %v1843_v25 = vadd.f32 %v1842_v18, %v2968_v54  ;;  %v1844_v45 = vpop.f32.mrb[33].mxu0 }
 0x340   : > { %1900 = vst [vmem:[%s2981_s14 + $0x38] sm:$0xff] %v1884_v15  ;;  %v1845_v21 = vadd.f32 %v1844_v45, %v2970_v55  ;;  %v1846_v23 = vpop.f32.mrb[34].mxu0 }
 0x341   : > { %v1869_v26 = vadd.f32 %v1843_v25, %v2630_v31  ;;  %v1847_v22 = vadd.f32 %v1846_v23, %v2968_v54  ;;  %v1848_v24 = vpop.f32.mrb[35].mxu0 }
 0x342   : > { %v1870_v29 = vadd.f32 %v1845_v21, %v2620_v27  ;;  %v1849_v1 = vadd.f32 %v1848_v24, %v2970_v55 }
 0x343   : > { %v1885_v16 = vmax.f32 %v1869_v26, 0.0  ;;  %v1871_v30 = vadd.f32 %v1847_v22, %v2633_v32 }
 0x344   : > { %v1886_v46 = vmax.f32 %v1870_v29, 0.0  ;;  %v1872_v35 = vadd.f32 %v1849_v1, %v2623_v28 }
 0x345   : > { %1901 = vst [vmem:[%s2981_s14 + $0x40] sm:$0xff] %v1885_v16  ;;  %v1887_v52 = vmax.f32 %v1871_v30, 0.0 }
 0x346   : > { %1902 = vst [vmem:[%s2981_s14 + $0x48] sm:$0xff] %v1886_v46  ;;  %v1888_v17 = vmax.f32 %v1872_v35, 0.0  ;;  %v1852_v36 = vpop.f32.mrb[36].mxu0 }
 0x347   : > { %1903 = vst [vmem:[%s2981_s14 + $0x50] sm:$0xff] %v1887_v52  ;;  %v1853_v31 = vadd.f32 %v1852_v36, %v2968_v54  ;;  %v1854_v43 = vpop.f32.mrb[37].mxu0 }
 0x348   : > { %1904 = vst [vmem:[%s2981_s14 + $0x58] sm:$0xff] %v1888_v17  ;;  %v1855_v27 = vadd.f32 %v1854_v43, %v2970_v55  ;;  %v1856_v32 = vpop.f32.mrb[38].mxu0 }
 0x349   : > { %v1873_v44 = vadd.f32 %v1853_v31, %v2646_v37  ;;  %v1857_v28 = vadd.f32 %v1856_v32, %v2968_v54  ;;  %v1858_v48 = vpop.f32.mrb[39].mxu0 }
 0x34a   : > { %v1874_v51 = vadd.f32 %v1855_v27, %v2636_v33  ;;  %v1859_v53 = vadd.f32 %v1858_v48, %v2970_v55 }
 0x34b   : > { %v1889_v56 = vmax.f32 %v1873_v44, 0.0  ;;  %v1875_v57 = vadd.f32 %v1857_v28, %v2649_v38 }
 0x34c   : > { %v1890_v58 = vmax.f32 %v1874_v51, 0.0  ;;  %v1876_v47 = vadd.f32 %v1859_v53, %v2639_v34 }
 0x34d   : > { %1905 = vst [vmem:[%s2981_s14 + $0x60] sm:$0xff] %v1889_v56  ;;  %v1891_v59 = vmax.f32 %v1875_v57, 0.0 }
 0x34e   : > { %1906 = vst [vmem:[%s2981_s14 + $0x68] sm:$0xff] %v1890_v58  ;;  %v1892_v60 = vmax.f32 %v1876_v47, 0.0 }
 0x34f   : > { %1907 = vst [vmem:[%s2981_s14 + $0x70] sm:$0xff] %v1891_v59 }
 0x350   : > { %1908 = vst [vmem:[%s2981_s14 + $0x78] sm:$0xff] %v1892_v60 }
 0x351 PF: > { %s17_s24 = sadd.s32 1, %s2479_s24  }
 0x352   : > { %p14_p4 = scmp.ge.s32.totalorder %s17_s24, 4  }
 0x354   :  { %16 = sbr.rel (!%p14_p4) target bundleno = 1 (0x1), region = 80 }

// kernel: shared_module_bh_forward.17
= control target key start
LH: loop header
LB: loop body
LE: loop exit
PB: predicated region body
PF: predicated region fallthrough
CT: control target
= control target key end

     0   :  { %12 = vsyncpa [#allocation4], 0  ;;  %s3226_s0 = inlined_call_operand.vmem [shape: f32[2,8,8,256], index: 0, kind: input, shape index: {}]   ;;  %s3227_s1 = inlined_call_operand.vmem [shape: bf16[256,64], index: 1, kind: input, shape index: {}]   ;;  %s3228_s2 = inlined_call_operand.vmem [shape: f32[1,64], index: 2, kind: input, shape index: {}]   ;;  %s3229_s3 = inlined_call_operand.vmem [shape: bf16[576,64], index: 3, kind: input, shape index: {}]   ;;  %s3230_s4 = inlined_call_operand.vmem [shape: f32[1,64], index: 4, kind: input, shape index: {}]   ;;  %s3231_s5 = inlined_call_operand.vmem [shape: bf16[64,256], index: 5, kind: input, shape index: {}]   ;;  %s3232_s6 = inlined_call_operand.vmem [shape: f32[1,256], index: 6, kind: input, shape index: {}]   ;;  %s3233_s7 = inlined_call_operand.hbm [shape: f32[2,64,256], index: 7, kind: output, shape index: {}]  }
   0x1   :  { %14 = vsyncpa [#allocation4 + $0x1], 0  ;;  %s2635_s24 = smov 0   ;;  %s2637_s25 = smov 0  }
   0x2   :  { %s2639_s26 = smov 0   ;;  %s2641_s27 = smov 0  }
   0x3 LB: > { %s2656_s28 = sadd.s32 4294967295, %s2588_s27   ;;  %s1983_s29 = sadd.s32 4294967294, %s2588_s27   ;;  %s2588_s27 = sphi %s2641_s27, %s3239_s27   ;;  %s2584_s26 = sphi %s2639_s26, %s3238_s26   ;;  %s2580_s25 = sphi %s2637_s25, %s3237_s25   ;;  %s2576_s24 = sphi %s2635_s24, %s3236_s24  }
   0x4   : > { %s2660_s30 = sadd.s32 1, %s2588_s27   ;;  %s179_s8 = sadd.s32 1, %s2584_s26 }
   0x5   : > { %s176_s9 = ssub.s32 %s2588_s27, %s2660_s30  ;;  %p189_p0 = scmp.ne.s32.totalorder %s2584_s26, %s2580_s25 }
   0x6   : > { %p177_p1 = scmp.eq.s32.totalorder %s176_s9, 0  ;;  %p190_p2 = scmp.eq.s32.totalorder %s2656_s28, 1 }
   0x7   : > { %p195_p3 = scmp.ne.s32.totalorder %s2580_s25, %s2576_s24  ;;  %p196_p4 = scmp.eq.s32.totalorder %s1983_s29, 1 }
   0x8   : > { %s2671_s10 = scalar_select %p177_p1, %s2584_s26, %s179_s8  }
   0x9   : > { %p2673_p5 = por %p190_p2, %p189_p0  ;;  %p2677_p6 = por %p196_p4, %p195_p3 }
   0xa   : > { %p1986_p7 = scmp.ge.s32.totalorder %s2588_s27, 1  ;;  %p240_p8 = scmp.lt.s32.totalorder %s2588_s27, 3 }
   0xc   : > { %p241_p9 = pnand %p1986_p7, %p240_p8 }
   0xd   : > { %v2462_v0 = vld [vmem:[%s3227_s1 + $0x40] sm:$0xff] (!%p241_p9)   ;;  %v2464_v2 = vld [vmem:[%s3227_s1 + $0x48] sm:$0xff] (!%p241_p9)   ;;  %p272_p10 = scmp.lt.s32.totalorder (!%p241_p9), %s2656_s28, 1  ;;  %v2466_v4 = vld [vmem:[%s3227_s1 + $0x50] sm:$0xff] (!%p241_p9)   ;;  %vm510_vm0 = vcmask (!%p241_p9), 523264   ;;  %vm512_vm1 = vcmask (!%p241_p9), 517120  }
   0xe   : > { %244 = sbr.rel (%p241_p9) target bundleno = 871 (0x367), region = 48  ;;  %v2463_v1 = vld [vmem:[%s3227_s1] sm:$0xff] (!%p241_p9)   ;;  %2099 = vmatprep.subr.bf16.mxu0 (!%p241_p9), %v2462_v0  ;;  %v2465_v3 = vld [vmem:[%s3227_s1 + $0x8] sm:$0xff] (!%p241_p9)   ;;  %v2467_v5 = vld [vmem:[%s3227_s1 + $0x10] sm:$0xff] (!%p241_p9)   ;;  %v2590_v40 = vmov (!%p241_p9), 0.0   ;;  %s269_s18 = sand.u32 (!%p241_p9), 1, %s2580_s25  }
   0xf   : > { %2100 = vmatpush3.bf16.msra.mxu0 (!%p241_p9), %v2463_v1  ;;  %v2468_v6 = vld [vmem:[%s3227_s1 + $0x58] sm:$0xff] (!%p241_p9)   ;;  %v2470_v8 = vld [vmem:[%s3227_s1 + $0x60] sm:$0xff] (!%p241_p9)   ;;  %v2472_v10 = vld [vmem:[%s3227_s1 + $0x68] sm:$0xff] (!%p241_p9)   ;;  %514 = vst.msk [vmem:[#allocation2 + $0x10] sm:$0xff] (!%p241_p9), %vm510_vm0, %v2590_v40  ;;  %s1987_s19 = sshll.u32 (!%p241_p9), %s269_s18, 7  ;;  %s2098_s22 = sshll.u32 (!%p241_p9), %s2656_s28, 11 }
  0x10   : > { %2101 = vmatprep.subr.bf16.mxu0 (!%p241_p9), %v2464_v2  ;;  %v2469_v7 = vld [vmem:[%s3227_s1 + $0x18] sm:$0xff] (!%p241_p9)   ;;  %v2471_v9 = vld [vmem:[%s3227_s1 + $0x20] sm:$0xff] (!%p241_p9)   ;;  %v2473_v14 = vld [vmem:[%s3227_s1 + $0x28] sm:$0xff] (!%p241_p9)   ;;  %515 = vst.msk [vmem:[#allocation2 + $0x18] sm:$0x3] (!%p241_p9), %vm512_vm1, %v2590_v40  ;;  %s3132_s20 = scalar_lea.vmem (!%p241_p9), [#allocation3], %s1987_s19  ;;  %s3176_s8 = scalar_lea.hbm (!%p241_p9), %s3233_s7, %s2098_s22 }
  0x11   : > { %v2474_v15 = vld [vmem:[%s3227_s1 + $0x70] sm:$0xff] (!%p241_p9)   ;;  %v2476_v17 = vld [vmem:[%s3227_s1 + $0x78] sm:$0xff] (!%p241_p9)   ;;  %511 = vst.msk [vmem:[#allocation2] sm:$0xff] (!%p241_p9), %vm510_vm0, %v2590_v40  ;;  %516 = vst.msk [vmem:[#allocation2 + $0x20] sm:$0xff] (!%p241_p9), %vm510_vm0, %v2590_v40  ;;  %s2592_s13 = smov (!%p241_p9), [#allocation3]  }
  0x12   : > { %v2475_v16 = vld [vmem:[%s3227_s1 + $0x30] sm:$0xff] (!%p241_p9)   ;;  %v2477_v18 = vld [vmem:[%s3227_s1 + $0x38] sm:$0xff] (!%p241_p9)   ;;  %513 = vst.msk [vmem:[#allocation2 + $0x8] sm:$0x3] (!%p241_p9), %vm512_vm1, %v2590_v40  ;;  %517 = vst.msk [vmem:[#allocation2 + $0x28] sm:$0x3] (!%p241_p9), %vm512_vm1, %v2590_v40 }
  0x13   : > { %2102 = vmatpush3.bf16.msra.mxu0 (!%p241_p9), %v2465_v3  ;;  %518 = vst.msk [vmem:[#allocation2 + $0x30] sm:$0xff] (!%p241_p9), %vm510_vm0, %v2590_v40  ;;  %520 = vst.msk [vmem:[#allocation2 + $0x40] sm:$0xff] (!%p241_p9), %vm510_vm0, %v2590_v40  ;;  %v2478_v41 = vld [vmem:[%s3229_s3 + $0x20] sm:$0xff] (!%p241_p9)   ;;  %v2480_v43 = vld [vmem:[%s3229_s3 + $0x28] sm:$0xff] (!%p241_p9)  }
  0x14   : > { %2103 = vmatprep.subr.bf16.mxu0 (!%p241_p9), %v2466_v4  ;;  %519 = vst.msk [vmem:[#allocation2 + $0x38] sm:$0x3] (!%p241_p9), %vm512_vm1, %v2590_v40  ;;  %521 = vst.msk [vmem:[#allocation2 + $0x48] sm:$0x3] (!%p241_p9), %vm512_vm1, %v2590_v40  ;;  %v2479_v42 = vld [vmem:[%s3229_s3 + $0x40] sm:$0xff] (!%p241_p9)   ;;  %v2481_v44 = vld [vmem:[%s3229_s3 + $0x48] sm:$0xff] (!%p241_p9)  }
  0x15   : > { %s273_s23 = scalar_select %p272_p10, %s2656_s28, 1  ;;  %522 = vst.msk [vmem:[#allocation2 + $0x50] sm:$0xff] %vm510_vm0, %v2590_v40  ;;  %524 = vst.msk [vmem:[#allocation2 + $0x60] sm:$0xff] %vm510_vm0, %v2590_v40  ;;  %2243 = vmatprep.subr.bf16.mxu1 %v2479_v42  ;;  %v2482_v45 = vld [vmem:[%s3229_s3 + $0x30] sm:$0xff]   ;;  %v2484_v47 = vld [vmem:[%s3229_s3 + $0x38] sm:$0xff]  }
  0x16   : > { %523 = vst.msk [vmem:[#allocation2 + $0x58] sm:$0x3] %vm512_vm1, %v2590_v40  ;;  %525 = vst.msk [vmem:[#allocation2 + $0x68] sm:$0x3] %vm512_vm1, %v2590_v40  ;;  %2244 = vmatpush3.bf16.msra.mxu1 %v2479_v42  ;;  %v2483_v46 = vld [vmem:[%s3229_s3 + $0x50] sm:$0xff]   ;;  %v2485_v48 = vld [vmem:[%s3229_s3 + $0x58] sm:$0xff]  }
  0x17   : > { %s2097_s14 = sshll.u32 %s273_s23, 7  ;;  %2104 = vmatpush3.bf16.msra.mxu0 %v2467_v5  ;;  %526 = vst.msk [vmem:[#allocation2 + $0x70] sm:$0xff] %vm510_vm0, %v2590_v40  ;;  %528 = vst.msk [vmem:[#allocation2 + $0x80] sm:$0xff] %vm510_vm0, %v2590_v40  ;;  %2245 = vmatprep.subr.bf16.mxu1 %v2481_v44  ;;  %v2849_v49 = vld [vmem:[%s3229_s3 + $0x60] sm:$0xff]   ;;  %s3185_s28 = scalar_lea.sflag [#allocation4], %s269_s18 }
  0x18   : > { %2105 = vmatprep.subr.bf16.mxu0 %v2468_v6  ;;  %s2715_s21 = scalar_lea.vmem %s3226_s0, %s2097_s14  ;;  %527 = vst.msk [vmem:[#allocation2 + $0x78] sm:$0x3] %vm512_vm1, %v2590_v40  ;;  %529 = vst.msk [vmem:[#allocation2 + $0x88] sm:$0x3] %vm512_vm1, %v2590_v40  ;;  %v2854_v50 = vld [vmem:[%s3229_s3] sm:$0xff]   ;;  %s2530_s14 = sshll.u32 %s2592_s13, 4  ;;  %s2531_s14 = int_to_ptr.vmem [resolvable:$false] %s2530_s14 }
  0x19   : > { %v2724_v11 = vld [vmem:[%s2715_s21 + $0x8] sm:$0xff]  ;;  %v2727_v12 = vld [vmem:[%s2715_s21 + $0x18] sm:$0xff]  ;;  %v2747_v19 = vld [vmem:[%s2715_s21] sm:$0xff]  ;;  %530 = vst.msk [vmem:[#allocation2 + $0x90] sm:$0xff] %vm510_vm0, %v2590_v40  ;;  %s2532_s15 = scalar_lea.vmem %s2531_s14, 4096 }
  0x1a   : > { %v295_v13 = vpack.c.bf16 %v2727_v12, %v2724_v11  ;;  %v2750_v20 = vld [vmem:[%s2715_s21 + $0x10] sm:$0xff]  ;;  %v2753_v21 = vld [vmem:[%s2715_s21 + $0x28] sm:$0xff]  ;;  %v2756_v22 = vld [vmem:[%s2715_s21 + $0x38] sm:$0xff]  ;;  %531 = vst.msk [vmem:[#allocation2 + $0x98] sm:$0x3] %vm512_vm1, %v2590_v40  ;;  %2246 = vmatpush3.bf16.msra.mxu1 %v2481_v44 }
  0x1b   : > { %2106 = vmatpush3.bf16.msra.mxu0 %v2469_v7  ;;  %v294_v23 = vpack.c.bf16 %v2750_v20, %v2747_v19  ;;  %v297_v24 = vpack.c.bf16 %v2756_v22, %v2753_v21  ;;  %v2763_v25 = vld [vmem:[%s2715_s21 + $0x20] sm:$0xff]  ;;  %v2766_v26 = vld [vmem:[%s2715_s21 + $0x30] sm:$0xff]  ;;  %v2769_v27 = vld [vmem:[%s2715_s21 + $0x48] sm:$0xff]  ;;  %2247 = vmatprep.subr.bf16.mxu1 %v2483_v46 }
  0x1c   : > { %2107 = vmatprep.subr.bf16.mxu0 %v2470_v8  ;;  %469 = vmatprep.mubr.bf16.mxu0 %v295_v13  ;;  %v2772_v28 = vld [vmem:[%s2715_s21 + $0x58] sm:$0xff]  ;;  %v296_v29 = vpack.c.bf16 %v2766_v26, %v2763_v25  ;;  %v2779_v31 = vld [vmem:[%s2715_s21 + $0x40] sm:$0xff]  ;;  %v2782_v32 = vld [vmem:[%s2715_s21 + $0x50] sm:$0xff] }
  0x1d   : > { %v299_v30 = vpack.c.bf16 %v2772_v28, %v2769_v27  ;;  %v2785_v33 = vld [vmem:[%s2715_s21 + $0x68] sm:$0xff]  ;;  %v2788_v34 = vld [vmem:[%s2715_s21 + $0x78] sm:$0xff]  ;;  %v298_v35 = vpack.c.bf16 %v2782_v32, %v2779_v31  ;;  %v2795_v37 = vld [vmem:[%s2715_s21 + $0x60] sm:$0xff] }
  0x1e   : > { %v301_v36 = vpack.c.bf16 %v2788_v34, %v2785_v33  ;;  %v2798_v38 = vld [vmem:[%s2715_s21 + $0x70] sm:$0xff]  ;;  %2248 = vmatpush3.bf16.msra.mxu1 %v2483_v46  ;;  %v2861_v52 = vld [vmem:[%s3228_s2] ss:$0 sm:$0xff]  ;;  %v561_v5 = vld [vmem:[#allocation2 + $0x1] sm:$0xff]  ;;  %s1921_s21 = sshll.u32 %s3132_s20, 4  ;;  %s3178_s21 = int_to_ptr.vmem [resolvable:$true] %s1921_s21 }
  0x1f   : > { %2108 = vmatpush3.bf16.msra.mxu0 %v2471_v9  ;;  %v300_v39 = vpack.c.bf16 %v2798_v38, %v2795_v37  ;;  %2249 = vmatprep.subr.bf16.mxu1 %v2485_v48  ;;  %v783_v6 = vld [vmem:[#allocation2 + $0x2] sm:$0xff]  ;;  %s2526_s9 = scalar_lea.vmem %s3178_s21, 2048  ;;  %p2533_p0 = scmp.lt.s32.totalorder %s3178_s21, %s2531_s14 }
  0x20   : > { %2109 = vmatprep.subr.bf16.mxu0 %v2472_v10  ;;  %p2527_p11 = scmp.ne.s32.totalorder %s3178_s21, %s2526_s9  ;;  %p2534_p1 = scmp.lt.s32.totalorder %s2532_s15, %s2526_s9 }
  0x22   : > { %2250 = vmatpush3.bf16.msra.mxu1 %v2485_v48  ;;  %v2489_v48 = vld [vmem:[%s3229_s3 + $0x8] sm:$0xff]   ;;  %p2528_p12 = pnand %p2527_p11, %p2673_p5  ;;  %p2535_p2 = por %p2534_p1, %p2533_p0 }
  0x23   : > { %2110 = vmatpush3.bf16.msra.mxu0 %v2473_v14  ;;  %2259 = vmatprep.subr.bf16.mxu1 %v2849_v49 }
  0x24   : > { %2111 = vmatprep.subr.bf16.mxu0 %v2474_v15  ;;  %p2529_p13 = pneg %p2528_p12 }
  0x26   : > { %p2536_p3 = pnand %p2535_p2, %p2529_p13 }
  0x27   : > { %2112 = vmatpush3.bf16.msra.mxu0 %v2475_v16 }
  0x28   : > { %2113 = vmatprep.subr.bf16.mxu0 %v2476_v17 }
  0x2b   : > { %2114 = vmatpush3.bf16.msra.mxu0 %v2477_v18 }
  0x2c   : > { %2211 = vmatprep.subr.bf16.mxu0 %v2478_v41 }
  0x2e   : > { %470 = vmatmul.mubr.bf16.vlgmr.msra.gmra.mrb[0].mxu0 %v294_v23 }
  0x2f   : > { %477 = vmatprep.mubr.bf16.mxu0 %v297_v24  ;;  %2212 = vmatpush3.bf16.msra.mxu0 %v2478_v41 }
  0x30   : > { %2213 = vmatprep.subr.bf16.mxu0 %v2480_v43 }
  0x33   : > { %2214 = vmatpush3.bf16.msra.mxu0 %v2480_v43 }
  0x34   : > { %2215 = vmatprep.subr.bf16.mxu0 %v2482_v45 }
  0x36   : > { %478 = vmatmul.mubr.bf16.gmra.mrb[4].mxu0 %v296_v29 }
  0x37   : > { %485 = vmatprep.mubr.bf16.mxu0 %v299_v30  ;;  %2216 = vmatpush3.bf16.msra.mxu0 %v2482_v45 }
  0x38   : > { %2217 = vmatprep.subr.bf16.mxu0 %v2484_v47 }
  0x3b   : > { %2218 = vmatpush3.bf16.msra.mxu0 %v2484_v47  ;;  %v2488_v47 = vld [vmem:[%s3229_s3 + $0x68] sm:$0xff]  }
  0x3c   : > { %2227 = vmatprep.subr.bf16.mxu0 %v2854_v50 }
  0x3e   : > { %486 = vmatmul.mubr.bf16.gmra.mrb[8].mxu0 %v298_v35 }
  0x3f   : > { %493 = vmatprep.mubr.bf16.mxu0 %v301_v36 }
  0x46   : > { %494 = vmatmul.mubr.bf16.gmra.mrb[12].mxu0 %v300_v39 }
 0x101   : > { %v2115_v51 = vpop.f32.mrb[0].mxu0 }
 0x102   : > { %v2116_v53 = vpop.f32.mrb[1].mxu0 }
 0x103   : > { %v2117_v54 = vadd.f32 %v2116_v53, %v2115_v51  ;;  %v2118_v55 = vpop.f32.mrb[2].mxu0 }
 0x104   : > { %v2119_v56 = vpop.f32.mrb[3].mxu0 }
 0x105   : > { %v472_v57 = vadd.f32 %v2117_v54, %v2861_v52  ;;  %v2120_v58 = vadd.f32 %v2119_v56, %v2118_v55 }
 0x107   : > { %v502_v59 = vmax.f32 %v472_v57, 0.0  ;;  %v475_v60 = vadd.f32 %v2120_v58, %v2861_v52  ;;  %v2490_v58 = vld [vmem:[%s3229_s3 + $0x70] sm:$0xff]  }
 0x109   : > { %533 = vst.msk [vmem:[#allocation2 + $0x11] sm:$0xff] %vm510_vm0, %v502_v59  ;;  %v503_v61 = vmax.f32 %v475_v60, 0.0  ;;  %v2121_v62 = vpop.f32.mrb[4].mxu0  ;;  %v2491_v59 = vld [vmem:[%s3229_s3 + $0x10] sm:$0xff]  }
 0x10a   : > { %v2122_v63 = vpop.f32.mrb[5].mxu0 }
 0x10b   : > { %534 = vst.msk [vmem:[#allocation2 + $0x21] sm:$0xff] %vm510_vm0, %v503_v61  ;;  %v2123_v0 = vadd.f32 %v2122_v63, %v2121_v62  ;;  %v2124_v1 = vpop.f32.mrb[6].mxu0 }
 0x10c   : > { %v2125_v2 = vpop.f32.mrb[7].mxu0 }
 0x10d   : > { %v480_v3 = vadd.f32 %v2123_v0, %v2861_v52  ;;  %v2126_v4 = vadd.f32 %v2125_v2, %v2124_v1  ;;  %v2492_v2 = vld [vmem:[%s3229_s3 + $0x78] sm:$0xff]  }
 0x10f   : > { %v504_v7 = vmax.f32 %v480_v3, 0.0  ;;  %v483_v8 = vadd.f32 %v2126_v4, %v2861_v52  ;;  %v2493_v3 = vld [vmem:[%s3229_s3 + $0x18] sm:$0xff]   ;;  %v2494_v4 = vld [vmem:[%s3229_s3 + $0x80] sm:$0xff]  }
 0x110   : > { %v2869_v9 = vld [vmem:[#allocation2 + $0x11] sm:$0xff] }
 0x111   : > { %v2871_v10 = vld [vmem:[#allocation2 + $0x12] sm:$0xff]  ;;  %535 = vst.msk [vmem:[#allocation2 + $0x31] sm:$0xff] %vm510_vm0, %v504_v7  ;;  %v505_v13 = vmax.f32 %v483_v8, 0.0  ;;  %v2127_v14 = vpop.f32.mrb[8].mxu0  ;;  %v569_v15 = vpack.c.bf16 %v2869_v9, %v561_v5  ;;  %v541_v5 = vld [vmem:[#allocation2] sm:$0xff] }
 0x112   : > { %v791_v16 = vpack.c.bf16 %v2871_v10, %v783_v6  ;;  %v2128_v17 = vpop.f32.mrb[9].mxu0  ;;  %v2881_v39 = vld [vmem:[#allocation2 + $0x21] sm:$0xff]  ;;  %v542_v7 = vld [vmem:[#allocation2 + $0x10] sm:$0xff] }
 0x113   : > { %536 = vst.msk [vmem:[#allocation2 + $0x41] sm:$0xff] %vm510_vm0, %v505_v13  ;;  %v2129_v18 = vadd.f32 %v2128_v17, %v2127_v14  ;;  %v2130_v23 = vpop.f32.mrb[10].mxu0  ;;  %2219 = vmatprep.mubr.msk.bf16.mxu0 %vm510_vm0, %v569_v15  ;;  %v2885_v41 = vld [vmem:[#allocation2 + $0x22] sm:$0xff] }
 0x114   : > { %2251 = vmatprep.mubr.msk.bf16.mxu1 %vm510_vm0, %v791_v16  ;;  %v2131_v24 = vpop.f32.mrb[11].mxu0  ;;  %v913_v8 = vld [vmem:[#allocation2 + $0x20] sm:$0xff] }
 0x115   : > { %v488_v29 = vadd.f32 %v2129_v18, %v2861_v52  ;;  %v2132_v30 = vadd.f32 %v2131_v24, %v2130_v23  ;;  %v549_v18 = vpack.c.bf16 %v542_v7, %v541_v5  ;;  %v920_v23 = vpack.c.bf16 %v913_v8, %v542_v7  ;;  %v2508_v7 = vld [vmem:[%s3229_s3 + $0xf0] sm:$0xff]  }
 0x117   : > { %v506_v35 = vmax.f32 %v488_v29, 0.0  ;;  %v491_v36 = vadd.f32 %v2132_v30, %v2861_v52 }
 0x118   : > { %v2883_v40 = vld [vmem:[#allocation2 + $0x31] sm:$0xff] }
 0x119   : > { %v2887_v42 = vld [vmem:[#allocation2 + $0x32] sm:$0xff]  ;;  %537 = vst.msk [vmem:[#allocation2 + $0x51] sm:$0xff] %vm510_vm0, %v506_v35  ;;  %v507_v43 = vmax.f32 %v491_v36, 0.0  ;;  %v2133_v44 = vpop.f32.mrb[12].mxu0  ;;  %v2892_v45 = vpack.c.bf16 %v2883_v40, %v2881_v39 }
 0x11a   : > { %v2896_v46 = vpack.c.bf16 %v2887_v42, %v2885_v41  ;;  %v2134_v51 = vpop.f32.mrb[13].mxu0  ;;  %v2919_v62 = vld [vmem:[#allocation2 + $0x41] sm:$0xff]  ;;  %v544_v24 = vld [vmem:[#allocation2 + $0x30] sm:$0xff] }
 0x11b   : > { %538 = vst.msk [vmem:[#allocation2 + $0x61] sm:$0xff] %vm510_vm0, %v507_v43  ;;  %v2135_v53 = vadd.f32 %v2134_v51, %v2133_v44  ;;  %v2136_v54 = vpop.f32.mrb[14].mxu0  ;;  %2220 = vmatmul.mubr.msk.bf16.vlgmr.msra.gmra.mrb[16].mxu0 %vm510_vm0, %v2892_v45  ;;  %v915_v29 = vld [vmem:[#allocation2 + $0x40] sm:$0xff]  ;;  %v2966_v36 = vpack.c.bf16 %v544_v24, %v913_v8  ;;  %v2495_v44 = vld [vmem:[%s3229_s3 + $0x88] sm:$0xff]   ;;  %v2496_v51 = vld [vmem:[%s3229_s3 + $0x90] sm:$0xff]  }
 0x11c   : > { %2252 = vmatmul.mubr.msk.bf16.vlgmr.msra.gmra.mrb[0].mxu1 %vm510_vm0, %v2896_v46  ;;  %v2137_v55 = vpop.f32.mrb[15].mxu0  ;;  %2228 = vmatpush3.bf16.msra.mxu0 %v2854_v50  ;;  %v2923_v50 = vld [vmem:[#allocation2 + $0x42] sm:$0xff]  ;;  %v921_v43 = vpack.c.bf16 %v915_v29, %v544_v24  ;;  %v1307_v8 = vld [vmem:[#allocation2 + $0x90] sm:$0xff] }
 0x11d   : > { %2260 = vmatpush3.bf16.msra.mxu1 %v2849_v49  ;;  %v496_v56 = vadd.f32 %v2135_v53, %v2861_v52  ;;  %v2138_v57 = vadd.f32 %v2137_v55, %v2136_v54  ;;  %2229 = vmatprep.subr.bf16.mxu0 %v2489_v48 }
 0x11e   : > { %2261 = vmatprep.subr.bf16.mxu1 %v2488_v47 }
 0x11f   : > { %v508_v60 = vmax.f32 %v496_v56, 0.0  ;;  %v499_v61 = vadd.f32 %v2138_v57, %v2861_v52  ;;  %v2497_v57 = vld [vmem:[%s3229_s3 + $0x98] sm:$0xff]  }
 0x120   : > { %v2921_v49 = vld [vmem:[#allocation2 + $0x51] sm:$0xff]  ;;  %2230 = vmatpush3.bf16.msra.mxu0 %v2489_v48 }
 0x121   : > { %v2925_v63 = vld [vmem:[#allocation2 + $0x52] sm:$0xff]  ;;  %2262 = vmatpush3.bf16.msra.mxu1 %v2488_v47  ;;  %539 = vst.msk [vmem:[#allocation2 + $0x71] sm:$0xff] %vm510_vm0, %v508_v60  ;;  %v509_v0 = vmax.f32 %v499_v61, 0.0  ;;  %v2930_v1 = vpack.c.bf16 %v2921_v49, %v2919_v62  ;;  %2231 = vmatprep.subr.bf16.mxu0 %v2491_v59  ;;  %v1050_v60 = vpack.c.bf16 %v2919_v62, %v2883_v40 }
 0x122   : > { %v2934_v52 = vpack.c.bf16 %v2925_v63, %v2923_v50  ;;  %2263 = vmatprep.subr.bf16.mxu1 %v2490_v58  ;;  %v567_v6 = vld [vmem:[#allocation2 + $0x61] sm:$0xff]  ;;  %v546_v30 = vld [vmem:[#allocation2 + $0x50] sm:$0xff]  ;;  %v2501_v62 = vld [vmem:[%s3229_s3 + $0xb8] sm:$0xff]  }
 0x123   : > { %540 = vst.msk [vmem:[#allocation2 + $0x81] sm:$0xff] %vm510_vm0, %v509_v0  ;;  %2223 = vmatprep.mubr.msk.bf16.mxu0 %vm510_vm0, %v2930_v1  ;;  %v2950_v14 = vld [vmem:[#allocation2 + $0x62] sm:$0xff]  ;;  %v2971_v47 = vpack.c.bf16 %v546_v30, %v915_v29  ;;  %v2500_v61 = vld [vmem:[%s3229_s3 + $0xb0] sm:$0xff]   ;;  %v2513_v29 = vld [vmem:[%s3229_s3 + $0x118] sm:$0xff]  }
 0x124   : > { %2255 = vmatprep.mubr.msk.bf16.mxu1 %vm510_vm0, %v2934_v52  ;;  %2232 = vmatpush3.bf16.msra.mxu0 %v2491_v59  ;;  %v917_v35 = vld [vmem:[#allocation2 + $0x60] sm:$0xff] }
 0x125   : > { %2264 = vmatpush3.bf16.msra.mxu1 %v2490_v58  ;;  %2233 = vmatprep.subr.bf16.mxu0 %v2493_v3  ;;  %v922_v48 = vpack.c.bf16 %v917_v35, %v546_v30  ;;  %v1049_v58 = vpack.c.bf16 %v2881_v39, %v2869_v9  ;;  %v2498_v59 = vld [vmem:[%s3229_s3 + $0xa0] sm:$0xff]   ;;  %v2499_v9 = vld [vmem:[%s3229_s3 + $0xa8] sm:$0xff]   ;;  %v1051_v39 = vpack.c.bf16 %v567_v6, %v2921_v49 }
 0x126   : > { %2265 = vmatprep.subr.bf16.mxu1 %v2492_v2  ;;  %v1178_v49 = vpack.c.bf16 %v2885_v41, %v2871_v10  ;;  %v1180_v10 = vpack.c.bf16 %v2950_v14, %v2925_v63  ;;  %v2504_v41 = vld [vmem:[%s3229_s3 + $0xd0] sm:$0xff]   ;;  %v2506_v63 = vld [vmem:[%s3229_s3 + $0xe0] sm:$0xff]  }
 0x127   : > { %v2514_v30 = vld [vmem:[%s3231_s5] ss:$8 sps:$4 sm:$0xff]  }
 0x128   : > { %v568_v13 = vld [vmem:[#allocation2 + $0x71] sm:$0xff]  ;;  %2234 = vmatpush3.bf16.msra.mxu0 %v2493_v3  ;;  %v1179_v3 = vpack.c.bf16 %v2923_v50, %v2887_v42 }
 0x129   : > { %v2952_v15 = vld [vmem:[#allocation2 + $0x72] sm:$0xff]  ;;  %2266 = vmatpush3.bf16.msra.mxu1 %v2492_v2  ;;  %v2954_v16 = vpack.c.bf16 %v568_v13, %v567_v6  ;;  %v2502_v2 = vld [vmem:[%s3229_s3 + $0xc0] sm:$0xff]   ;;  %v2507_v6 = vld [vmem:[%s3229_s3 + $0xe8] sm:$0xff]  }
 0x12a   : > { %v2958_v17 = vpack.c.bf16 %v2952_v15, %v2950_v14  ;;  %2275 = vmatprep.subr.bf16.mxu1 %v2494_v4  ;;  %v548_v53 = vld [vmem:[#allocation2 + $0x70] sm:$0xff]  ;;  %v2982_v54 = vld [vmem:[#allocation2 + $0x80] sm:$0xff]  ;;  %v2505_v50 = vld [vmem:[%s3229_s3 + $0xd8] sm:$0xff]  }
 0x12b   : > { %2224 = vmatmul.mubr.msk.bf16.gmra.mrb[20].mxu0 %vm510_vm0, %v2954_v16  ;;  %v552_v55 = vpack.c.bf16 %v548_v53, %v917_v35  ;;  %v923_v56 = vpack.c.bf16 %v2982_v54, %v548_v53  ;;  %v3007_v0 = vld [vmem:[#allocation2 + $0x81] sm:$0xff]  ;;  %v2509_v14 = vld [vmem:[%s3229_s3 + $0xf8] sm:$0xff]  }
 0x12c   : > { %2256 = vmatmul.mubr.msk.bf16.gmra.mrb[4].mxu1 %vm510_vm0, %v2958_v17  ;;  %2235 = vmatprep.mubr.msk.bf16.mxu0 %vm510_vm0, %v549_v18  ;;  %v1052_v40 = vpack.c.bf16 %v3007_v0, %v568_v13  ;;  %v1177_v5 = vld [vmem:[#allocation2 + $0x82] sm:$0xff]  ;;  %v1311_v13 = vpack.c.bf16 %v1307_v8, %v2982_v54  ;;  %v2519_v35 = vld [vmem:[%s3231_s5 + $0x14] ss:$8 sps:$4 sm:$0xff]  }
 0x12d   : > { %2267 = vmatprep.mubr.msk.bf16.mxu1 %vm510_vm0, %v920_v23  ;;  %v1181_v42 = vpack.c.bf16 %v1177_v5, %v2952_v15  ;;  %v2510_v15 = vld [vmem:[%s3229_s3 + $0x100] sm:$0xff]   ;;  %v2511_v18 = vld [vmem:[%s3229_s3 + $0x108] sm:$0xff]   ;;  %v1436_v23 = vld [vmem:[#allocation2 + $0x91] sm:$0xff] }
 0x12e   : > { %v1440_v24 = vpack.c.bf16 %v1436_v23, %v3007_v0 }
 0x133   : > { %2236 = vmatmul.mubr.msk.bf16.vlgmr.msra.gmra.mrb[16].mxu0 %vm510_vm0, %v2966_v36 }
 0x134   : > { %2268 = vmatmul.mubr.msk.bf16.vlgmr.msra.gmra.mrb[0].mxu1 %vm510_vm0, %v921_v43  ;;  %2239 = vmatprep.mubr.msk.bf16.mxu0 %vm510_vm0, %v2971_v47  ;;  %v2525_v43 = vld [vmem:[%s3231_s5 + $0x34] ss:$8 sps:$4 sm:$0xff]  }
 0x135   : > { %2276 = vmatpush3.bf16.msra.mxu1 %v2494_v4  ;;  %2271 = vmatprep.mubr.msk.bf16.mxu1 %vm510_vm0, %v922_v48  ;;  %v2503_v4 = vld [vmem:[%s3229_s3 + $0xc8] sm:$0xff]  }
 0x136   : > { %2277 = vmatprep.subr.bf16.mxu1 %v2495_v44 }
 0x139   : > { %2278 = vmatpush3.bf16.msra.mxu1 %v2495_v44  ;;  %v2523_v44 = vld [vmem:[%s3231_s5 + $0x30] ss:$8 sps:$4 sm:$0xff]  }
 0x13a   : > { %2279 = vmatprep.subr.bf16.mxu1 %v2496_v51 }
 0x13b   : > { %2240 = vmatmul.mubr.msk.bf16.gmra.mrb[20].mxu0 %vm510_vm0, %v552_v55 }
 0x13c   : > { %2272 = vmatmul.mubr.msk.bf16.gmra.mrb[4].mxu1 %vm510_vm0, %v923_v56 }
 0x13d   : > { %2280 = vmatpush3.bf16.msra.mxu1 %v2496_v51  ;;  %2283 = vmatprep.mubr.msk.bf16.mxu1 %vm510_vm0, %v1049_v58 }
 0x13e   : > { %2281 = vmatprep.subr.bf16.mxu1 %v2497_v57 }
 0x141   : > { %2282 = vmatpush3.bf16.msra.mxu1 %v2497_v57 }
 0x142   : > { %2291 = vmatprep.subr.bf16.mxu1 %v2498_v59 }
 0x144   : > { %2284 = vmatmul.mubr.msk.bf16.vlgmr.msra.gmra.mrb[0].mxu1 %vm510_vm0, %v1050_v60  ;;  %v2079_v60 = vld [vmem:[%s3230_s4] ss:$0 sm:$0xff] }
 0x145   : > { %2292 = vmatpush3.bf16.msra.mxu1 %v2498_v59  ;;  %2287 = vmatprep.mubr.msk.bf16.mxu1 %vm510_vm0, %v1051_v39 }
 0x146   : > { %2293 = vmatprep.subr.bf16.mxu1 %v2499_v9 }
 0x149   : > { %2294 = vmatpush3.bf16.msra.mxu1 %v2499_v9 }
 0x14a   : > { %2295 = vmatprep.subr.bf16.mxu1 %v2500_v61 }
 0x14c   : > { %2288 = vmatmul.mubr.msk.bf16.gmra.mrb[4].mxu1 %vm510_vm0, %v1052_v40 }
 0x14d   : > { %2296 = vmatpush3.bf16.msra.mxu1 %v2500_v61  ;;  %2299 = vmatprep.mubr.msk.bf16.mxu1 %vm510_vm0, %v1178_v49 }
 0x14e   : > { %2297 = vmatprep.subr.bf16.mxu1 %v2501_v62 }
 0x151   : > { %2298 = vmatpush3.bf16.msra.mxu1 %v2501_v62 }
 0x152   : > { %2307 = vmatprep.subr.bf16.mxu1 %v2502_v2 }
 0x154   : > { %2300 = vmatmul.mubr.msk.bf16.vlgmr.msra.gmra.mrb[0].mxu1 %vm510_vm0, %v1179_v3 }
 0x155   : > { %2308 = vmatpush3.bf16.msra.mxu1 %v2502_v2  ;;  %2303 = vmatprep.mubr.msk.bf16.mxu1 %vm510_vm0, %v1180_v10 }
 0x156   : > { %2309 = vmatprep.subr.bf16.mxu1 %v2503_v4 }
 0x159   : > { %2310 = vmatpush3.bf16.msra.mxu1 %v2503_v4 }
 0x15a   : > { %2311 = vmatprep.subr.bf16.mxu1 %v2504_v41 }
 0x15c   : > { %2304 = vmatmul.mubr.msk.bf16.gmra.mrb[4].mxu1 %vm510_vm0, %v1181_v42 }
 0x15d   : > { %2312 = vmatpush3.bf16.msra.mxu1 %v2504_v41  ;;  %2315 = vmatprep.mubr.msk.bf16.mxu1 %vm510_vm0, %v2966_v36  ;;  %v2520_v36 = vld [vmem:[%s3231_s5 + $0x20] ss:$8 sps:$4 sm:$0xff]  }
 0x15e   : > { %2313 = vmatprep.subr.bf16.mxu1 %v2505_v50 }
 0x161   : > { %2314 = vmatpush3.bf16.msra.mxu1 %v2505_v50 }
 0x162   : > { %2323 = vmatprep.subr.bf16.mxu1 %v2506_v63 }
 0x164   : > { %2316 = vmatmul.mubr.msk.bf16.vlgmr.msra.gmra.mrb[0].mxu1 %vm510_vm0, %v2971_v47  ;;  %v2591_v47 = vmov 0  }
 0x165   : > { %2324 = vmatpush3.bf16.msra.mxu1 %v2506_v63  ;;  %2319 = vmatprep.mubr.msk.bf16.mxu1 %vm510_vm0, %v552_v55 }
 0x166   : > { %2325 = vmatprep.subr.bf16.mxu1 %v2507_v6  ;;  %1818 = vmatprep.mubr.bf16.mxu0 %v2591_v47 }
 0x169   : > { %2326 = vmatpush3.bf16.msra.mxu1 %v2507_v6 }
 0x16a   : > { %2327 = vmatprep.subr.bf16.mxu1 %v2508_v7 }
 0x16c   : > { %2320 = vmatmul.mubr.msk.bf16.gmra.mrb[4].mxu1 %vm510_vm0, %v1311_v13 }
 0x16d   : > { %2328 = vmatpush3.bf16.msra.mxu1 %v2508_v7  ;;  %2331 = vmatprep.mubr.msk.bf16.mxu1 %vm510_vm0, %v2892_v45  ;;  %v2512_v45 = vld [vmem:[%s3229_s3 + $0x110] sm:$0xff]  }
 0x16e   : > { %2329 = vmatprep.subr.bf16.mxu1 %v2509_v14 }
 0x171   : > { %2330 = vmatpush3.bf16.msra.mxu1 %v2509_v14 }
 0x172   : > { %2339 = vmatprep.subr.bf16.mxu1 %v2510_v15 }
 0x174   : > { %2332 = vmatmul.mubr.msk.bf16.vlgmr.msra.gmra.mrb[0].mxu1 %vm510_vm0, %v2930_v1  ;;  %v1565_v1 = vld [vmem:[#allocation2 + $0x92] sm:$0xff] }
 0x175   : > { %2340 = vmatpush3.bf16.msra.mxu1 %v2510_v15  ;;  %2335 = vmatprep.mubr.msk.bf16.mxu1 %vm510_vm0, %v2954_v16  ;;  %v1569_v16 = vpack.c.bf16 %v1565_v1, %v1177_v5 }
 0x176   : > { %2341 = vmatprep.subr.bf16.mxu1 %v2511_v18 }
 0x179   : > { %2342 = vmatpush3.bf16.msra.mxu1 %v2511_v18 }
 0x17a   : > { %2343 = vmatprep.subr.bf16.mxu1 %v2512_v45 }
 0x17c   : > { %2336 = vmatmul.mubr.msk.bf16.gmra.mrb[4].mxu1 %vm510_vm0, %v1440_v24 }
 0x17d   : > { %2344 = vmatpush3.bf16.msra.mxu1 %v2512_v45  ;;  %2347 = vmatprep.mubr.msk.bf16.mxu1 %vm510_vm0, %v2896_v46  ;;  %v2516_v46 = vld [vmem:[%s3231_s5 + $0x4] ss:$8 sps:$4 sm:$0xff]  }
 0x17e   : > { %2345 = vmatprep.subr.bf16.mxu1 %v2513_v29  ;;  %1786 = vmatprep.subr.bf16.mxu0 %v2516_v46 }
 0x17f   : > { %1787 = vmatpush1.bf16.msra.mxu0 %v2514_v30 }
 0x180   : > { %1788 = vmatprep.subr.bf16.mxu0 %v2519_v35 }
 0x181   : > { %2346 = vmatpush3.bf16.msra.mxu1 %v2513_v29 }
 0x184   : > { %2348 = vmatmul.mubr.msk.bf16.vlgmr.msra.gmra.mrb[0].mxu1 %vm510_vm0, %v2934_v52  ;;  %v2517_v52 = vld [vmem:[%s3231_s5 + $0x10] ss:$8 sps:$4 sm:$0xff]  }
 0x185   : > { %2351 = vmatprep.mubr.msk.bf16.mxu1 %vm510_vm0, %v2958_v17  ;;  %1789 = vmatpush1.bf16.msra.mxu0 %v2517_v52  ;;  %v2522_v17 = vld [vmem:[%s3231_s5 + $0x24] ss:$8 sps:$4 sm:$0xff]  }
 0x186   : > { %1790 = vmatprep.subr.bf16.mxu0 %v2522_v17 }
 0x189   : > { %1791 = vmatpush1.bf16.msra.mxu0 %v2520_v36 }
 0x18a   : > { %1792 = vmatprep.subr.bf16.mxu0 %v2525_v43  ;;  %v1724_v43 = vlaneseq }
 0x18c   : > { %2352 = vmatmul.mubr.msk.bf16.gmra.mrb[4].mxu1 %vm510_vm0, %v1569_v16 }
 0x18d   : > { %1793 = vmatpush1.bf16.msra.mxu0 %v2523_v44  ;;  %v1725_v44 = vshrl.u32 %v1724_v43, 7 }
 0x206   : > { %v2237_v48 = vpop.f32.mrb[16].mxu0 }
 0x207   : > { %v752_v51 = vpop.f32.mrb[17].mxu0 }
 0x208   : > { %v2238_v53 = vpop.f32.mrb[18].mxu0 }
 0x209   : > { %v755_v54 = vpop.f32.mrb[19].mxu0 }
 0x20e   : > { %v2241_v55 = vpop.f32.mrb[20].mxu0 }
 0x20f   : > { %v768_v56 = vpop.f32.mrb[21].mxu0 }
 0x210   : > { %v2242_v57 = vpop.f32.mrb[22].mxu0 }
 0x211   : > { %v771_v58 = vpop.f32.mrb[23].mxu0 }
 0x257   : > { %v2349_v59 = vpop.f32.mrb[0].mxu1 }
 0x258   : > { %v2355_v9 = vadd.f32 %v2349_v59, %v2237_v48  ;;  %v1648_v39 = vpop.f32.mrb[1].mxu1  ;;  %v1726_v48 = vsub.s32 0, %v1725_v44 }
 0x259   : > { %v2356_v61 = vadd.f32 %v1648_v39, %v752_v51  ;;  %v2350_v0 = vpop.f32.mrb[2].mxu1  ;;  %v1722_v51 = vld [vmem:[%s3232_s6] sm:$0x3] }
 0x25a   : > { %v1696_v40 = vadd.f32 %v2355_v9, %v2079_v60  ;;  %v2357_v62 = vadd.f32 %v2350_v0, %v2238_v53  ;;  %v1651_v49 = vpop.f32.mrb[3].mxu1  ;;  %v1730_v53 = vsub.s32 1, %v1725_v44 }
 0x25b   : > { %v1694_v2 = vadd.f32 %v2356_v61, %v2079_v60  ;;  %v2358_v3 = vadd.f32 %v1651_v49, %v755_v54  ;;  %v3117_v54 = vrot.slane %v1722_v51, %v1726_v48 }
 0x25c   : > { %v1697_v4 = vadd.f32 %v2357_v62, %v2079_v60  ;;  %v1704_v41 = vmax.f32 %v1696_v40, 0.0 }
 0x25d   : > { %v1695_v10 = vadd.f32 %v2358_v3, %v2079_v60  ;;  %v1702_v42 = vmax.f32 %v1694_v2, 0.0 }
 0x25e   : > { %v1705_v5 = vmax.f32 %v1697_v4, 0.0 }
 0x25f   : > { %v1703_v50 = vmax.f32 %v1695_v10, 0.0  ;;  %v2353_v63 = vpop.f32.mrb[4].mxu1 }
 0x260   : > { %v1711_v6 = vpack.c.bf16 %v1705_v5, %v1704_v41  ;;  %v2359_v7 = vadd.f32 %v2353_v63, %v2241_v55  ;;  %v1664_v8 = vpop.f32.mrb[5].mxu1  ;;  %v3120_v55 = vrot.slane %v1722_v51, %v1730_v53 }
 0x261   : > { %v1710_v13 = vpack.c.bf16 %v1703_v50, %v1702_v42  ;;  %v2360_v14 = vadd.f32 %v1664_v8, %v768_v56  ;;  %v2354_v15 = vpop.f32.mrb[6].mxu1 }
 0x262   : > { %v1700_v18 = vadd.f32 %v2359_v7, %v2079_v60  ;;  %v2361_v45 = vadd.f32 %v2354_v15, %v2242_v57  ;;  %v1667_v23 = vpop.f32.mrb[7].mxu1 }
 0x263   : > { %v1698_v24 = vadd.f32 %v2360_v14, %v2079_v60  ;;  %v2362_v29 = vadd.f32 %v1667_v23, %v771_v58  ;;  %2088 = vmatmul.mubr.msk.bf16.vlgmr.msra.gmra.mrb[24].mxu0 %vm510_vm0, %v1710_v13 }
 0x264   : > { %v1701_v1 = vadd.f32 %v2361_v45, %v2079_v60  ;;  %1828 = vmatprep.mubr.bf16.mxu0 %v2591_v47  ;;  %v1708_v30 = vmax.f32 %v1700_v18, 0.0 }
 0x265   : > { %v1699_v16 = vadd.f32 %v2362_v29, %v2079_v60  ;;  %v1706_v35 = vmax.f32 %v1698_v24, 0.0 }
 0x266   : > { %v1709_v46 = vmax.f32 %v1701_v1, 0.0 }
 0x267   : > { %v1707_v52 = vmax.f32 %v1699_v16, 0.0 }
 0x268   : > { %v1713_v17 = vpack.c.bf16 %v1709_v46, %v1708_v30 }
 0x269   : > { %v1712_v36 = vpack.c.bf16 %v1707_v52, %v1706_v35 }
 0x26b   : > { %2089 = vmatmul.mubr.msk.bf16.gmra.mrb[28].mxu0 %vm510_vm0, %v1711_v6 }
 0x26c   : > { %1838 = vmatprep.mubr.bf16.mxu0 %v2591_v47 }
 0x273   : > { %2090 = vmatmul.mubr.msk.bf16.gmra.mrb[32].mxu0 %vm510_vm0, %v1712_v36 }
 0x274   : > { %1848 = vmatprep.mubr.bf16.mxu0 %v2591_v47 }
 0x27b   : > { %2091 = vmatmul.mubr.msk.bf16.gmra.mrb[36].mxu0 %vm510_vm0, %v1713_v17 }
 0x336   : > { %v1820_v56 = vpop.f32.mrb[24].mxu0 }
 0x337   : > { %v1821_v47 = vadd.f32 %v1820_v56, %v3117_v54  ;;  %v1822_v57 = vpop.f32.mrb[25].mxu0 }
 0x338   : > { %v1823_v58 = vadd.f32 %v1822_v57, %v3120_v55  ;;  %v1824_v59 = vpop.f32.mrb[26].mxu0 }
 0x339   : > { %v1859_v60 = vadd.f32 %v1821_v47, %v2747_v19  ;;  %v1825_v9 = vadd.f32 %v1824_v59, %v3117_v54  ;;  %v1826_v39 = vpop.f32.mrb[27].mxu0 }
 0x33a   : > { %v1860_v61 = vadd.f32 %v1823_v58, %v2724_v11  ;;  %v1827_v0 = vadd.f32 %v1826_v39, %v3120_v55 }
 0x33b   : > { %v1875_v40 = vmax.f32 %v1859_v60, 0.0  ;;  %v1861_v62 = vadd.f32 %v1825_v9, %v2750_v20 }
 0x33c   : > { %v1876_v49 = vmax.f32 %v1860_v61, 0.0  ;;  %v1862_v2 = vadd.f32 %v1827_v0, %v2727_v12 }
 0x33d   : > { %1891 = vst [vmem:[%s3132_s20] sm:$0xff] %v1875_v40  ;;  %v1877_v19 = vmax.f32 %v1861_v62, 0.0 }
 0x33e   : > { %1892 = vst [vmem:[%s3132_s20 + $0x8] sm:$0xff] %v1876_v49  ;;  %v1878_v3 = vmax.f32 %v1862_v2, 0.0  ;;  %v1830_v4 = vpop.f32.mrb[28].mxu0 }
 0x33f   : > { %1893 = vst [vmem:[%s3132_s20 + $0x10] sm:$0xff] %v1877_v19  ;;  %v1831_v11 = vadd.f32 %v1830_v4, %v3117_v54  ;;  %v1832_v20 = vpop.f32.mrb[29].mxu0 }
 0x340   : > { %1894 = vst [vmem:[%s3132_s20 + $0x18] sm:$0xff] %v1878_v3  ;;  %v1833_v12 = vadd.f32 %v1832_v20, %v3120_v55  ;;  %v1834_v10 = vpop.f32.mrb[30].mxu0 }
 0x341   : > { %v1863_v41 = vadd.f32 %v1831_v11, %v2763_v25  ;;  %v1835_v5 = vadd.f32 %v1834_v10, %v3117_v54  ;;  %v1836_v42 = vpop.f32.mrb[31].mxu0 }
 0x342   : > { %v1864_v50 = vadd.f32 %v1833_v12, %v2753_v21  ;;  %v1837_v63 = vadd.f32 %v1836_v42, %v3120_v55 }
 0x343   : > { %v1879_v6 = vmax.f32 %v1863_v41, 0.0  ;;  %v1865_v7 = vadd.f32 %v1835_v5, %v2766_v26 }
 0x344   : > { %v1880_v8 = vmax.f32 %v1864_v50, 0.0  ;;  %v1866_v13 = vadd.f32 %v1837_v63, %v2756_v22 }
 0x345   : > { %1895 = vst [vmem:[%s3132_s20 + $0x20] sm:$0xff] %v1879_v6  ;;  %v1881_v14 = vmax.f32 %v1865_v7, 0.0 }
 0x346   : > { %1896 = vst [vmem:[%s3132_s20 + $0x28] sm:$0xff] %v1880_v8  ;;  %v1882_v15 = vmax.f32 %v1866_v13, 0.0  ;;  %v1840_v18 = vpop.f32.mrb[32].mxu0 }
 0x347   : > { %1897 = vst [vmem:[%s3132_s20 + $0x30] sm:$0xff] %v1881_v14  ;;  %v1841_v25 = vadd.f32 %v1840_v18, %v3117_v54  ;;  %v1842_v45 = vpop.f32.mrb[33].mxu0 }
 0x348   : > { %1898 = vst [vmem:[%s3132_s20 + $0x38] sm:$0xff] %v1882_v15  ;;  %v1843_v21 = vadd.f32 %v1842_v45, %v3120_v55  ;;  %v1844_v23 = vpop.f32.mrb[34].mxu0 }
 0x349   : > { %v1867_v26 = vadd.f32 %v1841_v25, %v2779_v31  ;;  %v1845_v22 = vadd.f32 %v1844_v23, %v3117_v54  ;;  %v1846_v24 = vpop.f32.mrb[35].mxu0 }
 0x34a   : > { %v1868_v29 = vadd.f32 %v1843_v21, %v2769_v27  ;;  %v1847_v1 = vadd.f32 %v1846_v24, %v3120_v55 }
 0x34b   : > { %v1883_v16 = vmax.f32 %v1867_v26, 0.0  ;;  %v1869_v30 = vadd.f32 %v1845_v22, %v2782_v32 }
 0x34c   : > { %v1884_v46 = vmax.f32 %v1868_v29, 0.0  ;;  %v1870_v35 = vadd.f32 %v1847_v1, %v2772_v28 }
 0x34d   : > { %1899 = vst [vmem:[%s3132_s20 + $0x40] sm:$0xff] %v1883_v16  ;;  %v1885_v52 = vmax.f32 %v1869_v30, 0.0 }
 0x34e   : > { %1900 = vst [vmem:[%s3132_s20 + $0x48] sm:$0xff] %v1884_v46  ;;  %v1886_v31 = vmax.f32 %v1870_v35, 0.0  ;;  %v1850_v17 = vpop.f32.mrb[36].mxu0 }
 0x34f   : > { %1901 = vst [vmem:[%s3132_s20 + $0x50] sm:$0xff] %v1885_v52  ;;  %v1851_v36 = vadd.f32 %v1850_v17, %v3117_v54  ;;  %v1852_v27 = vpop.f32.mrb[37].mxu0 }
 0x350   : > { %1902 = vst [vmem:[%s3132_s20 + $0x58] sm:$0xff] %v1886_v31  ;;  %v1853_v43 = vadd.f32 %v1852_v27, %v3120_v55  ;;  %v1854_v44 = vpop.f32.mrb[38].mxu0 }
 0x351   : > { %v1871_v32 = vadd.f32 %v1851_v36, %v2795_v37  ;;  %v1855_v28 = vadd.f32 %v1854_v44, %v3117_v54  ;;  %v1856_v48 = vpop.f32.mrb[39].mxu0 }
 0x352   : > { %v1872_v51 = vadd.f32 %v1853_v43, %v2785_v33  ;;  %v1857_v53 = vadd.f32 %v1856_v48, %v3120_v55 }
 0x353   : > { %v1887_v56 = vmax.f32 %v1871_v32, 0.0  ;;  %v1873_v47 = vadd.f32 %v1855_v28, %v2798_v38 }
 0x354   : > { %v1888_v57 = vmax.f32 %v1872_v51, 0.0  ;;  %v1874_v58 = vadd.f32 %v1857_v53, %v2788_v34 }
 0x355   : > { %1903 = vst [vmem:[%s3132_s20 + $0x60] sm:$0xff] %v1887_v56  ;;  %v1889_v37 = vmax.f32 %v1873_v47, 0.0 }
 0x356   : > { %1904 = vst [vmem:[%s3132_s20 + $0x68] sm:$0xff] %v1888_v57  ;;  %v1890_v33 = vmax.f32 %v1874_v58, 0.0 }
 0x357   : > { %1905 = vst [vmem:[%s3132_s20 + $0x70] sm:$0xff] %v1889_v37 }
 0x358   : > { %1906 = vst [vmem:[%s3132_s20 + $0x78] sm:$0xff] %v1890_v33 }
 0x359   : > { %2539 = shalt.err (!%p2536_p3)
}
 0x35a   : > { %s2540_s16 = scalar_lea.hbm %s3176_s8, 2048  ;;  %s2544_s19 = scalar_lea.hbm %s3233_s7, 4096 }
 0x35b   : > { %p2541_p4 = scmp.ne.s32.totalorder %s3176_s8, %s2540_s16  ;;  %p2545_p9 = scmp.lt.u32.totalorder %s3176_s8, %s3233_s7 }
 0x35c   : > { %p2546_p10 = scmp.lt.u32.totalorder %s2544_s19, %s2540_s16  ;;  %p2548_p12 = scmp.lt.u32.totalorder %s2540_s16, %s3176_s8 }
 0x35d   : > { %p2542_p7 = pnand %p2541_p4, %p2673_p5 }
 0x35e   : > { %p2547_p11 = por %p2546_p10, %p2545_p9 }
 0x35f   : > { %p2543_p8 = pneg %p2542_p7 }
 0x360   : > { %p2549_p13 = por %p2548_p12, %p2547_p11 }
 0x362   : > { %p2550_p0 = pnand %p2549_p13, %p2543_p8 }
 0x364   : > { %2553 = shalt.err (!%p2550_p0)
}
 0x365   : > { %s2593_s23 = smov 256   ;;  %s2594_s29 = smov 16  }
 0x366   : > { %2419 = dma.vmem_to_hbm [thread:$0]  (%p2673_p5), %s3178_s21, 2048, %s3176_s8, %s3185_s28, %s2593_s23, %s2593_s23, %s2594_s29  }
 0x367 PF: > { %p2425_p1 = scmp.ge.s32.totalorder %s2588_s27, 2  ;;  %s1936_s9 = sand.u32 1, %s2576_s24  }
 0x368   : > { %s1937_s13 = scalar_lea.sflag [#allocation4], %s1936_s9 }
 0x369   : > { %p2422_p2 = pnand %p2425_p1, %p2677_p6 }
 0x36b   : > { %2571 = dma.done.wait (!%p2422_p2), %s1937_s13, 2048  }
 0x36c   : > { %2573 = vsyncadd (!%p2422_p2), %s1937_s13, 4294965248  ;;  %p17_p3 = scmp.ge.s32.totalorder %s2660_s30, 4   ;;  %s3236_s24 = smov %s2580_s25 }
 0x36d   : > { %s3237_s25 = smov %s2584_s26  ;;  %s3238_s26 = smov %s2671_s10 }
 0x36e   : > { %s3239_s27 = smov %s2660_s30  ;;  %19 = sbr.rel (!%p17_p3) target bundleno = 3 (0x3), region = 85 }
 0x375   :  { %1942 = vsyncpa [#allocation4], 1 }
 0x376   :  { %1944 = vsyncpa [#allocation4 + $0x1], 1 }

</bundles_post_ra>
